<compile_context>
chip_gen: v5e
topology: v5e:2x2
jax: 0.10.0
libtpu: 0.0.40
codegen_flags: <defaults>
</compile_context>

<pallas_src>
import functools

import jax
import jax.numpy as jnp
from jax.experimental import pallas as pl
from jax.experimental.pallas import tpu as pltpu

LANE = 128   # every feature dim is zero-padded to one full lane width
HALF = 64    # logvar lanes start here in the fused mu|logvar slab


def _vae_kernel(xe_ref, w_ref, b_ref, recon_ref, mlv_ref):
    """One batch tile of the full VAE forward.

    xe_ref:    (TB, 128)      bf16  input slab: eps in lanes [0,Z), x in [Z,Z+D), 0 elsewhere
    w_ref:     (8, 128, 128)  bf16  packed layer weights (in, out), zero-padded
                                    (layer 3 = fused fc21|fc22; fc1 rows offset by Z)
    b_ref:     (8, 1, 128)    f32   packed layer biases, zero-padded
    recon_ref: (TB, 128)      bf16  sigmoid output (cols >= input_dim hold 0.5)
    mlv_ref:   (TB, 128)      bf16  mu in lanes [0,Z), logvar in lanes [64,64+Z)
    """

    def linear(h_bf16, layer):
        # bf16 operands on the MXU, f32 accumulation, f32 bias add.
        return (jnp.dot(h_bf16, w_ref[layer], preferred_element_type=jnp.float32)
                + b_ref[layer])

    def relu_cast(v):
        # relu in f32, then round to bf16 for the next MXU pass.
        return jnp.maximum(v, 0.0).astype(jnp.bfloat16)

    xe = xe_ref[...]                                   # (TB, 128) bf16: eps | x | 0

    # ----- encoder -----
    h1 = relu_cast(linear(xe, 0))                      # fc1   : -> 100 (eps lanes hit zero rows)
    h2 = relu_cast(linear(h1, 1))                      # fc1_2 : -> 50
    h3 = relu_cast(linear(h2, 2))                      # fc1_3 : -> 50
    mlv = linear(h3, 3)                                # fused fc21|fc22: mu@[0,Z), logvar@[64,64+Z)

    # ----- reparameterize (training mode) -----
    lv = pltpu.roll(mlv, shift=HALF, axis=1)           # logvar aligned to lanes [0,Z) (XLU, ~free)
    std = jnp.exp(0.5 * lv)                            # pad lanes: exp(0) = 1 (finite)
    # z lanes [0,Z) = mu + eps*std.  Other lanes carry finite junk (x values,
    # logvar copies) that is annihilated by the zero-padded fc3 weight rows.
    z = mlv + xe.astype(jnp.float32) * std

    # ----- decoder -----
    d1 = relu_cast(linear(z.astype(jnp.bfloat16), 4))  # fc3   : z -> 50
    d2 = relu_cast(linear(d1, 5))                      # fc3_1 : -> 50
    d3 = relu_cast(linear(d2, 6))                      # fc3_2 : -> 100
    logits = linear(d3, 7)                             # fc4   : -> input_dim
    recon = 0.5 * (jnp.tanh(0.5 * logits) + 1.0)       # sigmoid via single EUP tanh

    # Lane-dense bf16 stores: full 128-lane aligned slabs, no masked partial stores.
    recon_ref[...] = recon.astype(jnp.bfloat16)
    mlv_ref[...] = mlv.astype(jnp.bfloat16)


def _round_up(n, m):
    return ((n + m - 1) // m) * m


def init_params(key, input_dim, z_dim=2):
    """PyTorch-Linear-style init: U(-1/sqrt(fan_in), 1/sqrt(fan_in)).
    Weights stored as (in, out); biases as (1, out)."""
    dims = [
        ("fc1", input_dim, 100),
        ("fc1_2", 100, 50),
        ("fc1_3", 50, 50),
        ("fc21", 50, z_dim),
        ("fc22", 50, z_dim),
        ("fc3", z_dim, 50),
        ("fc3_1", 50, 50),
        ("fc3_2", 50, 100),
        ("fc4", 100, input_dim),
    ]
    params = []
    for _, fan_in, fan_out in dims:
        key, kw, kb = jax.random.split(key, 3)
        bound = 1.0 / jnp.sqrt(fan_in)
        w = jax.random.uniform(kw, (fan_in, fan_out), jnp.float32, -bound, bound)
        b = jax.random.uniform(kb, (1, fan_out), jnp.float32, -bound, bound)
        params.extend([w, b])
    return params


def pack_vae_params(params, input_dim, z_dim, pad=LANE):
    """Pack the 9 PyTorch layers into 8 padded matmul slots:
       0: fc1 (rows offset by z_dim to match the eps|x input slab)
       1: fc1_2   2: fc1_3
       3: fused fc21 (cols [0,Z)) | fc22 (cols [HALF,HALF+Z))
       4: fc3     5: fc3_1   6: fc3_2   7: fc4
    Weights -> (8, pad, pad) bf16, biases -> (8, 1, pad) f32."""
    assert input_dim + z_dim <= pad and HALF + z_dim <= pad and z_dim <= HALF
    ws, bs = list(params[0::2]), list(params[1::2])
    w_stack = jnp.zeros((8, pad, pad), jnp.float32)
    b_stack = jnp.zeros((8, 1, pad), jnp.float32)

    def place(slot, w, b, row_off=0, col_off=0):
        nonlocal w_stack, b_stack
        r, c = w.shape
        assert row_off + r <= pad and col_off + c <= pad, "feature dim > 128"
        w_stack = w_stack.at[slot, row_off:row_off + r, col_off:col_off + c].set(w)
        b_stack = b_stack.at[slot, 0, col_off:col_off + c].set(b.reshape(-1))

    place(0, ws[0], bs[0], row_off=z_dim)      # fc1 (x at lanes [Z, Z+D))
    place(1, ws[1], bs[1])                     # fc1_2
    place(2, ws[2], bs[2])                     # fc1_3
    place(3, ws[3], bs[3])                     # fc21 -> lanes [0, Z)
    place(3, ws[4], bs[4], col_off=HALF)       # fc22 -> lanes [HALF, HALF+Z)
    place(4, ws[5], bs[5])                     # fc3
    place(5, ws[6], bs[6])                     # fc3_1
    place(6, ws[7], bs[7])                     # fc3_2
    place(7, ws[8], bs[8])                     # fc4
    return w_stack.astype(jnp.bfloat16), b_stack


@functools.partial(jax.jit, static_argnames=("tile_b",))
def vae_forward(x, eps, w_stack, b_stack, *, tile_b=512):
    B, D = x.shape
    Z = eps.shape[1]
    n_layers = w_stack.shape[0]
    assert D + Z <= LANE and HALF + Z <= LANE and Z <= HALF

    # Tile choice: default 512 rows; for small batches cap so the grid still
    # has >= 2 steps (keeps both v7x TensorCores busy). Multiple of 16 for bf16.
    tile = min(tile_b, _round_up(max(1, (B + 1) // 2), 16))
    b_pad = _round_up(B, tile)

    # Single combined bf16 input slab: eps in lanes [0,Z), x in lanes [Z,Z+D).
    xe = jnp.zeros((b_pad, LANE), jnp.bfloat16)
    xe = xe.at[:B, :Z].set(eps.astype(jnp.bfloat16))
    xe = xe.at[:B, Z:Z + D].set(x.astype(jnp.bfloat16))

    cost = pl.CostEstimate(
        flops=2 * b_pad * n_layers * LANE * LANE,
        transcendentals=2 * b_pad * LANE,                    # exp (reparam) + tanh (sigmoid)
        bytes_accessed=(xe.size * 2 + w_stack.size * 2 + b_stack.size * 4
                        + 2 * b_pad * LANE * 2))             # two bf16 output slabs

    recon_p, mlv_p = pl.pallas_call(
        _vae_kernel,
        grid=(b_pad // tile,),
        in_specs=[
            pl.BlockSpec((tile, LANE), lambda i: (i, 0)),             # eps|x slab (batch-tiled)
            pl.BlockSpec((n_layers, LANE, LANE), lambda i: (0, 0, 0)),  # weights (VMEM-resident)
            pl.BlockSpec((n_layers, 1, LANE), lambda i: (0, 0, 0)),     # biases  (VMEM-resident)
        ],
        out_specs=(
            pl.BlockSpec((tile, LANE), lambda i: (i, 0)),             # recon (bf16, padded)
            pl.BlockSpec((tile, LANE), lambda i: (i, 0)),             # fused mu|logvar (bf16)
        ),
        out_shape=(
            jax.ShapeDtypeStruct((b_pad, LANE), jnp.bfloat16),
            jax.ShapeDtypeStruct((b_pad, LANE), jnp.bfloat16),
        ),
        compiler_params=pltpu.CompilerParams(
            dimension_semantics=("parallel",)),
        cost_estimate=cost,
    )(xe, w_stack, b_stack)

    recon = recon_p[:B, :D].astype(jnp.float32)
    mu = mlv_p[:B, :Z].astype(jnp.float32)
    logvar = mlv_p[:B, HALF:HALF + Z].astype(jnp.float32)
    return recon, mu, logvar


def vae_forward_ref(x, eps, params):
    """Plain-JAX reference with matching numerics (bf16 matmul operands,
    f32 accumulation, bf16-rounded eps, f32 elementwise)."""
    ws = [w.astype(jnp.bfloat16) for w in params[0::2]]
    bs = list(params[1::2])

    def lin(h, i):
        return jnp.dot(h.astype(jnp.bfloat16), ws[i],
                       preferred_element_type=jnp.float32) + bs[i]

    relu = lambda v: jnp.maximum(v, 0.0)
    h1 = relu(lin(x, 0))
    h2 = relu(lin(h1, 1))
    h3 = relu(lin(h2, 2))
    mu = lin(h3, 3)
    logvar = lin(h3, 4)
    eps_b = eps.astype(jnp.bfloat16).astype(jnp.float32)   # kernel folds eps in bf16
    z = mu + eps_b * jnp.exp(0.5 * logvar)
    d1 = relu(lin(z, 5))
    d2 = relu(lin(d1, 6))
    d3 = relu(lin(d2, 7))
    recon = jax.nn.sigmoid(lin(d3, 8))
    return recon, mu, logvar


if __name__ == "__main__":
    B = 1024         # two 512-row batch tiles -> exercises the grid / megacore path
    INPUT_DIM = 16   # UCI feature dim (synthetic)
    Z_DIM = 2

    key = jax.random.PRNGKey(0)
    key, kx, keps, kparams = jax.random.split(key, 4)

    x = jax.random.uniform(kx, (B, INPUT_DIM), jnp.float32)   # bounded like UCI data
    eps = jax.random.normal(keps, (B, Z_DIM), jnp.float32)    # reparam noise
    params = init_params(kparams, INPUT_DIM, Z_DIM)
    w_stack, b_stack = pack_vae_params(params, INPUT_DIM, Z_DIM)

    recon, mu, logvar = jax.block_until_ready(
        vae_forward(x, eps, w_stack, b_stack, tile_b=512))

    # sanity-check against a plain-JAX reference of the same math
    recon_r, mu_r, logvar_r = vae_forward_ref(x, eps, params)
    assert recon.shape == (B, INPUT_DIM)
    assert mu.shape == (B, Z_DIM) and logvar.shape == (B, Z_DIM)
    assert jnp.allclose(recon, recon_r, atol=2e-2), "recon mismatch"
    assert jnp.allclose(mu, mu_r, atol=2e-2), "mu mismatch"
    assert jnp.allclose(logvar, logvar_r, atol=2e-2), "logvar mismatch"

    print("KERNEL_OK")
</pallas_src>

<mosaic_0001>
module attributes {stable_mosaic.version = 11 : i64} {
  func.func @_vae_kernel(%arg0: i32, %arg1: memref<512x128xbf16, #tpu.memory_space<vmem>>, %arg2: memref<8x128x128xbf16, #tpu.memory_space<vmem>>, %arg3: memref<8x1x128xf32, #tpu.memory_space<vmem>>, %arg4: memref<512x128xbf16, #tpu.memory_space<vmem>>, %arg5: memref<512x128xbf16, #tpu.memory_space<vmem>>) attributes {dimension_semantics = [#tpu.dimension_semantics<parallel>], iteration_bounds = array<i64: 2>, scalar_prefetch = 0 : i64, scratch_operands = 0 : i64, tpu.core_type = #tpu.core_type<tc>, window_params = [{transform_indices = @transform_0, window_bounds = array<i64: 512, 128>}, {pipeline_mode = #tpu.pipeline_mode<synchronous>, transform_indices = @transform_1, window_bounds = array<i64: 8, 128, 128>}, {pipeline_mode = #tpu.pipeline_mode<synchronous>, transform_indices = @transform_2, window_bounds = array<i64: 8, 1, 128>}, {transform_indices = @transform_3, window_bounds = array<i64: 512, 128>}, {transform_indices = @transform_4, window_bounds = array<i64: 512, 128>}]} {
    %c0 = arith.constant 0 : index
    %c0_0 = arith.constant 0 : index
    %0 = vector.load %arg1[%c0, %c0_0] : memref<512x128xbf16, #tpu.memory_space<vmem>>, vector<512x128xbf16>
    %c0_1 = arith.constant 0 : index
    %c0_2 = arith.constant 0 : index
    %c0_3 = arith.constant 0 : index
    %1 = vector.load %arg2[%c0_1, %c0_2, %c0_3] : memref<8x128x128xbf16, #tpu.memory_space<vmem>>, vector<1x128x128xbf16>
    %2 = vector.shape_cast %1 : vector<1x128x128xbf16> to vector<128x128xbf16>
    %cst = arith.constant dense<0.000000e+00> : vector<512x128xf32>
    %3 = tpu.matmul %0, %2, %cst {dimension_numbers = #tpu.dot_dimension_numbers<[1], [0], [0], [1], [0, 0, 1, 1], [], []>} : vector<512x128xbf16>, vector<128x128xbf16>, vector<512x128xf32> -> vector<512x128xf32>
    %c0_4 = arith.constant 0 : index
    %c0_5 = arith.constant 0 : index
    %c0_6 = arith.constant 0 : index
    %4 = vector.load %arg3[%c0_4, %c0_5, %c0_6] : memref<8x1x128xf32, #tpu.memory_space<vmem>>, vector<1x1x128xf32>
    %5 = vector.shape_cast %4 : vector<1x1x128xf32> to vector<1x128xf32>
    %6 = vector.broadcast %5 : vector<1x128xf32> to vector<512x128xf32>
    %7 = arith.addf %3, %6 : vector<512x128xf32>
    %cst_7 = arith.constant 0.000000e+00 : f32
    %8 = vector.broadcast %cst_7 : f32 to vector<512x128xf32>
    %9 = arith.maximumf %7, %8 : vector<512x128xf32>
    %10 = arith.truncf %9 : vector<512x128xf32> to vector<512x128xbf16>
    %c1 = arith.constant 1 : index
    %c0_8 = arith.constant 0 : index
    %c0_9 = arith.constant 0 : index
    %11 = vector.load %arg2[%c1, %c0_8, %c0_9] : memref<8x128x128xbf16, #tpu.memory_space<vmem>>, vector<1x128x128xbf16>
    %12 = vector.shape_cast %11 : vector<1x128x128xbf16> to vector<128x128xbf16>
    %cst_10 = arith.constant dense<0.000000e+00> : vector<512x128xf32>
    %13 = tpu.matmul %10, %12, %cst_10 {dimension_numbers = #tpu.dot_dimension_numbers<[1], [0], [0], [1], [0, 0, 1, 1], [], []>} : vector<512x128xbf16>, vector<128x128xbf16>, vector<512x128xf32> -> vector<512x128xf32>
    %c1_11 = arith.constant 1 : index
    %c0_12 = arith.constant 0 : index
    %c0_13 = arith.constant 0 : index
    %14 = vector.load %arg3[%c1_11, %c0_12, %c0_13] : memref<8x1x128xf32, #tpu.memory_space<vmem>>, vector<1x1x128xf32>
    %15 = vector.shape_cast %14 : vector<1x1x128xf32> to vector<1x128xf32>
    %16 = vector.broadcast %15 : vector<1x128xf32> to vector<512x128xf32>
    %17 = arith.addf %13, %16 : vector<512x128xf32>
    %cst_14 = arith.constant 0.000000e+00 : f32
    %18 = vector.broadcast %cst_14 : f32 to vector<512x128xf32>
    %19 = arith.maximumf %17, %18 : vector<512x128xf32>
    %20 = arith.truncf %19 : vector<512x128xf32> to vector<512x128xbf16>
    %c2 = arith.constant 2 : index
    %c0_15 = arith.constant 0 : index
    %c0_16 = arith.constant 0 : index
    %21 = vector.load %arg2[%c2, %c0_15, %c0_16] : memref<8x128x128xbf16, #tpu.memory_space<vmem>>, vector<1x128x128xbf16>
    %22 = vector.shape_cast %21 : vector<1x128x128xbf16> to vector<128x128xbf16>
    %cst_17 = arith.constant dense<0.000000e+00> : vector<512x128xf32>
    %23 = tpu.matmul %20, %22, %cst_17 {dimension_numbers = #tpu.dot_dimension_numbers<[1], [0], [0], [1], [0, 0, 1, 1], [], []>} : vector<512x128xbf16>, vector<128x128xbf16>, vector<512x128xf32> -> vector<512x128xf32>
    %c2_18 = arith.constant 2 : index
    %c0_19 = arith.constant 0 : index
    %c0_20 = arith.constant 0 : index
    %24 = vector.load %arg3[%c2_18, %c0_19, %c0_20] : memref<8x1x128xf32, #tpu.memory_space<vmem>>, vector<1x1x128xf32>
    %25 = vector.shape_cast %24 : vector<1x1x128xf32> to vector<1x128xf32>
    %26 = vector.broadcast %25 : vector<1x128xf32> to vector<512x128xf32>
    %27 = arith.addf %23, %26 : vector<512x128xf32>
    %cst_21 = arith.constant 0.000000e+00 : f32
    %28 = vector.broadcast %cst_21 : f32 to vector<512x128xf32>
    %29 = arith.maximumf %27, %28 : vector<512x128xf32>
    %30 = arith.truncf %29 : vector<512x128xf32> to vector<512x128xbf16>
    %c3 = arith.constant 3 : index
    %c0_22 = arith.constant 0 : index
    %c0_23 = arith.constant 0 : index
    %31 = vector.load %arg2[%c3, %c0_22, %c0_23] : memref<8x128x128xbf16, #tpu.memory_space<vmem>>, vector<1x128x128xbf16>
    %32 = vector.shape_cast %31 : vector<1x128x128xbf16> to vector<128x128xbf16>
    %cst_24 = arith.constant dense<0.000000e+00> : vector<512x128xf32>
    %33 = tpu.matmul %30, %32, %cst_24 {dimension_numbers = #tpu.dot_dimension_numbers<[1], [0], [0], [1], [0, 0, 1, 1], [], []>} : vector<512x128xbf16>, vector<128x128xbf16>, vector<512x128xf32> -> vector<512x128xf32>
    %c3_25 = arith.constant 3 : index
    %c0_26 = arith.constant 0 : index
    %c0_27 = arith.constant 0 : index
    %34 = vector.load %arg3[%c3_25, %c0_26, %c0_27] : memref<8x1x128xf32, #tpu.memory_space<vmem>>, vector<1x1x128xf32>
    %35 = vector.shape_cast %34 : vector<1x1x128xf32> to vector<1x128xf32>
    %36 = vector.broadcast %35 : vector<1x128xf32> to vector<512x128xf32>
    %37 = arith.addf %33, %36 : vector<512x128xf32>
    %c64_i32 = arith.constant 64 : i32
    %38 = tpu.dynamic_rotate %37 by %c64_i32 dim 1 : vector<512x128xf32>, i32 -> vector<512x128xf32>
    %cst_28 = arith.constant 5.000000e-01 : f32
    %39 = vector.broadcast %cst_28 : f32 to vector<512x128xf32>
    %40 = arith.mulf %39, %38 : vector<512x128xf32>
    %41 = math.exp %40 : vector<512x128xf32>
    %42 = arith.extf %0 : vector<512x128xbf16> to vector<512x128xf32>
    %43 = arith.mulf %42, %41 : vector<512x128xf32>
    %44 = arith.addf %37, %43 : vector<512x128xf32>
    %45 = arith.truncf %44 : vector<512x128xf32> to vector<512x128xbf16>
    %c4 = arith.constant 4 : index
    %c0_29 = arith.constant 0 : index
    %c0_30 = arith.constant 0 : index
    %46 = vector.load %arg2[%c4, %c0_29, %c0_30] : memref<8x128x128xbf16, #tpu.memory_space<vmem>>, vector<1x128x128xbf16>
    %47 = vector.shape_cast %46 : vector<1x128x128xbf16> to vector<128x128xbf16>
    %cst_31 = arith.constant dense<0.000000e+00> : vector<512x128xf32>
    %48 = tpu.matmul %45, %47, %cst_31 {dimension_numbers = #tpu.dot_dimension_numbers<[1], [0], [0], [1], [0, 0, 1, 1], [], []>} : vector<512x128xbf16>, vector<128x128xbf16>, vector<512x128xf32> -> vector<512x128xf32>
    %c4_32 = arith.constant 4 : index
    %c0_33 = arith.constant 0 : index
    %c0_34 = arith.constant 0 : index
    %49 = vector.load %arg3[%c4_32, %c0_33, %c0_34] : memref<8x1x128xf32, #tpu.memory_space<vmem>>, vector<1x1x128xf32>
    %50 = vector.shape_cast %49 : vector<1x1x128xf32> to vector<1x128xf32>
    %51 = vector.broadcast %50 : vector<1x128xf32> to vector<512x128xf32>
    %52 = arith.addf %48, %51 : vector<512x128xf32>
    %cst_35 = arith.constant 0.000000e+00 : f32
    %53 = vector.broadcast %cst_35 : f32 to vector<512x128xf32>
    %54 = arith.maximumf %52, %53 : vector<512x128xf32>
    %55 = arith.truncf %54 : vector<512x128xf32> to vector<512x128xbf16>
    %c5 = arith.constant 5 : index
    %c0_36 = arith.constant 0 : index
    %c0_37 = arith.constant 0 : index
    %56 = vector.load %arg2[%c5, %c0_36, %c0_37] : memref<8x128x128xbf16, #tpu.memory_space<vmem>>, vector<1x128x128xbf16>
    %57 = vector.shape_cast %56 : vector<1x128x128xbf16> to vector<128x128xbf16>
    %cst_38 = arith.constant dense<0.000000e+00> : vector<512x128xf32>
    %58 = tpu.matmul %55, %57, %cst_38 {dimension_numbers = #tpu.dot_dimension_numbers<[1], [0], [0], [1], [0, 0, 1, 1], [], []>} : vector<512x128xbf16>, vector<128x128xbf16>, vector<512x128xf32> -> vector<512x128xf32>
    %c5_39 = arith.constant 5 : index
    %c0_40 = arith.constant 0 : index
    %c0_41 = arith.constant 0 : index
    %59 = vector.load %arg3[%c5_39, %c0_40, %c0_41] : memref<8x1x128xf32, #tpu.memory_space<vmem>>, vector<1x1x128xf32>
    %60 = vector.shape_cast %59 : vector<1x1x128xf32> to vector<1x128xf32>
    %61 = vector.broadcast %60 : vector<1x128xf32> to vector<512x128xf32>
    %62 = arith.addf %58, %61 : vector<512x128xf32>
    %cst_42 = arith.constant 0.000000e+00 : f32
    %63 = vector.broadcast %cst_42 : f32 to vector<512x128xf32>
    %64 = arith.maximumf %62, %63 : vector<512x128xf32>
    %65 = arith.truncf %64 : vector<512x128xf32> to vector<512x128xbf16>
    %c6 = arith.constant 6 : index
    %c0_43 = arith.constant 0 : index
    %c0_44 = arith.constant 0 : index
    %66 = vector.load %arg2[%c6, %c0_43, %c0_44] : memref<8x128x128xbf16, #tpu.memory_space<vmem>>, vector<1x128x128xbf16>
    %67 = vector.shape_cast %66 : vector<1x128x128xbf16> to vector<128x128xbf16>
    %cst_45 = arith.constant dense<0.000000e+00> : vector<512x128xf32>
    %68 = tpu.matmul %65, %67, %cst_45 {dimension_numbers = #tpu.dot_dimension_numbers<[1], [0], [0], [1], [0, 0, 1, 1], [], []>} : vector<512x128xbf16>, vector<128x128xbf16>, vector<512x128xf32> -> vector<512x128xf32>
    %c6_46 = arith.constant 6 : index
    %c0_47 = arith.constant 0 : index
    %c0_48 = arith.constant 0 : index
    %69 = vector.load %arg3[%c6_46, %c0_47, %c0_48] : memref<8x1x128xf32, #tpu.memory_space<vmem>>, vector<1x1x128xf32>
    %70 = vector.shape_cast %69 : vector<1x1x128xf32> to vector<1x128xf32>
    %71 = vector.broadcast %70 : vector<1x128xf32> to vector<512x128xf32>
    %72 = arith.addf %68, %71 : vector<512x128xf32>
    %cst_49 = arith.constant 0.000000e+00 : f32
    %73 = vector.broadcast %cst_49 : f32 to vector<512x128xf32>
    %74 = arith.maximumf %72, %73 : vector<512x128xf32>
    %75 = arith.truncf %74 : vector<512x128xf32> to vector<512x128xbf16>
    %c7 = arith.constant 7 : index
    %c0_50 = arith.constant 0 : index
    %c0_51 = arith.constant 0 : index
    %76 = vector.load %arg2[%c7, %c0_50, %c0_51] : memref<8x128x128xbf16, #tpu.memory_space<vmem>>, vector<1x128x128xbf16>
    %77 = vector.shape_cast %76 : vector<1x128x128xbf16> to vector<128x128xbf16>
    %cst_52 = arith.constant dense<0.000000e+00> : vector<512x128xf32>
    %78 = tpu.matmul %75, %77, %cst_52 {dimension_numbers = #tpu.dot_dimension_numbers<[1], [0], [0], [1], [0, 0, 1, 1], [], []>} : vector<512x128xbf16>, vector<128x128xbf16>, vector<512x128xf32> -> vector<512x128xf32>
    %c7_53 = arith.constant 7 : index
    %c0_54 = arith.constant 0 : index
    %c0_55 = arith.constant 0 : index
    %79 = vector.load %arg3[%c7_53, %c0_54, %c0_55] : memref<8x1x128xf32, #tpu.memory_space<vmem>>, vector<1x1x128xf32>
    %80 = vector.shape_cast %79 : vector<1x1x128xf32> to vector<1x128xf32>
    %81 = vector.broadcast %80 : vector<1x128xf32> to vector<512x128xf32>
    %82 = arith.addf %78, %81 : vector<512x128xf32>
    %cst_56 = arith.constant 5.000000e-01 : f32
    %83 = vector.broadcast %cst_56 : f32 to vector<512x128xf32>
    %84 = arith.mulf %83, %82 : vector<512x128xf32>
    %85 = math.tanh %84 : vector<512x128xf32>
    %cst_57 = arith.constant 1.000000e+00 : f32
    %86 = vector.broadcast %cst_57 : f32 to vector<512x128xf32>
    %87 = arith.addf %85, %86 : vector<512x128xf32>
    %cst_58 = arith.constant 5.000000e-01 : f32
    %88 = vector.broadcast %cst_58 : f32 to vector<512x128xf32>
    %89 = arith.mulf %88, %87 : vector<512x128xf32>
    %90 = arith.truncf %89 : vector<512x128xf32> to vector<512x128xbf16>
    %c0_59 = arith.constant 0 : index
    %c0_60 = arith.constant 0 : index
    %91 = vector.load %arg4[%c0_59, %c0_60] : memref<512x128xbf16, #tpu.memory_space<vmem>>, vector<512x128xbf16>
    tpu.vector_store %arg4[%c0_59, %c0_60], %90 {strides = array<i32>} : memref<512x128xbf16, #tpu.memory_space<vmem>>, vector<512x128xbf16>,
    %92 = arith.truncf %37 : vector<512x128xf32> to vector<512x128xbf16>
    %c0_61 = arith.constant 0 : index
    %c0_62 = arith.constant 0 : index
    %93 = vector.load %arg5[%c0_61, %c0_62] : memref<512x128xbf16, #tpu.memory_space<vmem>>, vector<512x128xbf16>
    tpu.vector_store %arg5[%c0_61, %c0_62], %92 {strides = array<i32>} : memref<512x128xbf16, #tpu.memory_space<vmem>>, vector<512x128xbf16>,
    return
  }
  func.func @transform_0(%arg0: i32) -> (i32, i32) {
    %c0_i32 = arith.constant 0 : i32
    %c0_i32_0 = arith.constant 0 : i32
    return %arg0, %c0_i32 : i32, i32
  }
  func.func @transform_1(%arg0: i32) -> (i32, i32, i32) {
    %c0_i32 = arith.constant 0 : i32
    %c0_i32_0 = arith.constant 0 : i32
    %c0_i32_1 = arith.constant 0 : i32
    %c0_i32_2 = arith.constant 0 : i32
    return %c0_i32, %c0_i32_0, %c0_i32_1 : i32, i32, i32
  }
  func.func @transform_2(%arg0: i32) -> (i32, i32, i32) {
    %c0_i32 = arith.constant 0 : i32
    %c0_i32_0 = arith.constant 0 : i32
    %c0_i32_1 = arith.constant 0 : i32
    %c0_i32_2 = arith.constant 0 : i32
    return %c0_i32, %c0_i32_0, %c0_i32_1 : i32, i32, i32
  }
  func.func @transform_3(%arg0: i32) -> (i32, i32) {
    %c0_i32 = arith.constant 0 : i32
    %c0_i32_0 = arith.constant 0 : i32
    return %arg0, %c0_i32 : i32, i32
  }
  func.func @transform_4(%arg0: i32) -> (i32, i32) {
    %c0_i32 = arith.constant 0 : i32
    %c0_i32_0 = arith.constant 0 : i32
    return %arg0, %c0_i32 : i32, i32
  }
}

</mosaic_0001>

<bundles_post_ra>
// kernel: vae_forward.1
= control target key start
LH: loop header
LB: loop body
LE: loop exit
PB: predicated region body
PF: predicated region fallthrough
CT: control target
= control target key end

     0   :  { %s5416_s15 = smov 0   ;;  %s6757_s0 = inlined_call_operand.vmem [shape: bf16[1024,128], index: 0, kind: input, shape index: {}]   ;;  %s6758_s1 = inlined_call_operand.vmem [shape: bf16[8,128,128], index: 1, kind: input, shape index: {}]   ;;  %s6759_s2 = inlined_call_operand.vmem [shape: f32[8,1,128], index: 2, kind: input, shape index: {}]   ;;  %s6760_s3 = inlined_call_operand.vmem [shape: bf16[1024,128], index: 3, kind: output, shape index: {0}]   ;;  %s6761_s4 = inlined_call_operand.vmem [shape: bf16[1024,128], index: 4, kind: output, shape index: {1}]  }
   0x1 LB: > { %s4103_s16 = sadd.s32 4294967295, %s5388_s15   ;;  %p4107_p0 = scmp.ge.s32.totalorder %s5388_s15, 1  ;;  %s5388_s15 = sphi %s5416_s15, %s15_s15  }
   0x2   : > { %p166_p1 = scmp.lt.s32.totalorder %s5388_s15, 3 }
   0x4   : > { %p167_p2 = pnand %p4107_p0, %p166_p1 }
   0x5   : > { %s4108_s25 = sshll.u32 (!%p167_p2), %s4103_s16, 6  ;;  %s5390_s30 = smov (!%p167_p2), 64  }
   0x6   : > { %170 = sbr.rel (%p167_p2) target bundleno = 1824 (0x720), region = 32  ;;  %p198_p3 = scmp.lt.s32.totalorder (!%p167_p2), %s4108_s25, 127 }
   0xb   : > { %v4658_v0 = vld [vmem:[%s6758_s1 + $0x38] sm:$0xff]  ;;  %v4657_v1 = vld [vmem:[%s6758_s1 + $0x30] sm:$0xff]  ;;  %v4656_v2 = vld [vmem:[%s6758_s1 + $0x28] sm:$0xff]  ;;  %s6763_s25 = smov (!%p198_p3, %s4108_s25), 127 }
   0xc   : > { %539 = vmatpush.bf16.msra.mxu0 %v4658_v0  ;;  %v4655_v3 = vld [vmem:[%s6758_s1 + $0x20] sm:$0xff]  ;;  %v4654_v4 = vld [vmem:[%s6758_s1 + $0x18] sm:$0xff]  ;;  %v4653_v5 = vld [vmem:[%s6758_s1 + $0x10] sm:$0xff]  ;;  %s5445_s6 = sshll.u32 %s6763_s25, 2 }
   0xd   : > { %v4652_v6 = vld [vmem:[%s6758_s1 + $0x8] sm:$0xff]  ;;  %v4651_v7 = vld [vmem:[%s6758_s1] sm:$0xff]  ;;  %s5454_s11 = scalar_lea.vmem %s6757_s0, %s5445_s6  ;;  %v4666_v13 = vld [vmem:[%s6758_s1 + $0x78] sm:$0xff]  ;;  %s5756_s10 = scalar_lea.vmem %s6761_s4, %s5445_s6 }
   0xe   : > { %v4619_v8 = vld [vmem:[%s5454_s11] sm:$0xff]  ;;  %v4620_v9 = vld [vmem:[%s5454_s11 + $0x8] sm:$0xff]  ;;  %v4621_v10 = vld [vmem:[%s5454_s11 + $0x10] sm:$0xff]  ;;  %874 = vmatpush.bf16.msra.mxu1 %v4666_v13  ;;  %s6569_s28 = scalar_lea.vmem %s6760_s3, %s5445_s6 }
   0xf   : > { %v4622_v11 = vld [vmem:[%s5454_s11 + $0x18] sm:$0xff]  ;;  %v4623_v12 = vld [vmem:[%s5454_s11 + $0x20] sm:$0xff]  ;;  %v4624_v14 = vld [vmem:[%s5454_s11 + $0x28] sm:$0xff] }
  0x10   : > { %540 = vmatpush.bf16.msra.mxu0 %v4657_v1  ;;  %v4665_v15 = vld [vmem:[%s6758_s1 + $0x70] sm:$0xff]  ;;  %v4664_v16 = vld [vmem:[%s6758_s1 + $0x68] sm:$0xff]  ;;  %v4663_v17 = vld [vmem:[%s6758_s1 + $0x60] sm:$0xff] }
  0x11   : > { %v4662_v18 = vld [vmem:[%s6758_s1 + $0x58] sm:$0xff]  ;;  %v4625_v19 = vld [vmem:[%s5454_s11 + $0x30] sm:$0xff]  ;;  %v4660_v21 = vld [vmem:[%s6758_s1 + $0x48] sm:$0xff] }
  0x12   : > { %875 = vmatpush.bf16.msra.mxu1 %v4665_v15  ;;  %v4661_v20 = vld [vmem:[%s6758_s1 + $0x50] sm:$0xff]  ;;  %v4659_v22 = vld [vmem:[%s6758_s1 + $0x40] sm:$0xff]  ;;  %v4626_v23 = vld [vmem:[%s5454_s11 + $0x38] sm:$0xff] }
  0x13   : > { %v4627_v24 = vld [vmem:[%s5454_s11 + $0x40] sm:$0xff]  ;;  %v4628_v33 = vld [vmem:[%s5454_s11 + $0x48] sm:$0xff]  ;;  %v4629_v41 = vld [vmem:[%s5454_s11 + $0x50] sm:$0xff] }
  0x14   : > { %541 = vmatpush.bf16.msra.mxu0 %v4656_v2  ;;  %v5492_v26 = vld [vmem:[%s6759_s2] ss:$0 sm:$0xff]  ;;  %v4690_v42 = vld [vmem:[%s6758_s1 + $0x138] sm:$0xff]  ;;  %v4632_v2 = vld [vmem:[%s5454_s11 + $0x68] sm:$0xff] }
  0x15   : > { %v4630_v50 = vld [vmem:[%s5454_s11 + $0x58] sm:$0xff]  ;;  %v4631_v58 = vld [vmem:[%s5454_s11 + $0x60] sm:$0xff]  ;;  %v4689_v13 = vld [vmem:[%s6758_s1 + $0x130] sm:$0xff] }
  0x16   : > { %876 = vmatpush.bf16.msra.mxu1 %v4664_v16  ;;  %v4672_v15 = vld [vmem:[%s6758_s1 + $0xa8] sm:$0xff]  ;;  %v4671_v16 = vld [vmem:[%s6758_s1 + $0xa0] sm:$0xff] }
  0x18   : > { %542 = vmatpush.bf16.msra.mxu0 %v4655_v3 }
  0x1a   : > { %877 = vmatpush.bf16.msra.mxu1 %v4663_v17 }
  0x1c   : > { %543 = vmatpush.bf16.msra.mxu0 %v4654_v4 }
  0x1e   : > { %878 = vmatpush.bf16.msra.mxu1 %v4662_v18 }
  0x20   : > { %544 = vmatpush.bf16.msra.mxu0 %v4653_v5 }
  0x22   : > { %879 = vmatpush.bf16.msra.mxu1 %v4661_v20  ;;  %v4670_v20 = vld [vmem:[%s6758_s1 + $0x98] sm:$0xff] }
  0x24   : > { %545 = vmatpush.bf16.msra.mxu0 %v4652_v6 }
  0x26   : > { %880 = vmatpush.bf16.msra.mxu1 %v4660_v21 }
  0x28   : > { %546 = vmatpush.bf16.msra.mxu0 %v4651_v7  ;;  %v4674_v7 = vld [vmem:[%s6758_s1 + $0xb8] sm:$0xff] }
  0x29   : > { %1209 = vmatpush.bf16.msra.mxu2 %v4674_v7 }
  0x2a   : > { %881 = vmatpush.bf16.msra.mxu1 %v4659_v22 }
  0x2b   : > { %547 = vmatmul.bf16.vlgmr.msra.gmra.mxu0 %v4619_v8 }
  0x2c   : > { %2327 = vmatpush.bf16.msrb.mxu0 %v4690_v42 }
  0x30   : > { %2328 = vmatpush.bf16.msrb.mxu0 %v4689_v13 }
  0x3b   : > { %552 = vmatmul.bf16.gmra.mxu0 %v4620_v9 }
  0x4b   : > { %557 = vmatmul.bf16.gmra.mxu0 %v4621_v10 }
  0x5b   : > { %562 = vmatmul.bf16.gmra.mxu0 %v4622_v11  ;;  %v4673_v11 = vld [vmem:[%s6758_s1 + $0xb0] sm:$0xff] }
  0x5c   : > { %1210 = vmatpush.bf16.msra.mxu2 %v4673_v11  ;;  %v4698_v11 = vld [vmem:[%s6758_s1 + $0x178] sm:$0xff] }
  0x5d   : > { %2662 = vmatpush.bf16.msrb.mxu1 %v4698_v11  ;;  %v4697_v11 = vld [vmem:[%s6758_s1 + $0x170] sm:$0xff] }
  0x60   : > { %1211 = vmatpush.bf16.msra.mxu2 %v4672_v15 }
  0x61   : > { %2663 = vmatpush.bf16.msrb.mxu1 %v4697_v11 }
  0x64   : > { %1212 = vmatpush.bf16.msra.mxu2 %v4671_v16 }
  0x68   : > { %1213 = vmatpush.bf16.msra.mxu2 %v4670_v20 }
  0x6b   : > { %567 = vmatmul.bf16.gmra.mxu0 %v4623_v12  ;;  %v4633_v12 = vld [vmem:[%s5454_s11 + $0x70] sm:$0xff] }
  0x7b   : > { %572 = vmatmul.bf16.gmra.mxu0 %v4624_v14 }
  0x8b   : > { %577 = vmatmul.bf16.gmra.mxu0 %v4625_v19 }
  0x9b   : > { %582 = vmatmul.bf16.gmra.mxu0 %v4626_v23 }
  0xa8   : > { %v548_v25 = vpop.f32.mrf.mxu0 }
  0xa9   : > { %v549_v27 = vadd.f32 %v5492_v26, %v548_v25  ;;  %v4634_v25 = vld [vmem:[%s5454_s11 + $0x78] sm:$0xff] }
  0xab   : > { %587 = vmatmul.bf16.gmra.mxu0 %v4627_v24  ;;  %v708_v30 = vmax.f32 %v549_v27, 0.0  ;;  %v4669_v24 = vld [vmem:[%s6758_s1 + $0x90] sm:$0xff] }
  0xac   : > { %1214 = vmatpush.bf16.msra.mxu2 %v4669_v24 }
  0xb0   : > { %v550_v28 = vpop.f32.mrf.mxu0 }
  0xb1   : > { %v551_v29 = vadd.f32 %v5492_v26, %v550_v28  ;;  %v4668_v28 = vld [vmem:[%s6758_s1 + $0x88] sm:$0xff] }
  0xb2   : > { %1215 = vmatpush.bf16.msra.mxu2 %v4668_v28 }
  0xb3   : > { %v709_v31 = vmax.f32 %v551_v29, 0.0  ;;  %v4667_v29 = vld [vmem:[%s6758_s1 + $0x80] sm:$0xff] }
  0xb5   : > { %v772_v32 = vpack.c.bf16 %v709_v31, %v708_v30 }
  0xb6   : > { %1216 = vmatpush.bf16.msra.mxu2 %v4667_v29 }
  0xb7   : > { %882 = vmatmul.bf16.vlgmr.msra.gmra.mxu1 %v772_v32 }
  0xb8   : > { %v553_v34 = vpop.f32.mrf.mxu0 }
  0xb9   : > { %v554_v35 = vadd.f32 %v5492_v26, %v553_v34 }
  0xbb   : > { %592 = vmatmul.bf16.gmra.mxu0 %v4628_v33  ;;  %v710_v38 = vmax.f32 %v554_v35, 0.0 }
  0xc0   : > { %v555_v36 = vpop.f32.mrf.mxu0 }
  0xc1   : > { %v556_v37 = vadd.f32 %v5492_v26, %v555_v36  ;;  %v4635_v36 = vld [vmem:[%s5454_s11 + $0x80] sm:$0xff] }
  0xc3   : > { %v711_v39 = vmax.f32 %v556_v37, 0.0 }
  0xc5   : > { %v773_v40 = vpack.c.bf16 %v711_v39, %v710_v38 }
  0xc7   : > { %887 = vmatmul.bf16.gmra.mxu1 %v773_v40 }
  0xc8   : > { %v558_v43 = vpop.f32.mrf.mxu0 }
  0xc9   : > { %v559_v44 = vadd.f32 %v5492_v26, %v558_v43 }
  0xcb   : > { %597 = vmatmul.bf16.gmra.mxu0 %v4629_v41  ;;  %v712_v47 = vmax.f32 %v559_v44, 0.0 }
  0xd0   : > { %v560_v45 = vpop.f32.mrf.mxu0 }
  0xd1   : > { %v561_v46 = vadd.f32 %v5492_v26, %v560_v45  ;;  %v5553_v45 = vld [vmem:[%s6759_s2 + $0x1] ss:$0 sm:$0xff] }
  0xd3   : > { %v713_v48 = vmax.f32 %v561_v46, 0.0  ;;  %v4636_v46 = vld [vmem:[%s5454_s11 + $0x88] sm:$0xff] }
  0xd5   : > { %v774_v49 = vpack.c.bf16 %v713_v48, %v712_v47 }
  0xd7   : > { %892 = vmatmul.bf16.gmra.mxu1 %v774_v49 }
  0xd8   : > { %v563_v51 = vpop.f32.mrf.mxu0 }
  0xd9   : > { %v564_v52 = vadd.f32 %v5492_v26, %v563_v51 }
  0xdb   : > { %602 = vmatmul.bf16.gmra.mxu0 %v4630_v50  ;;  %v714_v55 = vmax.f32 %v564_v52, 0.0 }
  0xe0   : > { %v565_v53 = vpop.f32.mrf.mxu0 }
  0xe1   : > { %v566_v54 = vadd.f32 %v5492_v26, %v565_v53 }
  0xe3   : > { %v715_v56 = vmax.f32 %v566_v54, 0.0 }
  0xe5   : > { %v775_v57 = vpack.c.bf16 %v715_v56, %v714_v55 }
  0xe7   : > { %897 = vmatmul.bf16.gmra.mxu1 %v775_v57 }
  0xe8   : > { %v568_v59 = vpop.f32.mrf.mxu0 }
  0xe9   : > { %v569_v60 = vadd.f32 %v5492_v26, %v568_v59 }
  0xeb   : > { %607 = vmatmul.bf16.gmra.mxu0 %v4631_v58  ;;  %v716_v63 = vmax.f32 %v569_v60, 0.0 }
  0xf0   : > { %v570_v61 = vpop.f32.mrf.mxu0 }
  0xf1   : > { %v571_v62 = vadd.f32 %v5492_v26, %v570_v61  ;;  %v4637_v61 = vld [vmem:[%s5454_s11 + $0x90] sm:$0xff] }
  0xf3   : > { %v717_v0 = vmax.f32 %v571_v62, 0.0  ;;  %v4688_v62 = vld [vmem:[%s6758_s1 + $0x128] sm:$0xff] }
  0xf4   : > { %2329 = vmatpush.bf16.msrb.mxu0 %v4688_v62  ;;  %v4687_v62 = vld [vmem:[%s6758_s1 + $0x120] sm:$0xff] }
  0xf5   : > { %v776_v1 = vpack.c.bf16 %v717_v0, %v716_v63 }
  0xf7   : > { %902 = vmatmul.bf16.gmra.mxu1 %v776_v1 }
  0xf8   : > { %v573_v3 = vpop.f32.mrf.mxu0  ;;  %2330 = vmatpush.bf16.msrb.mxu0 %v4687_v62 }
  0xf9   : > { %v574_v4 = vadd.f32 %v5492_v26, %v573_v3 }
  0xfb   : > { %612 = vmatmul.bf16.gmra.mxu0 %v4632_v2  ;;  %v718_v8 = vmax.f32 %v574_v4, 0.0 }
 0x100   : > { %v575_v5 = vpop.f32.mrf.mxu0 }
 0x101   : > { %v576_v6 = vadd.f32 %v5492_v26, %v575_v5 }
 0x103   : > { %v719_v9 = vmax.f32 %v576_v6, 0.0 }
 0x105   : > { %v777_v10 = vpack.c.bf16 %v719_v9, %v718_v8 }
 0x107   : > { %907 = vmatmul.bf16.gmra.mxu1 %v777_v10 }
 0x108   : > { %v578_v14 = vpop.f32.mrf.mxu0 }
 0x109   : > { %v579_v17 = vadd.f32 %v5492_v26, %v578_v14  ;;  %v4638_v14 = vld [vmem:[%s5454_s11 + $0x98] sm:$0xff] }
 0x10b   : > { %617 = vmatmul.bf16.gmra.mxu0 %v4633_v12  ;;  %v720_v21 = vmax.f32 %v579_v17, 0.0 }
 0x110   : > { %v580_v18 = vpop.f32.mrf.mxu0 }
 0x111   : > { %v581_v19 = vadd.f32 %v5492_v26, %v580_v18 }
 0x113   : > { %v721_v22 = vmax.f32 %v581_v19, 0.0 }
 0x115   : > { %v778_v23 = vpack.c.bf16 %v721_v22, %v720_v21 }
 0x117   : > { %912 = vmatmul.bf16.gmra.mxu1 %v778_v23 }
 0x118   : > { %v583_v27 = vpop.f32.mrf.mxu0 }
 0x119   : > { %v584_v30 = vadd.f32 %v5492_v26, %v583_v27 }
 0x11b   : > { %622 = vmatmul.bf16.gmra.mxu0 %v4634_v25  ;;  %v722_v33 = vmax.f32 %v584_v30, 0.0  ;;  %v4639_v30 = vld [vmem:[%s5454_s11 + $0xa0] sm:$0xff] }
 0x120   : > { %v585_v31 = vpop.f32.mrf.mxu0 }
 0x121   : > { %v586_v32 = vadd.f32 %v5492_v26, %v585_v31 }
 0x123   : > { %v723_v34 = vmax.f32 %v586_v32, 0.0 }
 0x125   : > { %v779_v35 = vpack.c.bf16 %v723_v34, %v722_v33 }
 0x127   : > { %917 = vmatmul.bf16.gmra.mxu1 %v779_v35 }
 0x128   : > { %v588_v37 = vpop.f32.mrf.mxu0 }
 0x129   : > { %v589_v38 = vadd.f32 %v5492_v26, %v588_v37 }
 0x12b   : > { %627 = vmatmul.bf16.gmra.mxu0 %v4635_v36  ;;  %v724_v41 = vmax.f32 %v589_v38, 0.0 }
 0x130   : > { %v590_v39 = vpop.f32.mrf.mxu0 }
 0x131   : > { %v591_v40 = vadd.f32 %v5492_v26, %v590_v39 }
 0x133   : > { %v725_v42 = vmax.f32 %v591_v40, 0.0 }
 0x134   : > { %v883_v43 = vpop.f32.mrf.mxu1 }
 0x135   : > { %v780_v44 = vpack.c.bf16 %v725_v42, %v724_v41  ;;  %v884_v48 = vadd.f32 %v5553_v45, %v883_v43 }
 0x137   : > { %922 = vmatmul.bf16.gmra.mxu1 %v780_v44  ;;  %v1043_v51 = vmax.f32 %v884_v48, 0.0 }
 0x138   : > { %v593_v47 = vpop.f32.mrf.mxu0 }
 0x139   : > { %v594_v52 = vadd.f32 %v5492_v26, %v593_v47 }
 0x13b   : > { %632 = vmatmul.bf16.gmra.mxu0 %v4636_v46  ;;  %v726_v57 = vmax.f32 %v594_v52, 0.0  ;;  %v4640_v46 = vld [vmem:[%s5454_s11 + $0xa8] sm:$0xff] }
 0x13c   : > { %v885_v49 = vpop.f32.mrf.mxu1 }
 0x13d   : > { %v886_v50 = vadd.f32 %v5553_v45, %v885_v49 }
 0x13f   : > { %v1044_v53 = vmax.f32 %v886_v50, 0.0 }
 0x140   : > { %v595_v54 = vpop.f32.mrf.mxu0 }
 0x141   : > { %v596_v55 = vadd.f32 %v5492_v26, %v595_v54  ;;  %v1107_v56 = vpack.c.bf16 %v1044_v53, %v1043_v51 }
 0x143   : > { %v727_v58 = vmax.f32 %v596_v55, 0.0  ;;  %1217 = vmatmul.bf16.vlgmr.msra.gmra.mxu2 %v1107_v56 }
 0x144   : > { %v888_v59 = vpop.f32.mrf.mxu1 }
 0x145   : > { %v781_v60 = vpack.c.bf16 %v727_v58, %v726_v57  ;;  %v889_v0 = vadd.f32 %v5553_v45, %v888_v59 }
 0x147   : > { %927 = vmatmul.bf16.gmra.mxu1 %v781_v60  ;;  %v1045_v3 = vmax.f32 %v889_v0, 0.0 }
 0x148   : > { %v598_v63 = vpop.f32.mrf.mxu0 }
 0x149   : > { %v599_v4 = vadd.f32 %v5492_v26, %v598_v63 }
 0x14b   : > { %637 = vmatmul.bf16.gmra.mxu0 %v4637_v61  ;;  %v728_v9 = vmax.f32 %v599_v4, 0.0  ;;  %v4641_v61 = vld [vmem:[%s5454_s11 + $0xb0] sm:$0xff] }
 0x14c   : > { %v890_v1 = vpop.f32.mrf.mxu1 }
 0x14d   : > { %v891_v2 = vadd.f32 %v5553_v45, %v890_v1 }
 0x14f   : > { %v1046_v5 = vmax.f32 %v891_v2, 0.0 }
 0x150   : > { %v600_v6 = vpop.f32.mrf.mxu0 }
 0x151   : > { %v601_v7 = vadd.f32 %v5492_v26, %v600_v6  ;;  %v1108_v8 = vpack.c.bf16 %v1046_v5, %v1045_v3 }
 0x153   : > { %v729_v10 = vmax.f32 %v601_v7, 0.0  ;;  %1222 = vmatmul.bf16.gmra.mxu2 %v1108_v8 }
 0x154   : > { %v893_v12 = vpop.f32.mrf.mxu1 }
 0x155   : > { %v782_v13 = vpack.c.bf16 %v729_v10, %v728_v9  ;;  %v894_v16 = vadd.f32 %v5553_v45, %v893_v12 }
 0x157   : > { %932 = vmatmul.bf16.gmra.mxu1 %v782_v13  ;;  %v1047_v19 = vmax.f32 %v894_v16, 0.0  ;;  %v4682_v13 = vld [vmem:[%s6758_s1 + $0xf8] sm:$0xff] }
 0x158   : > { %v603_v15 = vpop.f32.mrf.mxu0  ;;  %1544 = vmatpush.bf16.msra.mxu3 %v4682_v13 }
 0x159   : > { %v604_v20 = vadd.f32 %v5492_v26, %v603_v15  ;;  %v4642_v15 = vld [vmem:[%s5454_s11 + $0xb8] sm:$0xff] }
 0x15b   : > { %642 = vmatmul.bf16.gmra.mxu0 %v4638_v14  ;;  %v730_v25 = vmax.f32 %v604_v20, 0.0  ;;  %v4680_v20 = vld [vmem:[%s6758_s1 + $0xe8] sm:$0xff] }
 0x15c   : > { %v895_v17 = vpop.f32.mrf.mxu1 }
 0x15d   : > { %v896_v18 = vadd.f32 %v5553_v45, %v895_v17  ;;  %v4681_v17 = vld [vmem:[%s6758_s1 + $0xf0] sm:$0xff] }
 0x15e   : > { %1545 = vmatpush.bf16.msra.mxu3 %v4681_v17 }
 0x15f   : > { %v1048_v21 = vmax.f32 %v896_v18, 0.0 }
 0x160   : > { %v605_v22 = vpop.f32.mrf.mxu0 }
 0x161   : > { %v606_v23 = vadd.f32 %v5492_v26, %v605_v22  ;;  %v1109_v24 = vpack.c.bf16 %v1048_v21, %v1047_v19 }
 0x162   : > { %1546 = vmatpush.bf16.msra.mxu3 %v4680_v20 }
 0x163   : > { %v731_v27 = vmax.f32 %v606_v23, 0.0  ;;  %1227 = vmatmul.bf16.gmra.mxu2 %v1109_v24 }
 0x164   : > { %v898_v28 = vpop.f32.mrf.mxu1 }
 0x165   : > { %v783_v29 = vpack.c.bf16 %v731_v27, %v730_v25  ;;  %v899_v32 = vadd.f32 %v5553_v45, %v898_v28  ;;  %v4679_v27 = vld [vmem:[%s6758_s1 + $0xe0] sm:$0xff] }
 0x166   : > { %1547 = vmatpush.bf16.msra.mxu3 %v4679_v27 }
 0x167   : > { %937 = vmatmul.bf16.gmra.mxu1 %v783_v29  ;;  %v1049_v35 = vmax.f32 %v899_v32, 0.0 }
 0x168   : > { %v608_v31 = vpop.f32.mrf.mxu0 }
 0x169   : > { %v609_v36 = vadd.f32 %v5492_v26, %v608_v31 }
 0x16b   : > { %647 = vmatmul.bf16.gmra.mxu0 %v4639_v30  ;;  %v732_v41 = vmax.f32 %v609_v36, 0.0 }
 0x16c   : > { %v900_v33 = vpop.f32.mrf.mxu1 }
 0x16d   : > { %v901_v34 = vadd.f32 %v5553_v45, %v900_v33  ;;  %v4678_v33 = vld [vmem:[%s6758_s1 + $0xd8] sm:$0xff] }
 0x16e   : > { %1548 = vmatpush.bf16.msra.mxu3 %v4678_v33 }
 0x16f   : > { %v1050_v37 = vmax.f32 %v901_v34, 0.0 }
 0x170   : > { %v610_v38 = vpop.f32.mrf.mxu0 }
 0x171   : > { %v611_v39 = vadd.f32 %v5492_v26, %v610_v38  ;;  %v1110_v40 = vpack.c.bf16 %v1050_v37, %v1049_v35  ;;  %v4643_v35 = vld [vmem:[%s5454_s11 + $0xc0] sm:$0xff]  ;;  %v4677_v37 = vld [vmem:[%s6758_s1 + $0xd0] sm:$0xff] }
 0x172   : > { %1549 = vmatpush.bf16.msra.mxu3 %v4677_v37 }
 0x173   : > { %v733_v42 = vmax.f32 %v611_v39, 0.0  ;;  %1232 = vmatmul.bf16.gmra.mxu2 %v1110_v40  ;;  %v4676_v40 = vld [vmem:[%s6758_s1 + $0xc8] sm:$0xff] }
 0x174   : > { %v903_v43 = vpop.f32.mrf.mxu1 }
 0x175   : > { %v784_v44 = vpack.c.bf16 %v733_v42, %v732_v41  ;;  %v904_v48 = vadd.f32 %v5553_v45, %v903_v43 }
 0x176   : > { %1550 = vmatpush.bf16.msra.mxu3 %v4676_v40 }
 0x177   : > { %942 = vmatmul.bf16.gmra.mxu1 %v784_v44  ;;  %v1051_v51 = vmax.f32 %v904_v48, 0.0 }
 0x178   : > { %v613_v47 = vpop.f32.mrf.mxu0 }
 0x179   : > { %v614_v52 = vadd.f32 %v5492_v26, %v613_v47  ;;  %v4675_v47 = vld [vmem:[%s6758_s1 + $0xc0] sm:$0xff] }
 0x17a   : > { %1551 = vmatpush.bf16.msra.mxu3 %v4675_v47 }
 0x17b   : > { %652 = vmatmul.bf16.gmra.mxu0 %v4640_v46  ;;  %v734_v57 = vmax.f32 %v614_v52, 0.0 }
 0x17c   : > { %v905_v49 = vpop.f32.mrf.mxu1 }
 0x17d   : > { %v906_v50 = vadd.f32 %v5553_v45, %v905_v49 }
 0x17f   : > { %v1052_v53 = vmax.f32 %v906_v50, 0.0 }
 0x180   : > { %v615_v54 = vpop.f32.mrf.mxu0 }
 0x181   : > { %v616_v55 = vadd.f32 %v5492_v26, %v615_v54  ;;  %v1111_v56 = vpack.c.bf16 %v1052_v53, %v1051_v51  ;;  %v4644_v54 = vld [vmem:[%s5454_s11 + $0xc8] sm:$0xff] }
 0x183   : > { %v735_v58 = vmax.f32 %v616_v55, 0.0  ;;  %1237 = vmatmul.bf16.gmra.mxu2 %v1111_v56 }
 0x184   : > { %v908_v59 = vpop.f32.mrf.mxu1 }
 0x185   : > { %v785_v60 = vpack.c.bf16 %v735_v58, %v734_v57  ;;  %v909_v0 = vadd.f32 %v5553_v45, %v908_v59 }
 0x187   : > { %947 = vmatmul.bf16.gmra.mxu1 %v785_v60  ;;  %v1053_v3 = vmax.f32 %v909_v0, 0.0 }
 0x188   : > { %v618_v63 = vpop.f32.mrf.mxu0 }
 0x189   : > { %v619_v4 = vadd.f32 %v5492_v26, %v618_v63 }
 0x18b   : > { %657 = vmatmul.bf16.gmra.mxu0 %v4641_v61  ;;  %v736_v9 = vmax.f32 %v619_v4, 0.0 }
 0x18c   : > { %v910_v1 = vpop.f32.mrf.mxu1 }
 0x18d   : > { %v911_v2 = vadd.f32 %v5553_v45, %v910_v1 }
 0x18f   : > { %v1054_v5 = vmax.f32 %v911_v2, 0.0 }
 0x190   : > { %v620_v6 = vpop.f32.mrf.mxu0 }
 0x191   : > { %v621_v7 = vadd.f32 %v5492_v26, %v620_v6  ;;  %v1112_v8 = vpack.c.bf16 %v1054_v5, %v1053_v3  ;;  %v4645_v6 = vld [vmem:[%s5454_s11 + $0xd0] sm:$0xff] }
 0x193   : > { %v737_v10 = vmax.f32 %v621_v7, 0.0  ;;  %1242 = vmatmul.bf16.gmra.mxu2 %v1112_v8  ;;  %v5640_v8 = vld [vmem:[%s6759_s2 + $0x2] ss:$0 sm:$0xff] }
 0x194   : > { %v913_v12 = vpop.f32.mrf.mxu1 }
 0x195   : > { %v786_v14 = vpack.c.bf16 %v737_v10, %v736_v9  ;;  %v914_v18 = vadd.f32 %v5553_v45, %v913_v12  ;;  %v4686_v9 = vld [vmem:[%s6758_s1 + $0x118] sm:$0xff] }
 0x196   : > { %2331 = vmatpush.bf16.msrb.mxu0 %v4686_v9 }
 0x197   : > { %952 = vmatmul.bf16.gmra.mxu1 %v786_v14  ;;  %v1055_v22 = vmax.f32 %v914_v18, 0.0 }
 0x198   : > { %v623_v16 = vpop.f32.mrf.mxu0 }
 0x199   : > { %v624_v23 = vadd.f32 %v5492_v26, %v623_v16 }
 0x19b   : > { %662 = vmatmul.bf16.gmra.mxu0 %v4642_v15  ;;  %v738_v30 = vmax.f32 %v624_v23, 0.0 }
 0x19c   : > { %v915_v19 = vpop.f32.mrf.mxu1 }
 0x19d   : > { %v916_v21 = vadd.f32 %v5553_v45, %v915_v19 }
 0x19f   : > { %v1056_v24 = vmax.f32 %v916_v21, 0.0 }
 0x1a0   : > { %v625_v25 = vpop.f32.mrf.mxu0 }
 0x1a1   : > { %v626_v28 = vadd.f32 %v5492_v26, %v625_v25  ;;  %v1113_v29 = vpack.c.bf16 %v1056_v24, %v1055_v22 }
 0x1a3   : > { %v739_v31 = vmax.f32 %v626_v28, 0.0  ;;  %1247 = vmatmul.bf16.gmra.mxu2 %v1113_v29  ;;  %v4696_v28 = vld [vmem:[%s6758_s1 + $0x168] sm:$0xff] }
 0x1a4   : > { %v918_v32 = vpop.f32.mrf.mxu1  ;;  %2664 = vmatpush.bf16.msrb.mxu1 %v4696_v28 }
 0x1a5   : > { %v787_v34 = vpack.c.bf16 %v739_v31, %v738_v30  ;;  %v919_v38 = vadd.f32 %v5553_v45, %v918_v32  ;;  %v4646_v32 = vld [vmem:[%s5454_s11 + $0xd8] sm:$0xff] }
 0x1a7   : > { %957 = vmatmul.bf16.gmra.mxu1 %v787_v34  ;;  %v1057_v42 = vmax.f32 %v919_v38, 0.0 }
 0x1a8   : > { %v628_v36 = vpop.f32.mrf.mxu0 }
 0x1a9   : > { %v629_v43 = vadd.f32 %v5492_v26, %v628_v36 }
 0x1ab   : > { %667 = vmatmul.bf16.gmra.mxu0 %v4643_v35  ;;  %v740_v50 = vmax.f32 %v629_v43, 0.0 }
 0x1ac   : > { %v920_v39 = vpop.f32.mrf.mxu1 }
 0x1ad   : > { %v921_v41 = vadd.f32 %v5553_v45, %v920_v39 }
 0x1af   : > { %v1058_v44 = vmax.f32 %v921_v41, 0.0 }
 0x1b0   : > { %v630_v46 = vpop.f32.mrf.mxu0 }
 0x1b1   : > { %v631_v48 = vadd.f32 %v5492_v26, %v630_v46  ;;  %v1114_v49 = vpack.c.bf16 %v1058_v44, %v1057_v42 }
 0x1b3   : > { %v741_v51 = vmax.f32 %v631_v48, 0.0  ;;  %1252 = vmatmul.bf16.gmra.mxu2 %v1114_v49  ;;  %v4706_v49 = vld [vmem:[%s6758_s1 + $0x1b8] sm:$0xff] }
 0x1b4   : > { %v923_v52 = vpop.f32.mrf.mxu1  ;;  %2997 = vmatpush.bf16.msrb.mxu2 %v4706_v49 }
 0x1b5   : > { %v788_v53 = vpack.c.bf16 %v741_v51, %v740_v50  ;;  %v924_v56 = vadd.f32 %v5553_v45, %v923_v52 }
 0x1b7   : > { %962 = vmatmul.bf16.gmra.mxu1 %v788_v53  ;;  %v1059_v59 = vmax.f32 %v924_v56, 0.0  ;;  %v4647_v56 = vld [vmem:[%s5454_s11 + $0xe0] sm:$0xff] }
 0x1b8   : > { %v633_v55 = vpop.f32.mrf.mxu0 }
 0x1b9   : > { %v634_v60 = vadd.f32 %v5492_v26, %v633_v55 }
 0x1bb   : > { %672 = vmatmul.bf16.gmra.mxu0 %v4644_v54  ;;  %v742_v1 = vmax.f32 %v634_v60, 0.0 }
 0x1bc   : > { %v925_v57 = vpop.f32.mrf.mxu1 }
 0x1bd   : > { %v926_v58 = vadd.f32 %v5553_v45, %v925_v57 }
 0x1bf   : > { %v1060_v61 = vmax.f32 %v926_v58, 0.0 }
 0x1c0   : > { %v635_v62 = vpop.f32.mrf.mxu0 }
 0x1c1   : > { %v636_v63 = vadd.f32 %v5492_v26, %v635_v62  ;;  %v1115_v0 = vpack.c.bf16 %v1060_v61, %v1059_v59 }
 0x1c3   : > { %v743_v2 = vmax.f32 %v636_v63, 0.0  ;;  %1257 = vmatmul.bf16.gmra.mxu2 %v1115_v0 }
 0x1c4   : > { %v928_v3 = vpop.f32.mrf.mxu1 }
 0x1c5   : > { %v789_v4 = vpack.c.bf16 %v743_v2, %v742_v1  ;;  %v929_v10 = vadd.f32 %v5553_v45, %v928_v3 }
 0x1c6   : > { %v1218_v5 = vpop.f32.mrf.mxu2 }
 0x1c7   : > { %967 = vmatmul.bf16.gmra.mxu1 %v789_v4  ;;  %v1219_v12 = vadd.f32 %v5640_v8, %v1218_v5  ;;  %v1061_v15 = vmax.f32 %v929_v10, 0.0 }
 0x1c8   : > { %v638_v7 = vpop.f32.mrf.mxu0 }
 0x1c9   : > { %v639_v16 = vadd.f32 %v5492_v26, %v638_v7  ;;  %v1378_v20 = vmax.f32 %v1219_v12, 0.0 }
 0x1cb   : > { %677 = vmatmul.bf16.gmra.mxu0 %v4645_v6  ;;  %v744_v24 = vmax.f32 %v639_v16, 0.0 }
 0x1cc   : > { %v930_v11 = vpop.f32.mrf.mxu1 }
 0x1cd   : > { %v931_v13 = vadd.f32 %v5553_v45, %v930_v11 }
 0x1ce   : > { %v1220_v14 = vpop.f32.mrf.mxu2 }
 0x1cf   : > { %v1062_v17 = vmax.f32 %v931_v13, 0.0  ;;  %v1221_v18 = vadd.f32 %v5640_v8, %v1220_v14 }
 0x1d0   : > { %v640_v19 = vpop.f32.mrf.mxu0 }
 0x1d1   : > { %v1379_v21 = vmax.f32 %v1221_v18, 0.0  ;;  %v641_v22 = vadd.f32 %v5492_v26, %v640_v19  ;;  %v1116_v23 = vpack.c.bf16 %v1062_v17, %v1061_v15  ;;  %v4648_v15 = vld [vmem:[%s5454_s11 + $0xe8] sm:$0xff] }
 0x1d3   : > { %v745_v25 = vmax.f32 %v641_v22, 0.0  ;;  %1262 = vmatmul.bf16.gmra.mxu2 %v1116_v23  ;;  %v1442_v27 = vpack.c.bf16 %v1379_v21, %v1378_v20 }
 0x1d4   : > { %v933_v29 = vpop.f32.mrf.mxu1 }
 0x1d5   : > { %1552 = vmatmul.bf16.vlgmr.msra.gmra.mxu3 %v1442_v27  ;;  %v790_v30 = vpack.c.bf16 %v745_v25, %v744_v24  ;;  %v934_v34 = vadd.f32 %v5553_v45, %v933_v29 }
 0x1d6   : > { %v1223_v31 = vpop.f32.mrf.mxu2 }
 0x1d7   : > { %972 = vmatmul.bf16.gmra.mxu1 %v790_v30  ;;  %v1224_v36 = vadd.f32 %v5640_v8, %v1223_v31  ;;  %v1063_v39 = vmax.f32 %v934_v34, 0.0 }
 0x1d8   : > { %v643_v33 = vpop.f32.mrf.mxu0 }
 0x1d9   : > { %v644_v40 = vadd.f32 %v5492_v26, %v643_v33  ;;  %v1380_v44 = vmax.f32 %v1224_v36, 0.0 }
 0x1db   : > { %682 = vmatmul.bf16.gmra.mxu0 %v4646_v32  ;;  %v746_v50 = vmax.f32 %v644_v40, 0.0  ;;  %v4685_v40 = vld [vmem:[%s6758_s1 + $0x110] sm:$0xff] }
 0x1dc   : > { %v935_v35 = vpop.f32.mrf.mxu1  ;;  %2332 = vmatpush.bf16.msrb.mxu0 %v4685_v40 }
 0x1dd   : > { %v936_v37 = vadd.f32 %v5553_v45, %v935_v35 }
 0x1de   : > { %v1225_v38 = vpop.f32.mrf.mxu2 }
 0x1df   : > { %v1064_v41 = vmax.f32 %v936_v37, 0.0  ;;  %v1226_v42 = vadd.f32 %v5640_v8, %v1225_v38  ;;  %v4649_v38 = vld [vmem:[%s5454_s11 + $0xf0] sm:$0xff] }
 0x1e0   : > { %v645_v43 = vpop.f32.mrf.mxu0 }
 0x1e1   : > { %v1381_v46 = vmax.f32 %v1226_v42, 0.0  ;;  %v646_v47 = vadd.f32 %v5492_v26, %v645_v43  ;;  %v1117_v48 = vpack.c.bf16 %v1064_v41, %v1063_v39 }
 0x1e3   : > { %v747_v51 = vmax.f32 %v646_v47, 0.0  ;;  %1267 = vmatmul.bf16.gmra.mxu2 %v1117_v48  ;;  %v1443_v52 = vpack.c.bf16 %v1381_v46, %v1380_v44 }
 0x1e4   : > { %v938_v53 = vpop.f32.mrf.mxu1 }
 0x1e5   : > { %1557 = vmatmul.bf16.gmra.mxu3 %v1443_v52  ;;  %v791_v54 = vpack.c.bf16 %v747_v51, %v746_v50  ;;  %v939_v58 = vadd.f32 %v5553_v45, %v938_v53 }
 0x1e6   : > { %v1228_v55 = vpop.f32.mrf.mxu2 }
 0x1e7   : > { %977 = vmatmul.bf16.gmra.mxu1 %v791_v54  ;;  %v1229_v60 = vadd.f32 %v5640_v8, %v1228_v55  ;;  %v1065_v63 = vmax.f32 %v939_v58, 0.0 }
 0x1e8   : > { %v648_v57 = vpop.f32.mrf.mxu0 }
 0x1e9   : > { %v649_v0 = vadd.f32 %v5492_v26, %v648_v57  ;;  %v1382_v4 = vmax.f32 %v1229_v60, 0.0 }
 0x1eb   : > { %687 = vmatmul.bf16.gmra.mxu0 %v4647_v56  ;;  %v748_v9 = vmax.f32 %v649_v0, 0.0 }
 0x1ec   : > { %v940_v59 = vpop.f32.mrf.mxu1 }
 0x1ed   : > { %v941_v61 = vadd.f32 %v5553_v45, %v940_v59  ;;  %v4695_v59 = vld [vmem:[%s6758_s1 + $0x160] sm:$0xff] }
 0x1ee   : > { %v1230_v62 = vpop.f32.mrf.mxu2  ;;  %2665 = vmatpush.bf16.msrb.mxu1 %v4695_v59 }
 0x1ef   : > { %v1066_v1 = vmax.f32 %v941_v61, 0.0  ;;  %v1231_v2 = vadd.f32 %v5640_v8, %v1230_v62 }
 0x1f0   : > { %v650_v3 = vpop.f32.mrf.mxu0 }
 0x1f1   : > { %v1383_v5 = vmax.f32 %v1231_v2, 0.0  ;;  %v651_v6 = vadd.f32 %v5492_v26, %v650_v3  ;;  %v1118_v7 = vpack.c.bf16 %v1066_v1, %v1065_v63  ;;  %v4650_v63 = vld [vmem:[%s5454_s11 + $0xf8] sm:$0xff] }
 0x1f3   : > { %v749_v10 = vmax.f32 %v651_v6, 0.0  ;;  %1272 = vmatmul.bf16.gmra.mxu2 %v1118_v7  ;;  %v1444_v11 = vpack.c.bf16 %v1383_v5, %v1382_v4 }
 0x1f4   : > { %v943_v12 = vpop.f32.mrf.mxu1 }
 0x1f5   : > { %1562 = vmatmul.bf16.gmra.mxu3 %v1444_v11  ;;  %v792_v13 = vpack.c.bf16 %v749_v10, %v748_v9  ;;  %v944_v17 = vadd.f32 %v5553_v45, %v943_v12 }
 0x1f6   : > { %v1233_v14 = vpop.f32.mrf.mxu2 }
 0x1f7   : > { %982 = vmatmul.bf16.gmra.mxu1 %v792_v13  ;;  %v1234_v19 = vadd.f32 %v5640_v8, %v1233_v14  ;;  %v1067_v22 = vmax.f32 %v944_v17, 0.0 }
 0x1f8   : > { %v653_v16 = vpop.f32.mrf.mxu0 }
 0x1f9   : > { %v654_v23 = vadd.f32 %v5492_v26, %v653_v16  ;;  %v1384_v28 = vmax.f32 %v1234_v19, 0.0  ;;  %v4705_v16 = vld [vmem:[%s6758_s1 + $0x1b0] sm:$0xff] }
 0x1fa   : > { %2998 = vmatpush.bf16.msrb.mxu2 %v4705_v16 }
 0x1fb   : > { %692 = vmatmul.bf16.gmra.mxu0 %v4648_v15  ;;  %v750_v32 = vmax.f32 %v654_v23, 0.0 }
 0x1fc   : > { %v945_v18 = vpop.f32.mrf.mxu1 }
 0x1fd   : > { %v946_v20 = vadd.f32 %v5553_v45, %v945_v18 }
 0x1fe   : > { %v1235_v21 = vpop.f32.mrf.mxu2 }
 0x1ff   : > { %v1068_v24 = vmax.f32 %v946_v20, 0.0  ;;  %v1236_v25 = vadd.f32 %v5640_v8, %v1235_v21 }
 0x200   : > { %v655_v27 = vpop.f32.mrf.mxu0 }
 0x201   : > { %v1385_v29 = vmax.f32 %v1236_v25, 0.0  ;;  %v656_v30 = vadd.f32 %v5492_v26, %v655_v27  ;;  %v1119_v31 = vpack.c.bf16 %v1068_v24, %v1067_v22 }
 0x203   : > { %v751_v33 = vmax.f32 %v656_v30, 0.0  ;;  %1277 = vmatmul.bf16.gmra.mxu2 %v1119_v31  ;;  %v1445_v34 = vpack.c.bf16 %v1385_v29, %v1384_v28 }
 0x204   : > { %v948_v35 = vpop.f32.mrf.mxu1 }
 0x205   : > { %1567 = vmatmul.bf16.gmra.mxu3 %v1445_v34  ;;  %v793_v36 = vpack.c.bf16 %v751_v33, %v750_v32  ;;  %v949_v41 = vadd.f32 %v5553_v45, %v948_v35 }
 0x206   : > { %v1238_v37 = vpop.f32.mrf.mxu2 }
 0x207   : > { %987 = vmatmul.bf16.gmra.mxu1 %v793_v36  ;;  %v1239_v43 = vadd.f32 %v5640_v8, %v1238_v37  ;;  %v1069_v47 = vmax.f32 %v949_v41, 0.0 }
 0x208   : > { %v658_v39 = vpop.f32.mrf.mxu0 }
 0x209   : > { %v659_v48 = vadd.f32 %v5492_v26, %v658_v39  ;;  %v1386_v52 = vmax.f32 %v1239_v43, 0.0 }
 0x20b   : > { %697 = vmatmul.bf16.gmra.mxu0 %v4649_v38  ;;  %v752_v56 = vmax.f32 %v659_v48, 0.0 }
 0x20c   : > { %v950_v42 = vpop.f32.mrf.mxu1 }
 0x20d   : > { %v951_v44 = vadd.f32 %v5553_v45, %v950_v42 }
 0x20e   : > { %v1240_v46 = vpop.f32.mrf.mxu2 }
 0x20f   : > { %v1070_v49 = vmax.f32 %v951_v44, 0.0  ;;  %v1241_v50 = vadd.f32 %v5640_v8, %v1240_v46 }
 0x210   : > { %v660_v51 = vpop.f32.mrf.mxu0 }
 0x211   : > { %v1387_v53 = vmax.f32 %v1241_v50, 0.0  ;;  %v661_v54 = vadd.f32 %v5492_v26, %v660_v51  ;;  %v1120_v55 = vpack.c.bf16 %v1070_v49, %v1069_v47 }
 0x213   : > { %v753_v57 = vmax.f32 %v661_v54, 0.0  ;;  %1282 = vmatmul.bf16.gmra.mxu2 %v1120_v55  ;;  %v1446_v58 = vpack.c.bf16 %v1387_v53, %v1386_v52 }
 0x214   : > { %v953_v60 = vpop.f32.mrf.mxu1 }
 0x215   : > { %1572 = vmatmul.bf16.gmra.mxu3 %v1446_v58  ;;  %v794_v61 = vpack.c.bf16 %v753_v57, %v752_v56  ;;  %v954_v1 = vadd.f32 %v5553_v45, %v953_v60 }
 0x216   : > { %v1243_v62 = vpop.f32.mrf.mxu2 }
 0x217   : > { %992 = vmatmul.bf16.gmra.mxu1 %v794_v61  ;;  %v1244_v3 = vadd.f32 %v5640_v8, %v1243_v62  ;;  %v1071_v6 = vmax.f32 %v954_v1, 0.0 }
 0x218   : > { %v663_v0 = vpop.f32.mrf.mxu0 }
 0x219   : > { %v664_v7 = vadd.f32 %v5492_v26, %v663_v0  ;;  %v1388_v12 = vmax.f32 %v1244_v3, 0.0 }
 0x21b   : > { %702 = vmatmul.bf16.gmra.mxu0 %v4650_v63  ;;  %v754_v17 = vmax.f32 %v664_v7, 0.0 }
 0x21c   : > { %v955_v2 = vpop.f32.mrf.mxu1 }
 0x21d   : > { %v956_v4 = vadd.f32 %v5553_v45, %v955_v2 }
 0x21e   : > { %v1245_v5 = vpop.f32.mrf.mxu2 }
 0x21f   : > { %v1072_v9 = vmax.f32 %v956_v4, 0.0  ;;  %v1246_v10 = vadd.f32 %v5640_v8, %v1245_v5  ;;  %v4684_v4 = vld [vmem:[%s6758_s1 + $0x108] sm:$0xff] }
 0x220   : > { %v665_v11 = vpop.f32.mrf.mxu0  ;;  %2333 = vmatpush.bf16.msrb.mxu0 %v4684_v4 }
 0x221   : > { %v1389_v13 = vmax.f32 %v1246_v10, 0.0  ;;  %v666_v14 = vadd.f32 %v5492_v26, %v665_v11  ;;  %v1121_v15 = vpack.c.bf16 %v1072_v9, %v1071_v6  ;;  %v5722_v11 = vld [vmem:[%s6759_s2] ss:$0 sm:$0xff] }
 0x223   : > { %v755_v18 = vmax.f32 %v666_v14, 0.0  ;;  %1287 = vmatmul.bf16.gmra.mxu2 %v1121_v15  ;;  %v1447_v19 = vpack.c.bf16 %v1389_v13, %v1388_v12 }
 0x224   : > { %v958_v20 = vpop.f32.mrf.mxu1 }
 0x225   : > { %1577 = vmatmul.bf16.gmra.mxu3 %v1447_v19  ;;  %v795_v21 = vpack.c.bf16 %v755_v18, %v754_v17  ;;  %v959_v24 = vadd.f32 %v5553_v45, %v958_v20 }
 0x226   : > { %v1248_v22 = vpop.f32.mrf.mxu2 }
 0x227   : > { %997 = vmatmul.bf16.gmra.mxu1 %v795_v21  ;;  %v1249_v27 = vadd.f32 %v5640_v8, %v1248_v22  ;;  %v1073_v30 = vmax.f32 %v959_v24, 0.0 }
 0x228   : > { %v668_v23 = vpop.f32.mrf.mxu0 }
 0x229   : > { %v669_v31 = vadd.f32 %v5492_v26, %v668_v23  ;;  %v1390_v35 = vmax.f32 %v1249_v27, 0.0  ;;  %v4694_v27 = vld [vmem:[%s6758_s1 + $0x158] sm:$0xff] }
 0x22a   : > { %2666 = vmatpush.bf16.msrb.mxu1 %v4694_v27 }
 0x22b   : > { %v756_v39 = vmax.f32 %v669_v31, 0.0 }
 0x22c   : > { %v960_v25 = vpop.f32.mrf.mxu1 }
 0x22d   : > { %v961_v28 = vadd.f32 %v5553_v45, %v960_v25  ;;  %v5730_v25 = vld [vmem:[%s6759_s2 + $0x3] ss:$0 sm:$0xff] }
 0x22e   : > { %v1250_v29 = vpop.f32.mrf.mxu2 }
 0x22f   : > { %v1074_v32 = vmax.f32 %v961_v28, 0.0  ;;  %v1251_v33 = vadd.f32 %v5640_v8, %v1250_v29 }
 0x230   : > { %v670_v34 = vpop.f32.mrf.mxu0 }
 0x231   : > { %v1391_v36 = vmax.f32 %v1251_v33, 0.0  ;;  %v671_v37 = vadd.f32 %v5492_v26, %v670_v34  ;;  %v1122_v38 = vpack.c.bf16 %v1074_v32, %v1073_v30 }
 0x233   : > { %v757_v40 = vmax.f32 %v671_v37, 0.0  ;;  %1292 = vmatmul.bf16.gmra.mxu2 %v1122_v38  ;;  %v1448_v41 = vpack.c.bf16 %v1391_v36, %v1390_v35 }
 0x234   : > { %v963_v42 = vpop.f32.mrf.mxu1 }
 0x235   : > { %1582 = vmatmul.bf16.gmra.mxu3 %v1448_v41  ;;  %v796_v43 = vpack.c.bf16 %v757_v40, %v756_v39  ;;  %v964_v47 = vadd.f32 %v5553_v45, %v963_v42 }
 0x236   : > { %v1253_v44 = vpop.f32.mrf.mxu2 }
 0x237   : > { %1002 = vmatmul.bf16.gmra.mxu1 %v796_v43  ;;  %v1254_v49 = vadd.f32 %v5640_v8, %v1253_v44  ;;  %v1075_v52 = vmax.f32 %v964_v47, 0.0 }
 0x238   : > { %v673_v46 = vpop.f32.mrf.mxu0 }
 0x239   : > { %v674_v53 = vadd.f32 %v5492_v26, %v673_v46  ;;  %v1392_v57 = vmax.f32 %v1254_v49, 0.0  ;;  %v4704_v49 = vld [vmem:[%s6758_s1 + $0x1a8] sm:$0xff] }
 0x23a   : > { %2999 = vmatpush.bf16.msrb.mxu2 %v4704_v49 }
 0x23b   : > { %v758_v61 = vmax.f32 %v674_v53, 0.0 }
 0x23c   : > { %v965_v48 = vpop.f32.mrf.mxu1 }
 0x23d   : > { %v966_v50 = vadd.f32 %v5553_v45, %v965_v48 }
 0x23e   : > { %v1255_v51 = vpop.f32.mrf.mxu2 }
 0x23f   : > { %v1076_v54 = vmax.f32 %v966_v50, 0.0  ;;  %v1256_v55 = vadd.f32 %v5640_v8, %v1255_v51 }
 0x240   : > { %v675_v56 = vpop.f32.mrf.mxu0 }
 0x241   : > { %v1393_v58 = vmax.f32 %v1256_v55, 0.0  ;;  %v676_v59 = vadd.f32 %v5492_v26, %v675_v56  ;;  %v1123_v60 = vpack.c.bf16 %v1076_v54, %v1075_v52 }
 0x243   : > { %v759_v62 = vmax.f32 %v676_v59, 0.0  ;;  %1297 = vmatmul.bf16.gmra.mxu2 %v1123_v60  ;;  %v1449_v63 = vpack.c.bf16 %v1393_v58, %v1392_v57 }
 0x244   : > { %v968_v0 = vpop.f32.mrf.mxu1 }
 0x245   : > { %1587 = vmatmul.bf16.gmra.mxu3 %v1449_v63  ;;  %v797_v1 = vpack.c.bf16 %v759_v62, %v758_v61  ;;  %v969_v5 = vadd.f32 %v5553_v45, %v968_v0 }
 0x246   : > { %v1258_v2 = vpop.f32.mrf.mxu2 }
 0x247   : > { %1007 = vmatmul.bf16.gmra.mxu1 %v797_v1  ;;  %v1259_v26 = vadd.f32 %v5640_v8, %v1258_v2  ;;  %v1077_v10 = vmax.f32 %v969_v5, 0.0 }
 0x248   : > { %v678_v3 = vpop.f32.mrf.mxu0 }
 0x249   : > { %v679_v12 = vadd.f32 %v5722_v11, %v678_v3  ;;  %v1394_v16 = vmax.f32 %v1259_v26, 0.0 }
 0x24b   : > { %v760_v20 = vmax.f32 %v679_v12, 0.0 }
 0x24c   : > { %v970_v6 = vpop.f32.mrf.mxu1 }
 0x24d   : > { %v971_v7 = vadd.f32 %v5553_v45, %v970_v6 }
 0x24e   : > { %v1260_v9 = vpop.f32.mrf.mxu2 }
 0x24f   : > { %v1078_v13 = vmax.f32 %v971_v7, 0.0  ;;  %v1261_v14 = vadd.f32 %v5640_v8, %v1260_v9 }
 0x250   : > { %v680_v15 = vpop.f32.mrf.mxu0 }
 0x251   : > { %v1395_v17 = vmax.f32 %v1261_v14, 0.0  ;;  %v681_v18 = vadd.f32 %v5722_v11, %v680_v15  ;;  %v1124_v19 = vpack.c.bf16 %v1078_v13, %v1077_v10 }
 0x253   : > { %v761_v21 = vmax.f32 %v681_v18, 0.0  ;;  %1302 = vmatmul.bf16.gmra.mxu2 %v1124_v19  ;;  %v1450_v22 = vpack.c.bf16 %v1395_v17, %v1394_v16  ;;  %v4714_v19 = vld [vmem:[%s6758_s1 + $0x1f8] sm:$0xff] }
 0x254   : > { %v973_v23 = vpop.f32.mrf.mxu1  ;;  %3332 = vmatpush.bf16.msrb.mxu3 %v4714_v19 }
 0x255   : > { %1592 = vmatmul.bf16.gmra.mxu3 %v1450_v22  ;;  %v798_v24 = vpack.c.bf16 %v761_v21, %v760_v20  ;;  %v974_v32 = vadd.f32 %v5553_v45, %v973_v23 }
 0x256   : > { %v1263_v28 = vpop.f32.mrf.mxu2 }
 0x257   : > { %1012 = vmatmul.bf16.gmra.mxu1 %v798_v24  ;;  %v1264_v33 = vadd.f32 %v5640_v8, %v1263_v28  ;;  %v1079_v37 = vmax.f32 %v974_v32, 0.0 }
 0x258   : > { %v683_v29 = vpop.f32.mrf.mxu0  ;;  %v1553_v30 = vpop.f32.mrf.mxu3 }
 0x259   : > { %v5736_v31 = vadd.f32 %v5730_v25, %v1553_v30  ;;  %v684_v38 = vadd.f32 %v5722_v11, %v683_v29  ;;  %v1396_v41 = vmax.f32 %v1264_v33, 0.0  ;;  %v5795_v29 = vld [vmem:[%s6759_s2 + $0x1] ss:$0 sm:$0xff] }
 0x25b   : > { %1713 = vrot.lane.b32.xlu0 %v5736_v31, %s5390_s30  ;;  %v762_v50 = vmax.f32 %v684_v38, 0.0 }
 0x25c   : > { %v975_v34 = vpop.f32.mrf.mxu1 }
 0x25d   : > { %v976_v35 = vadd.f32 %v5553_v45, %v975_v34 }
 0x25e   : > { %v1265_v36 = vpop.f32.mrf.mxu2 }
 0x25f   : > { %v1080_v39 = vmax.f32 %v976_v35, 0.0  ;;  %v1266_v40 = vadd.f32 %v5640_v8, %v1265_v36 }
 0x260   : > { %v685_v42 = vpop.f32.mrf.mxu0  ;;  %v1555_v43 = vpop.f32.mrf.mxu3 }
 0x261   : > { %v1397_v44 = vmax.f32 %v1266_v40, 0.0  ;;  %v686_v46 = vadd.f32 %v5722_v11, %v685_v42  ;;  %v5747_v47 = vadd.f32 %v5730_v25, %v1555_v43  ;;  %v1125_v48 = vpack.c.bf16 %v1080_v39, %v1079_v37 }
 0x263   : > { %v763_v51 = vmax.f32 %v686_v46, 0.0  ;;  %v4878_v52 = vpack.c.bf16 %v5747_v47, %v5736_v31  ;;  %1307 = vmatmul.bf16.gmra.mxu2 %v1125_v48  ;;  %1715 = vrot.lane.b32.xlu0 %v5747_v47, %s5390_s30  ;;  %v1451_v53 = vpack.c.bf16 %v1397_v44, %v1396_v41 }
 0x264   : > { %v978_v54 = vpop.f32.mrf.mxu1 }
 0x265   : > { %4879 = vst [vmem:[%s5756_s10] sm:$0xff] %v4878_v52   ;;  %1597 = vmatmul.bf16.gmra.mxu3 %v1451_v53  ;;  %v799_v55 = vpack.c.bf16 %v763_v51, %v762_v50  ;;  %v979_v60 = vadd.f32 %v5553_v45, %v978_v54 }
 0x266   : > { %v1268_v56 = vpop.f32.mrf.mxu2 }
 0x267   : > { %1017 = vmatmul.bf16.gmra.mxu1 %v799_v55  ;;  %v1269_v61 = vadd.f32 %v5640_v8, %v1268_v56  ;;  %v1081_v1 = vmax.f32 %v979_v60, 0.0  ;;  %v4683_v55 = vld [vmem:[%s6758_s1 + $0x100] sm:$0xff] }
 0x268   : > { %v688_v57 = vpop.f32.mrf.mxu0  ;;  %v1558_v58 = vpop.f32.mrf.mxu3  ;;  %2334 = vmatpush.bf16.msrb.mxu0 %v4683_v55 }
 0x269   : > { %v5764_v59 = vadd.f32 %v5730_v25, %v1558_v58  ;;  %v689_v2 = vadd.f32 %v5722_v11, %v688_v57  ;;  %v1398_v5 = vmax.f32 %v1269_v61, 0.0 }
 0x26b   : > { %1717 = vrot.lane.b32.xlu1 %v5764_v59, %s5390_s30  ;;  %v764_v13 = vmax.f32 %v689_v2, 0.0 }
 0x26c   : > { %v980_v62 = vpop.f32.mrf.mxu1 }
 0x26d   : > { %v981_v63 = vadd.f32 %v5553_v45, %v980_v62 }
 0x26e   : > { %v1270_v0 = vpop.f32.mrf.mxu2 }
 0x26f   : > { %v1082_v3 = vmax.f32 %v981_v63, 0.0  ;;  %v1271_v4 = vadd.f32 %v5640_v8, %v1270_v0 }
 0x270   : > { %v690_v6 = vpop.f32.mrf.mxu0  ;;  %v1560_v26 = vpop.f32.mrf.mxu3 }
 0x271   : > { %v1399_v7 = vmax.f32 %v1271_v4, 0.0  ;;  %v691_v9 = vadd.f32 %v5722_v11, %v690_v6  ;;  %v5775_v10 = vadd.f32 %v5730_v25, %v1560_v26  ;;  %v1126_v12 = vpack.c.bf16 %v1082_v3, %v1081_v1 }
 0x273   : > { %v765_v14 = vmax.f32 %v691_v9, 0.0  ;;  %v4883_v15 = vpack.c.bf16 %v5775_v10, %v5764_v59  ;;  %1312 = vmatmul.bf16.gmra.mxu2 %v1126_v12  ;;  %1719 = vrot.lane.b32.xlu1 %v5775_v10, %s5390_s30  ;;  %v1452_v16 = vpack.c.bf16 %v1399_v7, %v1398_v5 }
 0x274   : > { %v983_v17 = vpop.f32.mrf.mxu1 }
 0x275   : > { %5066 = vst [vmem:[%s5756_s10 + $0x8] sm:$0xff] %v4883_v15   ;;  %1602 = vmatmul.bf16.gmra.mxu3 %v1452_v16  ;;  %v800_v18 = vpack.c.bf16 %v765_v14, %v764_v13  ;;  %v984_v24 = vadd.f32 %v5553_v45, %v983_v17  ;;  %v4693_v17 = vld [vmem:[%s6758_s1 + $0x150] sm:$0xff] }
 0x276   : > { %v1273_v20 = vpop.f32.mrf.mxu2  ;;  %2667 = vmatpush.bf16.msrb.mxu1 %v4693_v17 }
 0x277   : > { %1022 = vmatmul.bf16.gmra.mxu1 %v800_v18  ;;  %v1274_v27 = vadd.f32 %v5640_v8, %v1273_v20  ;;  %v1083_v33 = vmax.f32 %v984_v24, 0.0 }
 0x278   : > { %v693_v21 = vpop.f32.mrf.mxu0  ;;  %v1563_v22 = vpop.f32.mrf.mxu3 }
 0x279   : > { %v5786_v23 = vadd.f32 %v5730_v25, %v1563_v22  ;;  %v694_v34 = vadd.f32 %v5722_v11, %v693_v21  ;;  %v1400_v36 = vmax.f32 %v1274_v27, 0.0 }
 0x27b   : > { %1721 = vrot.lane.b32.xlu2 %v5786_v23, %s5390_s30  ;;  %v766_v43 = vmax.f32 %v694_v34, 0.0 }
 0x27c   : > { %v985_v28 = vpop.f32.mrf.mxu1 }
 0x27d   : > { %v986_v30 = vadd.f32 %v5795_v29, %v985_v28 }
 0x27e   : > { %v1275_v32 = vpop.f32.mrf.mxu2 }
 0x27f   : > { %v1084_v35 = vmax.f32 %v986_v30, 0.0  ;;  %v1276_v45 = vadd.f32 %v5640_v8, %v1275_v32 }
 0x280   : > { %v695_v37 = vpop.f32.mrf.mxu0  ;;  %v1565_v38 = vpop.f32.mrf.mxu3 }
 0x281   : > { %v1401_v39 = vmax.f32 %v1276_v45, 0.0  ;;  %v696_v40 = vadd.f32 %v5722_v11, %v695_v37  ;;  %v5802_v41 = vadd.f32 %v5730_v25, %v1565_v38  ;;  %v1127_v42 = vpack.c.bf16 %v1084_v35, %v1083_v33 }
 0x283   : > { %v767_v44 = vmax.f32 %v696_v40, 0.0  ;;  %v4888_v46 = vpack.c.bf16 %v5802_v41, %v5786_v23  ;;  %1317 = vmatmul.bf16.gmra.mxu2 %v1127_v42  ;;  %1723 = vrot.lane.b32.xlu2 %v5802_v41, %s5390_s30  ;;  %v1453_v48 = vpack.c.bf16 %v1401_v39, %v1400_v36 }
 0x284   : > { %v988_v49 = vpop.f32.mrf.mxu1 }
 0x285   : > { %5067 = vst [vmem:[%s5756_s10 + $0x10] sm:$0xff] %v4888_v46   ;;  %1607 = vmatmul.bf16.gmra.mxu3 %v1453_v48  ;;  %v801_v50 = vpack.c.bf16 %v767_v44, %v766_v43  ;;  %v989_v56 = vadd.f32 %v5795_v29, %v988_v49  ;;  %v4703_v43 = vld [vmem:[%s6758_s1 + $0x1a0] sm:$0xff] }
 0x286   : > { %v1278_v51 = vpop.f32.mrf.mxu2  ;;  %3000 = vmatpush.bf16.msrb.mxu2 %v4703_v43 }
 0x287   : > { %1027 = vmatmul.bf16.gmra.mxu1 %v801_v50  ;;  %v1279_v57 = vadd.f32 %v5640_v8, %v1278_v51  ;;  %v1085_v62 = vmax.f32 %v989_v56, 0.0 }
 0x288   : > { %v698_v52 = vpop.f32.mrf.mxu0  ;;  %v1568_v53 = vpop.f32.mrf.mxu3 }
 0x289   : > { %v5810_v54 = vadd.f32 %v5730_v25, %v1568_v53  ;;  %v699_v63 = vadd.f32 %v5722_v11, %v698_v52  ;;  %v1402_v2 = vmax.f32 %v1279_v57, 0.0 }
 0x28b   : > { %1725 = vrot.lane.b32.xlu0 %v5810_v54, %s5390_s30  ;;  %v768_v9 = vmax.f32 %v699_v63, 0.0 }
 0x28c   : > { %v990_v58 = vpop.f32.mrf.mxu1 }
 0x28d   : > { %v991_v60 = vadd.f32 %v5795_v29, %v990_v58 }
 0x28e   : > { %v1280_v61 = vpop.f32.mrf.mxu2 }
 0x28f   : > { %v1086_v0 = vmax.f32 %v991_v60, 0.0  ;;  %v1281_v1 = vadd.f32 %v5640_v8, %v1280_v61 }
 0x290   : > { %v700_v3 = vpop.f32.mrf.mxu0  ;;  %v1570_v4 = vpop.f32.mrf.mxu3 }
 0x291   : > { %v1403_v5 = vmax.f32 %v1281_v1, 0.0  ;;  %v701_v6 = vadd.f32 %v5722_v11, %v700_v3  ;;  %v5824_v26 = vadd.f32 %v5730_v25, %v1570_v4  ;;  %v1128_v7 = vpack.c.bf16 %v1086_v0, %v1085_v62 }
 0x293   : > { %v769_v12 = vmax.f32 %v701_v6, 0.0  ;;  %v4893_v13 = vpack.c.bf16 %v5824_v26, %v5810_v54  ;;  %1322 = vmatmul.bf16.gmra.mxu2 %v1128_v7  ;;  %1727 = vrot.lane.b32.xlu1 %v5824_v26, %s5390_s30  ;;  %v1454_v14 = vpack.c.bf16 %v1403_v5, %v1402_v2 }
 0x294   : > { %v993_v15 = vpop.f32.mrf.mxu1 }
 0x295   : > { %5068 = vst [vmem:[%s5756_s10 + $0x18] sm:$0xff] %v4893_v13   ;;  %1612 = vmatmul.bf16.gmra.mxu3 %v1454_v14  ;;  %v802_v16 = vpack.c.bf16 %v769_v12, %v768_v9  ;;  %v994_v22 = vadd.f32 %v5795_v29, %v993_v15  ;;  %v4713_v14 = vld [vmem:[%s6758_s1 + $0x1f0] sm:$0xff] }
 0x296   : > { %v1283_v18 = vpop.f32.mrf.mxu2  ;;  %3333 = vmatpush.bf16.msrb.mxu3 %v4713_v14 }
 0x297   : > { %1032 = vmatmul.bf16.gmra.mxu1 %v802_v16  ;;  %v1284_v24 = vadd.f32 %v5640_v8, %v1283_v18  ;;  %v1087_v32 = vmax.f32 %v994_v22, 0.0 }
 0x298   : > { %v703_v19 = vpop.f32.mrf.mxu0  ;;  %v1573_v20 = vpop.f32.mrf.mxu3 }
 0x299   : > { %v5835_v21 = vadd.f32 %v5730_v25, %v1573_v20  ;;  %v704_v33 = vadd.f32 %v5722_v11, %v703_v19  ;;  %v1404_v45 = vmax.f32 %v1284_v24, 0.0 }
 0x29b   : > { %1729 = vrot.lane.b32.xlu2 %v5835_v21, %s5390_s30  ;;  %v770_v44 = vmax.f32 %v704_v33, 0.0 }
 0x29c   : > { %v995_v27 = vpop.f32.mrf.mxu1 }
 0x29d   : > { %v996_v28 = vadd.f32 %v5795_v29, %v995_v27 }
 0x29e   : > { %v1285_v30 = vpop.f32.mrf.mxu2 }
 0x29f   : > { %v1088_v34 = vmax.f32 %v996_v28, 0.0  ;;  %v1286_v35 = vadd.f32 %v5640_v8, %v1285_v30 }
 0x2a0   : > { %v705_v36 = vpop.f32.mrf.mxu0  ;;  %v1575_v37 = vpop.f32.mrf.mxu3 }
 0x2a1   : > { %v1405_v38 = vmax.f32 %v1286_v35, 0.0  ;;  %v706_v39 = vadd.f32 %v5722_v11, %v705_v36  ;;  %v5846_v40 = vadd.f32 %v5730_v25, %v1575_v37  ;;  %v1129_v42 = vpack.c.bf16 %v1088_v34, %v1087_v32 }
 0x2a3   : > { %v771_v46 = vmax.f32 %v706_v39, 0.0  ;;  %v4898_v48 = vpack.c.bf16 %v5846_v40, %v5835_v21  ;;  %1327 = vmatmul.bf16.gmra.mxu2 %v1129_v42  ;;  %1731 = vrot.lane.b32.xlu0 %v5846_v40, %s5390_s30  ;;  %v1455_v49 = vpack.c.bf16 %v1405_v38, %v1404_v45 }
 0x2a4   : > { %v998_v50 = vpop.f32.mrf.mxu1 }
 0x2a5   : > { %5069 = vst [vmem:[%s5756_s10 + $0x20] sm:$0xff] %v4898_v48   ;;  %1617 = vmatmul.bf16.gmra.mxu3 %v1455_v49  ;;  %v803_v11 = vpack.c.bf16 %v771_v46, %v770_v44  ;;  %v999_v55 = vadd.f32 %v5795_v29, %v998_v50 }
 0x2a6   : > { %v1288_v51 = vpop.f32.mrf.mxu2 }
 0x2a7   : > { %1037 = vmatmul.bf16.gmra.mxu1 %v803_v11  ;;  %v1289_v57 = vadd.f32 %v5640_v8, %v1288_v51  ;;  %v1089_v61 = vmax.f32 %v999_v55, 0.0 }
 0x2a8   : > { %v1578_v52 = vpop.f32.mrf.mxu3 }
 0x2a9   : > { %v5857_v53 = vadd.f32 %v5730_v25, %v1578_v52  ;;  %v1406_v1 = vmax.f32 %v1289_v57, 0.0 }
 0x2ab   : > { %1733 = vrot.lane.b32.xlu1 %v5857_v53, %s5390_s30 }
 0x2ac   : > { %v1000_v56 = vpop.f32.mrf.mxu1 }
 0x2ad   : > { %v1001_v58 = vadd.f32 %v5795_v29, %v1000_v56 }
 0x2ae   : > { %v1290_v60 = vpop.f32.mrf.mxu2 }
 0x2af   : > { %v1090_v62 = vmax.f32 %v1001_v58, 0.0  ;;  %v1291_v63 = vadd.f32 %v5640_v8, %v1290_v60 }
 0x2b0   : > { %v1580_v0 = vpop.f32.mrf.mxu3 }
 0x2b1   : > { %v1407_v2 = vmax.f32 %v1291_v63, 0.0  ;;  %v5866_v3 = vadd.f32 %v5730_v25, %v1580_v0  ;;  %v1130_v4 = vpack.c.bf16 %v1090_v62, %v1089_v61 }
 0x2b3   : > { %v4903_v5 = vpack.c.bf16 %v5866_v3, %v5857_v53  ;;  %1332 = vmatmul.bf16.gmra.mxu2 %v1130_v4  ;;  %1735 = vrot.lane.b32.xlu2 %v5866_v3, %s5390_s30  ;;  %v1456_v6 = vpack.c.bf16 %v1407_v2, %v1406_v1  ;;  %v4692_v1 = vld [vmem:[%s6758_s1 + $0x148] sm:$0xff] }
 0x2b4   : > { %v1003_v7 = vpop.f32.mrf.mxu1  ;;  %2668 = vmatpush.bf16.msrb.mxu1 %v4692_v1 }
 0x2b5   : > { %5070 = vst [vmem:[%s5756_s10 + $0x28] sm:$0xff] %v4903_v5   ;;  %1622 = vmatmul.bf16.gmra.mxu3 %v1456_v6  ;;  %v1004_v15 = vadd.f32 %v5795_v29, %v1003_v7  ;;  %v215_v7 = vld [vmem:[%s5454_s11] sm:$0xff]  }
 0x2b6   : > { %v1293_v9 = vpop.f32.mrf.mxu2  ;;  %v2033_v14 = vunpack.c.l.bf16 %v215_v7 }
 0x2b7   : > { %v1294_v17 = vadd.f32 %v5640_v8, %v1293_v9  ;;  %v1091_v20 = vmax.f32 %v1004_v15, 0.0 }
 0x2b8   : > { %v1583_v12 = vpop.f32.mrf.mxu3 }
 0x2b9   : > { %v5874_v13 = vadd.f32 %v5730_v25, %v1583_v12  ;;  %v1408_v28 = vmax.f32 %v1294_v17, 0.0 }
 0x2bb   : > { %1737 = vrot.lane.b32.xlu0 %v5874_v13, %s5390_s30 }
 0x2bc   : > { %v1005_v16 = vpop.f32.mrf.mxu1 }
 0x2bd   : > { %v1006_v18 = vadd.f32 %v5795_v29, %v1005_v16 }
 0x2be   : > { %v1295_v19 = vpop.f32.mrf.mxu2 }
 0x2bf   : > { %v1092_v22 = vmax.f32 %v1006_v18, 0.0  ;;  %v1296_v24 = vadd.f32 %v5640_v8, %v1295_v19 }
 0x2c0   : > { %v1585_v27 = vpop.f32.mrf.mxu3 }
 0x2c1   : > { %v1409_v30 = vmax.f32 %v1296_v24, 0.0  ;;  %v5886_v32 = vadd.f32 %v5730_v25, %v1585_v27  ;;  %v1131_v33 = vpack.c.bf16 %v1092_v22, %v1091_v20  ;;  %v2034_v20 = vunpack.c.h.bf16 %v215_v7 }
 0x2c3   : > { %v4908_v34 = vpack.c.bf16 %v5886_v32, %v5874_v13  ;;  %1337 = vmatmul.bf16.gmra.mxu2 %v1131_v33  ;;  %1739 = vrot.lane.b32.xlu1 %v5886_v32, %s5390_s30  ;;  %v1457_v35 = vpack.c.bf16 %v1409_v30, %v1408_v28  ;;  %v5925_v33 = vld [vmem:[%s6759_s2 + $0x2] ss:$0 sm:$0xff] }
 0x2c4   : > { %v1008_v45 = vpop.f32.mrf.mxu1 }
 0x2c5   : > { %5071 = vst [vmem:[%s5756_s10 + $0x30] sm:$0xff] %v4908_v34   ;;  %1627 = vmatmul.bf16.gmra.mxu3 %v1457_v35  ;;  %v1009_v39 = vadd.f32 %v5795_v29, %v1008_v45 }
 0x2c6   : > { %v1298_v36 = vpop.f32.mrf.mxu2 }
 0x2c7   : > { %v1299_v43 = vadd.f32 %v5640_v8, %v1298_v36  ;;  %v1093_v49 = vmax.f32 %v1009_v39, 0.0 }
 0x2c8   : > { %v1588_v37 = vpop.f32.mrf.mxu3 }
 0x2c9   : > { %v5894_v38 = vadd.f32 %v5730_v25, %v1588_v37  ;;  %v1410_v55 = vmax.f32 %v1299_v43, 0.0 }
 0x2cb   : > { %1741 = vrot.lane.b32.xlu2 %v5894_v38, %s5390_s30 }
 0x2cc   : > { %v1010_v42 = vpop.f32.mrf.mxu1 }
 0x2cd   : > { %v1011_v44 = vadd.f32 %v5795_v29, %v1010_v42  ;;  %v1714_v46 = vpop.permute.xlu0 %1713 }
 0x2ce   : > { %v1300_v48 = vpop.f32.mrf.mxu2  ;;  %v1841_v11 = vmul.f32 0.5, %v1714_v46  ;;  %v4702_v46 = vld [vmem:[%s6758_s1 + $0x198] sm:$0xff] }
 0x2cf   : > { %v1094_v50 = vmax.f32 %v1011_v44, 0.0  ;;  %v1301_v51 = vadd.f32 %v5640_v8, %v1300_v48  ;;  %3001 = vmatpush.bf16.msrb.mxu2 %v4702_v46 }
 0x2d0   : > { %v1590_v52 = vpop.f32.mrf.mxu3  ;;  %v1905_v60 = vmul.f32 1.442695, %v1841_v11 }
 0x2d1   : > { %v1411_v56 = vmax.f32 %v1301_v51, 0.0  ;;  %v5903_v57 = vadd.f32 %v5730_v25, %v1590_v52  ;;  %v1132_v58 = vpack.c.bf16 %v1094_v50, %v1093_v49 }
 0x2d2   : > { %5114 = vpow2.f32 %v1905_v60  ;;  %v217_v60 = vld [vmem:[%s5454_s11 + $0x8] sm:$0xff]  }
 0x2d3   : > { %v4913_v61 = vpack.c.bf16 %v5903_v57, %v5894_v38  ;;  %1342 = vmatmul.bf16.gmra.mxu2 %v1132_v58  ;;  %1743 = vrot.lane.b32.xlu0 %v5903_v57, %s5390_s30  ;;  %v1458_v62 = vpack.c.bf16 %v1411_v56, %v1410_v55  ;;  %v2036_v7 = vunpack.c.h.bf16 %v217_v60 }
 0x2d4   : > { %v1013_v63 = vpop.f32.mrf.mxu1 }
 0x2d5   : > { %5072 = vst [vmem:[%s5756_s10 + $0x38] sm:$0xff] %v4913_v61   ;;  %1632 = vmatmul.bf16.gmra.mxu3 %v1458_v62  ;;  %v1716_v0 = vpop.permute.xlu0 %1715  ;;  %v1014_v12 = vadd.f32 %v5795_v29, %v1013_v63  ;;  %v1722_v28 = vpop.permute.xlu2 %1721 }
 0x2d6   : > { %v1842_v2 = vmul.f32 0.5, %v1716_v0  ;;  %v1303_v4 = vpop.f32.mrf.mxu2 }
 0x2d7   : > { %v1304_v15 = vadd.f32 %v5640_v8, %v1303_v4  ;;  %v1095_v27 = vmax.f32 %v1014_v12, 0.0 }
 0x2d8   : > { %v1907_v5 = vmul.f32 1.442695, %v1842_v2  ;;  %v1593_v6 = vpop.f32.mrf.mxu3  ;;  %v5115_v17 = vpop.eup %5114 }
 0x2d9   : > { %v5915_v9 = vadd.f32 %v5730_v25, %v1593_v6  ;;  %v2097_v35 = vmul.f32 %v5115_v17, %v2033_v14  ;;  %v1412_v8 = vmax.f32 %v1304_v15, 0.0  ;;  %v1845_v15 = vmul.f32 0.5, %v1722_v28 }
 0x2da   : > { %5116 = vpow2.f32 %v1907_v5 }
 0x2db   : > { %1745 = vrot.lane.b32.xlu1 %v5915_v9, %s5390_s30  ;;  %v2161_v11 = vadd.f32 %v2097_v35, %v5736_v31  ;;  %v2035_v31 = vunpack.c.l.bf16 %v217_v60 }
 0x2dc   : > { %v1015_v16 = vpop.f32.mrf.mxu1 }
 0x2dd   : > { %v1016_v18 = vadd.f32 %v5795_v29, %v1015_v16  ;;  %v1718_v19 = vpop.permute.xlu1 %1717  ;;  %v1724_v63 = vpop.permute.xlu2 %1723 }
 0x2de   : > { %v1843_v22 = vmul.f32 0.5, %v1718_v19  ;;  %v1305_v24 = vpop.f32.mrf.mxu2  ;;  %v1846_v2 = vmul.f32 0.5, %v1724_v63 }
 0x2df   : > { %v1096_v30 = vmax.f32 %v1016_v18, 0.0  ;;  %v1306_v34 = vadd.f32 %v5925_v33, %v1305_v24 }
 0x2e0   : > { %v1595_v45 = vpop.f32.mrf.mxu3  ;;  %v5117_v36 = vpop.eup %5116  ;;  %v1909_v37 = vmul.f32 1.442695, %v1843_v22 }
 0x2e1   : > { %v1413_v39 = vmax.f32 %v1306_v34, 0.0  ;;  %v5929_v42 = vadd.f32 %v5730_v25, %v1595_v45  ;;  %v1133_v43 = vpack.c.bf16 %v1096_v30, %v1095_v27  ;;  %v2098_v44 = vmul.f32 %v5117_v36, %v2034_v20 }
 0x2e2   : > { %5118 = vpow2.f32 %v1909_v37  ;;  %v1915_v20 = vmul.f32 1.442695, %v1846_v2  ;;  %v1913_v45 = vmul.f32 1.442695, %v1845_v15 }
 0x2e3   : > { %v4918_v48 = vpack.c.bf16 %v5929_v42, %v5915_v9  ;;  %1347 = vmatmul.bf16.gmra.mxu2 %v1133_v43  ;;  %1747 = vrot.lane.b32.xlu2 %v5929_v42, %s5390_s30  ;;  %v1459_v49 = vpack.c.bf16 %v1413_v39, %v1412_v8  ;;  %v2162_v51 = vadd.f32 %v2098_v44, %v5747_v47 }
 0x2e4   : > { %v1018_v50 = vpop.f32.mrf.mxu1 }
 0x2e5   : > { %5073 = vst [vmem:[%s5756_s10 + $0x40] sm:$0xff] %v4918_v48   ;;  %1637 = vmatmul.bf16.gmra.mxu3 %v1459_v49  ;;  %v1720_v52 = vpop.permute.xlu1 %1719  ;;  %v2225_v58 = vpack.c.bf16 %v2162_v51, %v2161_v11  ;;  %v1019_v47 = vadd.f32 %v5795_v29, %v1018_v50  ;;  %v219_v49 = vld [vmem:[%s5454_s11 + $0x10] sm:$0xff]  }
 0x2e6   : > { %v1844_v55 = vmul.f32 0.5, %v1720_v52  ;;  %v1308_v56 = vpop.f32.mrf.mxu2  ;;  %v2038_v50 = vunpack.c.h.bf16 %v219_v49 }
 0x2e7   : > { %2335 = vmatmul.bf16.vlgmr.msrb.gmra.mxu0 %v2225_v58  ;;  %v1309_v4 = vadd.f32 %v5925_v33, %v1308_v56  ;;  %v1097_v16 = vmax.f32 %v1019_v47, 0.0 }
 0x2e8   : > { %v1911_v61 = vmul.f32 1.442695, %v1844_v55  ;;  %v1598_v62 = vpop.f32.mrf.mxu3  ;;  %v5119_v1 = vpop.eup %5118  ;;  %v2037_v55 = vunpack.c.l.bf16 %v219_v49 }
 0x2e9   : > { %v5943_v0 = vadd.f32 %v5730_v25, %v1598_v62  ;;  %v2099_v14 = vmul.f32 %v5119_v1, %v2035_v31  ;;  %v1414_v22 = vmax.f32 %v1309_v4, 0.0 }
 0x2ea   : > { %5120 = vpow2.f32 %v1911_v61 }
 0x2eb   : > { %1749 = vrot.lane.b32.xlu0 %v5943_v0, %s5390_s30  ;;  %v2163_v8 = vadd.f32 %v2099_v14, %v5764_v59  ;;  %5122 = vpow2.f32 %v1915_v20  ;;  %v4712_v59 = vld [vmem:[%s6758_s1 + $0x1e8] sm:$0xff] }
 0x2ec   : > { %v1020_v5 = vpop.f32.mrf.mxu1  ;;  %5124 = vpow2.f32 %v1913_v45  ;;  %3334 = vmatpush.bf16.msrb.mxu3 %v4712_v59 }
 0x2ed   : > { %v1021_v6 = vadd.f32 %v5795_v29, %v1020_v5 }
 0x2ee   : > { %v1310_v12 = vpop.f32.mrf.mxu2 }
 0x2ef   : > { %v1098_v17 = vmax.f32 %v1021_v6, 0.0  ;;  %v1311_v18 = vadd.f32 %v5925_v33, %v1310_v12 }
 0x2f0   : > { %v5121_v19 = vpop.eup %5120  ;;  %v1600_v24 = vpop.f32.mrf.mxu3 }
 0x2f1   : > { %v1415_v27 = vmax.f32 %v1311_v18, 0.0  ;;  %v5952_v30 = vadd.f32 %v5730_v25, %v1600_v24  ;;  %v1134_v34 = vpack.c.bf16 %v1098_v17, %v1097_v16  ;;  %v2100_v35 = vmul.f32 %v5121_v19, %v2036_v7 }
 0x2f3   : > { %v4923_v28 = vpack.c.bf16 %v5952_v30, %v5943_v0  ;;  %1352 = vmatmul.bf16.gmra.mxu2 %v1134_v34  ;;  %1751 = vrot.lane.b32.xlu1 %v5952_v30, %s5390_s30  ;;  %v1460_v36 = vpack.c.bf16 %v1415_v27, %v1414_v22  ;;  %v2164_v37 = vadd.f32 %v2100_v35, %v5775_v10  ;;  %v5123_v10 = vpop.eup %5122  ;;  %v221_v34 = vld [vmem:[%s5454_s11 + $0x18] sm:$0xff]  }
 0x2f4   : > { %v1023_v39 = vpop.f32.mrf.mxu1  ;;  %v5125_v56 = vpop.eup %5124  ;;  %v2102_v63 = vmul.f32 %v5123_v10, %v2038_v50 }
 0x2f5   : > { %5074 = vst [vmem:[%s5756_s10 + $0x48] sm:$0xff] %v4923_v28   ;;  %1642 = vmatmul.bf16.gmra.mxu3 %v1460_v36  ;;  %v2226_v43 = vpack.c.bf16 %v2164_v37, %v2163_v8  ;;  %v1024_v11 = vadd.f32 %v5795_v29, %v1023_v39  ;;  %v2101_v5 = vmul.f32 %v5125_v56, %v2037_v55  ;;  %v1730_v8 = vpop.permute.xlu2 %1729  ;;  %v2039_v28 = vunpack.c.l.bf16 %v221_v34 }
 0x2f6   : > { %v1313_v44 = vpop.f32.mrf.mxu2  ;;  %v2166_v15 = vadd.f32 %v2102_v63, %v5802_v41  ;;  %v1849_v37 = vmul.f32 0.5, %v1730_v8 }
 0x2f7   : > { %2340 = vmatmul.bf16.gmra.mxu0 %v2226_v43  ;;  %v1314_v51 = vadd.f32 %v5925_v33, %v1313_v44  ;;  %v1099_v31 = vmax.f32 %v1024_v11, 0.0  ;;  %v2165_v19 = vadd.f32 %v2101_v5, %v5786_v23  ;;  %v2040_v44 = vunpack.c.h.bf16 %v221_v34 }
 0x2f8   : > { %v1603_v46 = vpop.f32.mrf.mxu3 }
 0x2f9   : > { %v5965_v48 = vadd.f32 %v5730_v25, %v1603_v46  ;;  %v1416_v2 = vmax.f32 %v1314_v51, 0.0  ;;  %v2227_v27 = vpack.c.bf16 %v2166_v15, %v2165_v19 }
 0x2fb   : > { %1753 = vrot.lane.b32.xlu2 %v5965_v48, %s5390_s30 }
 0x2fc   : > { %v1025_v52 = vpop.f32.mrf.mxu1 }
 0x2fd   : > { %v1026_v58 = vadd.f32 %v5795_v29, %v1025_v52  ;;  %v1726_v60 = vpop.permute.xlu0 %1725  ;;  %v1921_v52 = vmul.f32 1.442695, %v1849_v37 }
 0x2fe   : > { %v1847_v61 = vmul.f32 0.5, %v1726_v60  ;;  %v1315_v62 = vpop.f32.mrf.mxu2 }
 0x2ff   : > { %v1100_v1 = vmax.f32 %v1026_v58, 0.0  ;;  %v1316_v47 = vadd.f32 %v5925_v33, %v1315_v62 }
 0x300   : > { %v1605_v4 = vpop.f32.mrf.mxu3  ;;  %v1917_v6 = vmul.f32 1.442695, %v1847_v61 }
 0x301   : > { %v1417_v7 = vmax.f32 %v1316_v47, 0.0  ;;  %v5975_v12 = vadd.f32 %v5730_v25, %v1605_v4  ;;  %v1135_v14 = vpack.c.bf16 %v1100_v1, %v1099_v31 }
 0x302   : > { %5126 = vpow2.f32 %v1917_v6 }
 0x303   : > { %v4928_v16 = vpack.c.bf16 %v5975_v12, %v5965_v48  ;;  %1357 = vmatmul.bf16.gmra.mxu2 %v1135_v14  ;;  %1755 = vrot.lane.b32.xlu0 %v5975_v12, %s5390_s30  ;;  %v1461_v17 = vpack.c.bf16 %v1417_v7, %v1416_v2  ;;  %v223_v14 = vld [vmem:[%s5454_s11 + $0x20] sm:$0xff]  }
 0x304   : > { %v1028_v18 = vpop.f32.mrf.mxu1 }
 0x305   : > { %5075 = vst [vmem:[%s5756_s10 + $0x50] sm:$0xff] %v4928_v16   ;;  %1647 = vmatmul.bf16.gmra.mxu3 %v1461_v17  ;;  %v1728_v20 = vpop.permute.xlu1 %1727  ;;  %v1029_v23 = vadd.f32 %v5795_v29, %v1028_v18 }
 0x306   : > { %v1848_v22 = vmul.f32 0.5, %v1728_v20  ;;  %v1318_v24 = vpop.f32.mrf.mxu2 }
 0x307   : > { %2345 = vmatmul.bf16.gmra.mxu0 %v2227_v27  ;;  %v1319_v39 = vadd.f32 %v5925_v33, %v1318_v24  ;;  %v1101_v50 = vmax.f32 %v1029_v23, 0.0 }
 0x308   : > { %v1919_v41 = vmul.f32 1.442695, %v1848_v22  ;;  %v1608_v35 = vpop.f32.mrf.mxu3  ;;  %v5127_v36 = vpop.eup %5126 }
 0x309   : > { %v5986_v45 = vadd.f32 %v5730_v25, %v1608_v35  ;;  %v2103_v49 = vmul.f32 %v5127_v36, %v2039_v28  ;;  %v1418_v55 = vmax.f32 %v1319_v39, 0.0 }
 0x30a   : > { %5128 = vpow2.f32 %v1919_v41  ;;  %v2042_v41 = vunpack.c.h.bf16 %v223_v14 }
 0x30b   : > { %1757 = vrot.lane.b32.xlu1 %v5986_v45, %s5390_s30  ;;  %v2167_v63 = vadd.f32 %v2103_v49, %v5810_v54  ;;  %5130 = vpow2.f32 %v1921_v52  ;;  %v4691_v54 = vld [vmem:[%s6758_s1 + $0x140] sm:$0xff]  ;;  %v4701_v52 = vld [vmem:[%s6758_s1 + $0x190] sm:$0xff] }
 0x30c   : > { %v1030_v43 = vpop.f32.mrf.mxu1  ;;  %2669 = vmatpush.bf16.msrb.mxu1 %v4691_v54  ;;  %3002 = vmatpush.bf16.msrb.mxu2 %v4701_v52 }
 0x30d   : > { %v1031_v59 = vadd.f32 %v5795_v29, %v1030_v43  ;;  %v1736_v20 = vpop.permute.xlu2 %1735 }
 0x30e   : > { %v1320_v46 = vpop.f32.mrf.mxu2  ;;  %v1852_v36 = vmul.f32 0.5, %v1736_v20 }
 0x30f   : > { %v1102_v10 = vmax.f32 %v1031_v59, 0.0  ;;  %v1321_v11 = vadd.f32 %v5925_v33, %v1320_v46 }
 0x310   : > { %v5129_v51 = vpop.eup %5128  ;;  %v1610_v56 = vpop.f32.mrf.mxu3 }
 0x311   : > { %v1419_v58 = vmax.f32 %v1321_v11, 0.0  ;;  %v5995_v60 = vadd.f32 %v5730_v25, %v1610_v56  ;;  %v1136_v61 = vpack.c.bf16 %v1102_v10, %v1101_v50  ;;  %v2104_v62 = vmul.f32 %v5129_v51, %v2040_v44  ;;  %v5131_v18 = vpop.eup %5130 }
 0x313   : > { %v4933_v31 = vpack.c.bf16 %v5995_v60, %v5986_v45  ;;  %1362 = vmatmul.bf16.gmra.mxu2 %v1136_v61  ;;  %1759 = vrot.lane.b32.xlu2 %v5995_v60, %s5390_s30  ;;  %v1462_v1 = vpack.c.bf16 %v1419_v58, %v1418_v55  ;;  %v2168_v47 = vadd.f32 %v2104_v62, %v5824_v26  ;;  %v2041_v26 = vunpack.c.l.bf16 %v223_v14 }
 0x314   : > { %v1033_v2 = vpop.f32.mrf.mxu1  ;;  %v1927_v55 = vmul.f32 1.442695, %v1852_v36 }
 0x315   : > { %5076 = vst [vmem:[%s5756_s10 + $0x58] sm:$0xff] %v4933_v31   ;;  %1652 = vmatmul.bf16.gmra.mxu3 %v1462_v1  ;;  %v1732_v4 = vpop.permute.xlu0 %1731  ;;  %v2228_v5 = vpack.c.bf16 %v2168_v47, %v2167_v63  ;;  %v1034_v19 = vadd.f32 %v5795_v29, %v1033_v2  ;;  %v2105_v28 = vmul.f32 %v5131_v18, %v2041_v26  ;;  %v225_v47 = vld [vmem:[%s5454_s11 + $0x28] sm:$0xff]  }
 0x316   : > { %v1850_v6 = vmul.f32 0.5, %v1732_v4  ;;  %v1323_v7 = vpop.f32.mrf.mxu2  ;;  %v2043_v2 = vunpack.c.l.bf16 %v225_v47  ;;  %v2044_v54 = vunpack.c.h.bf16 %v225_v47 }
 0x317   : > { %2350 = vmatmul.bf16.gmra.mxu0 %v2228_v5  ;;  %v1324_v22 = vadd.f32 %v5925_v33, %v1323_v7  ;;  %v1103_v23 = vmax.f32 %v1034_v19, 0.0  ;;  %v2169_v51 = vadd.f32 %v2105_v28, %v5835_v21 }
 0x318   : > { %v1923_v15 = vmul.f32 1.442695, %v1850_v6  ;;  %v1613_v16 = vpop.f32.mrf.mxu3 }
 0x319   : > { %v6009_v17 = vadd.f32 %v5730_v25, %v1613_v16  ;;  %v1420_v59 = vmax.f32 %v1324_v22, 0.0 }
 0x31a   : > { %5132 = vpow2.f32 %v1923_v15 }
 0x31b   : > { %1761 = vrot.lane.b32.xlu0 %v6009_v17, %s5390_s30 }
 0x31c   : > { %v1035_v24 = vpop.f32.mrf.mxu1 }
 0x31d   : > { %v1036_v27 = vadd.f32 %v5795_v29, %v1035_v24  ;;  %v1734_v34 = vpop.permute.xlu1 %1733 }
 0x31e   : > { %v1851_v35 = vmul.f32 0.5, %v1734_v34  ;;  %v1325_v8 = vpop.f32.mrf.mxu2 }
 0x31f   : > { %v1104_v37 = vmax.f32 %v1036_v27, 0.0  ;;  %v1326_v39 = vadd.f32 %v5925_v33, %v1325_v8 }
 0x320   : > { %v5133_v43 = vpop.eup %5132  ;;  %v1925_v44 = vmul.f32 1.442695, %v1851_v35  ;;  %v1615_v46 = vpop.f32.mrf.mxu3 }
 0x321   : > { %v1421_v49 = vmax.f32 %v1326_v39, 0.0  ;;  %v6018_v50 = vadd.f32 %v5730_v25, %v1615_v46  ;;  %v1137_v10 = vpack.c.bf16 %v1104_v37, %v1103_v23  ;;  %v2106_v11 = vmul.f32 %v5133_v43, %v2042_v41 }
 0x322   : > { %5134 = vpow2.f32 %v1925_v44 }
 0x323   : > { %v4938_v56 = vpack.c.bf16 %v6018_v50, %v6009_v17  ;;  %1367 = vmatmul.bf16.gmra.mxu2 %v1137_v10  ;;  %1763 = vrot.lane.b32.xlu1 %v6018_v50, %s5390_s30  ;;  %v1463_v58 = vpack.c.bf16 %v1421_v49, %v1420_v59  ;;  %v2170_v61 = vadd.f32 %v2106_v11, %v5846_v40  ;;  %5136 = vpow2.f32 %v1927_v55  ;;  %v227_v49 = vld [vmem:[%s5454_s11 + $0x30] sm:$0xff]  }
 0x324   : > { %v1038_v62 = vpop.f32.mrf.mxu1 }
 0x325   : > { %5077 = vst [vmem:[%s5756_s10 + $0x60] sm:$0xff] %v4938_v56   ;;  %1657 = vmatmul.bf16.gmra.mxu3 %v1463_v58  ;;  %v2229_v21 = vpack.c.bf16 %v2170_v61, %v2169_v51  ;;  %v1039_v5 = vadd.f32 %v5795_v29, %v1038_v62  ;;  %v1742_v10 = vpop.permute.xlu2 %1741  ;;  %v2045_v51 = vunpack.c.l.bf16 %v227_v49  ;;  %v2046_v58 = vunpack.c.h.bf16 %v227_v49 }
 0x326   : > { %v1328_v63 = vpop.f32.mrf.mxu2  ;;  %v1855_v55 = vmul.f32 0.5, %v1742_v10 }
 0x327   : > { %2355 = vmatmul.bf16.gmra.mxu0 %v2229_v21  ;;  %v1329_v7 = vadd.f32 %v5925_v33, %v1328_v63  ;;  %v1105_v19 = vmax.f32 %v1039_v5, 0.0 }
 0x328   : > { %v1618_v31 = vpop.f32.mrf.mxu3  ;;  %v5135_v4 = vpop.eup %5134 }
 0x329   : > { %v6031_v1 = vadd.f32 %v5730_v25, %v1618_v31  ;;  %v5137_v6 = vpop.eup %5136  ;;  %v2107_v18 = vmul.f32 %v5135_v4, %v2043_v2  ;;  %v1422_v34 = vmax.f32 %v1329_v7, 0.0  ;;  %v1933_v31 = vmul.f32 1.442695, %v1855_v55 }
 0x32a   : > { %v2108_v27 = vmul.f32 %v5137_v6, %v2044_v54 }
 0x32b   : > { %1765 = vrot.lane.b32.xlu2 %v6031_v1, %s5390_s30 }
 0x32c   : > { %v1040_v40 = vpop.f32.mrf.mxu1  ;;  %v2172_v37 = vadd.f32 %v2108_v27, %v5866_v3  ;;  %v6057_v3 = vld [vmem:[%s6759_s2 + $0x3] ss:$0 sm:$0xff] }
 0x32d   : > { %v1041_v14 = vadd.f32 %v5795_v29, %v1040_v40  ;;  %v1738_v15 = vpop.permute.xlu0 %1737  ;;  %v2171_v29 = vadd.f32 %v2107_v18, %v5857_v53 }
 0x32e   : > { %v1853_v16 = vmul.f32 0.5, %v1738_v15  ;;  %v1330_v26 = vpop.f32.mrf.mxu2 }
 0x32f   : > { %v1106_v20 = vmax.f32 %v1041_v14, 0.0  ;;  %v1331_v22 = vadd.f32 %v5925_v33, %v1330_v26  ;;  %v2230_v59 = vpack.c.bf16 %v2172_v37, %v2171_v29 }
 0x330   : > { %v1620_v24 = vpop.f32.mrf.mxu3  ;;  %v1929_v28 = vmul.f32 1.442695, %v1853_v16 }
 0x331   : > { %v1423_v41 = vmax.f32 %v1331_v22, 0.0  ;;  %v6041_v35 = vadd.f32 %v5730_v25, %v1620_v24  ;;  %v1138_v8 = vpack.c.bf16 %v1106_v20, %v1105_v19  ;;  %v4711_v25 = vld [vmem:[%s6758_s1 + $0x1e0] sm:$0xff]  ;;  %v229_v19 = vld [vmem:[%s5454_s11 + $0x38] sm:$0xff]  }
 0x332   : > { %5138 = vpow2.f32 %v1929_v28  ;;  %3335 = vmatpush.bf16.msrb.mxu3 %v4711_v25  ;;  %v2047_v27 = vunpack.c.l.bf16 %v229_v19 }
 0x333   : > { %v4943_v36 = vpack.c.bf16 %v6041_v35, %v6031_v1  ;;  %1372 = vmatmul.bf16.gmra.mxu2 %v1138_v8  ;;  %1767 = vrot.lane.b32.xlu0 %v6041_v35, %s5390_s30  ;;  %v1464_v23 = vpack.c.bf16 %v1423_v41, %v1422_v34  ;;  %v2048_v8 = vunpack.c.h.bf16 %v229_v19 }
 0x335   : > { %5078 = vst [vmem:[%s5756_s10 + $0x68] sm:$0xff] %v4943_v36   ;;  %1662 = vmatmul.bf16.gmra.mxu3 %v1464_v23  ;;  %v1740_v39 = vpop.permute.xlu1 %1739 }
 0x336   : > { %v1854_v53 = vmul.f32 0.5, %v1740_v39  ;;  %v1333_v43 = vpop.f32.mrf.mxu2 }
 0x337   : > { %2360 = vmatmul.bf16.gmra.mxu0 %v2230_v59  ;;  %v1334_v56 = vadd.f32 %v5925_v33, %v1333_v43 }
 0x338   : > { %v1931_v44 = vmul.f32 1.442695, %v1854_v53  ;;  %v1623_v46 = vpop.f32.mrf.mxu3  ;;  %v5139_v52 = vpop.eup %5138 }
 0x339   : > { %v6060_v11 = vadd.f32 %v6057_v3, %v1623_v46  ;;  %v2109_v21 = vmul.f32 %v5139_v52, %v2045_v51  ;;  %v1424_v2 = vmax.f32 %v1334_v56, 0.0 }
 0x33a   : > { %5140 = vpow2.f32 %v1931_v44 }
 0x33b   : > { %1769 = vrot.lane.b32.xlu1 %v6060_v11, %s5390_s30  ;;  %v2173_v7 = vadd.f32 %v2109_v21, %v5874_v13  ;;  %5142 = vpow2.f32 %v1933_v31 }
 0x33d   : > { %v1748_v13 = vpop.permute.xlu2 %1747 }
 0x33e   : > { %v1335_v61 = vpop.f32.mrf.mxu2  ;;  %v1858_v23 = vmul.f32 0.5, %v1748_v13 }
 0x33f   : > { %v1336_v62 = vadd.f32 %v5925_v33, %v1335_v61 }
 0x340   : > { %v5141_v63 = vpop.eup %5140  ;;  %v1625_v47 = vpop.f32.mrf.mxu3  ;;  %v1939_v10 = vmul.f32 1.442695, %v1858_v23  ;;  %v233_v23 = vld [vmem:[%s5454_s11 + $0x48] sm:$0xff]  }
 0x341   : > { %v1425_v4 = vmax.f32 %v1336_v62, 0.0  ;;  %v6067_v5 = vadd.f32 %v6057_v3, %v1625_v47  ;;  %v2110_v40 = vmul.f32 %v5141_v63, %v2046_v58  ;;  %v5143_v34 = vpop.eup %5142  ;;  %v231_v62 = vld [vmem:[%s5454_s11 + $0x40] sm:$0xff]  }
 0x342   : > { %v2111_v36 = vmul.f32 %v5143_v34, %v2047_v27  ;;  %v2049_v21 = vunpack.c.l.bf16 %v231_v62  ;;  %v2050_v31 = vunpack.c.h.bf16 %v231_v62 }
 0x343   : > { %v4948_v54 = vpack.c.bf16 %v6067_v5, %v6060_v11  ;;  %1771 = vrot.lane.b32.xlu2 %v6067_v5, %s5390_s30  ;;  %v1465_v6 = vpack.c.bf16 %v1425_v4, %v1424_v2  ;;  %v2174_v14 = vadd.f32 %v2110_v40, %v5886_v32 }
 0x344   : > { %v2175_v49 = vadd.f32 %v2111_v36, %v5894_v38 }
 0x345   : > { %5079 = vst [vmem:[%s5756_s10 + $0x70] sm:$0xff] %v4948_v54   ;;  %1667 = vmatmul.bf16.gmra.mxu3 %v1465_v6  ;;  %v1744_v15 = vpop.permute.xlu0 %1743  ;;  %v2231_v16 = vpack.c.bf16 %v2174_v14, %v2173_v7 }
 0x346   : > { %v1856_v26 = vmul.f32 0.5, %v1744_v15  ;;  %v1338_v18 = vpop.f32.mrf.mxu2 }
 0x347   : > { %2365 = vmatmul.bf16.gmra.mxu0 %v2231_v16  ;;  %v1339_v32 = vadd.f32 %v5925_v33, %v1338_v18 }
 0x348   : > { %v1935_v20 = vmul.f32 1.442695, %v1856_v26  ;;  %v1628_v22 = vpop.f32.mrf.mxu3 }
 0x349   : > { %v6078_v24 = vadd.f32 %v6057_v3, %v1628_v22  ;;  %v1426_v25 = vmax.f32 %v1339_v32, 0.0 }
 0x34a   : > { %5144 = vpow2.f32 %v1935_v20  ;;  %v4700_v20 = vld [vmem:[%s6758_s1 + $0x188] sm:$0xff] }
 0x34b   : > { %1773 = vrot.lane.b32.xlu0 %v6078_v24, %s5390_s30  ;;  %3003 = vmatpush.bf16.msrb.mxu2 %v4700_v20  ;;  %v235_v20 = vld [vmem:[%s5454_s11 + $0x50] sm:$0xff]  }
 0x34d   : > { %v1746_v41 = vpop.permute.xlu1 %1745 }
 0x34e   : > { %v1857_v28 = vmul.f32 0.5, %v1746_v41  ;;  %v1340_v29 = vpop.f32.mrf.mxu2 }
 0x34f   : > { %v1341_v37 = vadd.f32 %v5925_v33, %v1340_v29 }
 0x350   : > { %v5145_v39 = vpop.eup %5144  ;;  %v1630_v53 = vpop.f32.mrf.mxu3  ;;  %v1937_v43 = vmul.f32 1.442695, %v1857_v28  ;;  %v6118_v28 = vld [vmem:[%s6759_s2 + $0x4] ss:$0 sm:$0xff] }
 0x351   : > { %v1427_v59 = vmax.f32 %v1341_v37, 0.0  ;;  %v6085_v44 = vadd.f32 %v6057_v3, %v1630_v53  ;;  %v2112_v46 = vmul.f32 %v5145_v39, %v2048_v8  ;;  %v2051_v39 = vunpack.c.l.bf16 %v233_v23 }
 0x352   : > { %5146 = vpow2.f32 %v1937_v43 }
 0x353   : > { %v4953_v51 = vpack.c.bf16 %v6085_v44, %v6078_v24  ;;  %1775 = vrot.lane.b32.xlu1 %v6085_v44, %s5390_s30  ;;  %v1466_v52 = vpack.c.bf16 %v1427_v59, %v1426_v25  ;;  %v2176_v55 = vadd.f32 %v2112_v46, %v5903_v57  ;;  %5148 = vpow2.f32 %v1939_v10 }
 0x355   : > { %5080 = vst [vmem:[%s5756_s10 + $0x78] sm:$0xff] %v4953_v51   ;;  %1672 = vmatmul.bf16.gmra.mxu3 %v1466_v52  ;;  %v2232_v56 = vpack.c.bf16 %v2176_v55, %v2175_v49  ;;  %v1754_v37 = vpop.permute.xlu2 %1753  ;;  %v2052_v49 = vunpack.c.h.bf16 %v233_v23 }
 0x356   : > { %v1343_v58 = vpop.f32.mrf.mxu2  ;;  %v1861_v53 = vmul.f32 0.5, %v1754_v37 }
 0x357   : > { %2370 = vmatmul.bf16.gmra.mxu0 %v2232_v56  ;;  %v1344_v57 = vadd.f32 %v5925_v33, %v1343_v58 }
 0x358   : > { %v1633_v61 = vpop.f32.mrf.mxu3  ;;  %v5147_v63 = vpop.eup %5146  ;;  %v1945_v58 = vmul.f32 1.442695, %v1861_v53 }
 0x359   : > { %v6095_v38 = vadd.f32 %v6057_v3, %v1633_v61  ;;  %v5149_v47 = vpop.eup %5148  ;;  %v2113_v54 = vmul.f32 %v5147_v63, %v2049_v21  ;;  %v1428_v15 = vmax.f32 %v1344_v57, 0.0 }
 0x35a   : > { %v2114_v14 = vmul.f32 %v5149_v47, %v2050_v31 }
 0x35b   : > { %1777 = vrot.lane.b32.xlu2 %v6095_v38, %s5390_s30  ;;  %v2177_v19 = vadd.f32 %v2113_v54, %v5915_v9 }
 0x35c   : > { %v2178_v34 = vadd.f32 %v2114_v14, %v5929_v42 }
 0x35d   : > { %v1750_v2 = vpop.permute.xlu0 %1749 }
 0x35e   : > { %v1859_v4 = vmul.f32 0.5, %v1750_v2  ;;  %v1345_v40 = vpop.f32.mrf.mxu2  ;;  %v2233_v8 = vpack.c.bf16 %v2178_v34, %v2177_v19 }
 0x35f   : > { %v1346_v6 = vadd.f32 %v5925_v33, %v1345_v40 }
 0x360   : > { %v1635_v7 = vpop.f32.mrf.mxu3  ;;  %v1941_v18 = vmul.f32 1.442695, %v1859_v4 }
 0x361   : > { %v1429_v16 = vmax.f32 %v1346_v6, 0.0  ;;  %v6103_v26 = vadd.f32 %v6057_v3, %v1635_v7 }
 0x362   : > { %5150 = vpow2.f32 %v1941_v18 }
 0x363   : > { %v4958_v22 = vpack.c.bf16 %v6103_v26, %v6095_v38  ;;  %1779 = vrot.lane.b32.xlu0 %v6103_v26, %s5390_s30  ;;  %v1467_v27 = vpack.c.bf16 %v1429_v16, %v1428_v15  ;;  %v4710_v16 = vld [vmem:[%s6758_s1 + $0x1d8] sm:$0xff] }
 0x364   : > { %v2336_v13 = vpop.f32.mrf.mxu0  ;;  %3336 = vmatpush.bf16.msrb.mxu3 %v4710_v16 }
 0x365   : > { %5081 = vst [vmem:[%s5756_s10 + $0x80] sm:$0xff] %v4958_v22   ;;  %1677 = vmatmul.bf16.gmra.mxu3 %v1467_v27  ;;  %v1752_v32 = vpop.permute.xlu1 %1751  ;;  %v2337_v43 = vadd.f32 %v6118_v28, %v2336_v13  ;;  %v2053_v27 = vunpack.c.l.bf16 %v235_v20 }
 0x366   : > { %v1860_v9 = vmul.f32 0.5, %v1752_v32  ;;  %v1348_v41 = vpop.f32.mrf.mxu2 }
 0x367   : > { %2375 = vmatmul.bf16.gmra.mxu0 %v2233_v8  ;;  %v1349_v59 = vadd.f32 %v5925_v33, %v1348_v41  ;;  %v2496_v61 = vmax.f32 %v2337_v43, 0.0 }
 0x368   : > { %v1943_v29 = vmul.f32 1.442695, %v1860_v9  ;;  %v1638_v36 = vpop.f32.mrf.mxu3  ;;  %v5151_v25 = vpop.eup %5150 }
 0x369   : > { %v6122_v42 = vadd.f32 %v6057_v3, %v1638_v36  ;;  %v2115_v55 = vmul.f32 %v5151_v25, %v2051_v39  ;;  %v1430_v63 = vmax.f32 %v1349_v59, 0.0 }
 0x36a   : > { %5152 = vpow2.f32 %v1943_v29  ;;  %v2054_v29 = vunpack.c.h.bf16 %v235_v20 }
 0x36b   : > { %1781 = vrot.lane.b32.xlu1 %v6122_v42, %s5390_s30  ;;  %v2179_v54 = vadd.f32 %v2115_v55, %v5943_v0  ;;  %5154 = vpow2.f32 %v1945_v58 }
 0x36c   : > { %v2338_v46 = vpop.f32.mrf.mxu0 }
 0x36d   : > { %v2339_v10 = vadd.f32 %v6118_v28, %v2338_v46  ;;  %v1760_v13 = vpop.permute.xlu2 %1759 }
 0x36e   : > { %v1350_v51 = vpop.f32.mrf.mxu2  ;;  %v1864_v25 = vmul.f32 0.5, %v1760_v13 }
 0x36f   : > { %v1351_v52 = vadd.f32 %v5925_v33, %v1350_v51  ;;  %v2497_v62 = vmax.f32 %v2339_v10, 0.0 }
 0x370   : > { %v5153_v56 = vpop.eup %5152  ;;  %v1640_v21 = vpop.f32.mrf.mxu3 }
 0x371   : > { %v1431_v31 = vmax.f32 %v1351_v52, 0.0  ;;  %v6131_v47 = vadd.f32 %v6057_v3, %v1640_v21  ;;  %v2116_v57 = vmul.f32 %v5153_v56, %v2052_v49  ;;  %v2560_v2 = vpack.c.bf16 %v2497_v62, %v2496_v61  ;;  %v5155_v34 = vpop.eup %5154 }
 0x372   : > { %v2117_v39 = vmul.f32 %v5155_v34, %v2053_v27  ;;  %v1951_v62 = vmul.f32 1.442695, %v1864_v25 }
 0x373   : > { %v4963_v4 = vpack.c.bf16 %v6131_v47, %v6122_v42  ;;  %1783 = vrot.lane.b32.xlu2 %v6131_v47, %s5390_s30  ;;  %v1468_v40 = vpack.c.bf16 %v1431_v31, %v1430_v63  ;;  %v2180_v6 = vadd.f32 %v2116_v57, %v5952_v30  ;;  %2670 = vmatmul.bf16.vlgmr.msrb.gmra.mxu1 %v2560_v2 }
 0x374   : > { %v2341_v7 = vpop.f32.mrf.mxu0  ;;  %v2181_v61 = vadd.f32 %v2117_v39, %v5965_v48 }
 0x375   : > { %5082 = vst [vmem:[%s5756_s10 + $0x88] sm:$0xff] %v4963_v4   ;;  %1682 = vmatmul.bf16.gmra.mxu3 %v1468_v40  ;;  %v1756_v14 = vpop.permute.xlu0 %1755  ;;  %v2234_v15 = vpack.c.bf16 %v2180_v6, %v2179_v54  ;;  %v2342_v32 = vadd.f32 %v6118_v28, %v2341_v7  ;;  %v237_v54 = vld [vmem:[%s5454_s11 + $0x58] sm:$0xff]  }
 0x376   : > { %v1862_v18 = vmul.f32 0.5, %v1756_v14  ;;  %v1353_v19 = vpop.f32.mrf.mxu2  ;;  %v2055_v6 = vunpack.c.l.bf16 %v237_v54  ;;  %v2056_v14 = vunpack.c.h.bf16 %v237_v54 }
 0x377   : > { %2380 = vmatmul.bf16.gmra.mxu0 %v2234_v15  ;;  %v1354_v9 = vadd.f32 %v5925_v33, %v1353_v19  ;;  %v2498_v59 = vmax.f32 %v2342_v32, 0.0 }
 0x378   : > { %v1947_v22 = vmul.f32 1.442695, %v1862_v18  ;;  %v1643_v0 = vpop.f32.mrf.mxu3 }
 0x379   : > { %v6145_v30 = vadd.f32 %v6057_v3, %v1643_v0  ;;  %v1432_v46 = vmax.f32 %v1354_v9, 0.0 }
 0x37a   : > { %5156 = vpow2.f32 %v1947_v22 }
 0x37b   : > { %1785 = vrot.lane.b32.xlu0 %v6145_v30, %s5390_s30 }
 0x37c   : > { %v2343_v41 = vpop.f32.mrf.mxu0 }
 0x37d   : > { %v1758_v8 = vpop.permute.xlu1 %1757  ;;  %v2344_v36 = vadd.f32 %v6118_v28, %v2343_v41 }
 0x37e   : > { %v1863_v23 = vmul.f32 0.5, %v1758_v8  ;;  %v1355_v37 = vpop.f32.mrf.mxu2 }
 0x37f   : > { %v1356_v53 = vadd.f32 %v5925_v33, %v1355_v37  ;;  %v2499_v49 = vmax.f32 %v2344_v36, 0.0 }
 0x380   : > { %v5157_v43 = vpop.eup %5156  ;;  %v1645_v10 = vpop.f32.mrf.mxu3  ;;  %v1949_v51 = vmul.f32 1.442695, %v1863_v23 }
 0x381   : > { %v1433_v52 = vmax.f32 %v1356_v53, 0.0  ;;  %v6154_v55 = vadd.f32 %v6057_v3, %v1645_v10  ;;  %v2118_v56 = vmul.f32 %v5157_v43, %v2054_v29  ;;  %v2561_v58 = vpack.c.bf16 %v2499_v49, %v2498_v59 }
 0x382   : > { %5158 = vpow2.f32 %v1949_v51 }
 0x383   : > { %v4968_v21 = vpack.c.bf16 %v6154_v55, %v6145_v30  ;;  %1787 = vrot.lane.b32.xlu1 %v6154_v55, %s5390_s30  ;;  %v1469_v63 = vpack.c.bf16 %v1433_v52, %v1432_v46  ;;  %v2182_v31 = vadd.f32 %v2118_v56, %v5975_v12  ;;  %2675 = vmatmul.bf16.gmra.mxu1 %v2561_v58  ;;  %5160 = vpow2.f32 %v1951_v62  ;;  %v239_v56 = vld [vmem:[%s5454_s11 + $0x60] sm:$0xff]  }
 0x384   : > { %v2346_v57 = vpop.f32.mrf.mxu0 }
 0x385   : > { %5083 = vst [vmem:[%s5756_s10 + $0x90] sm:$0xff] %v4968_v21   ;;  %1687 = vmatmul.bf16.gmra.mxu3 %v1469_v63  ;;  %v2235_v2 = vpack.c.bf16 %v2182_v31, %v2181_v61  ;;  %v2347_v12 = vadd.f32 %v6118_v28, %v2346_v57  ;;  %v1766_v58 = vpop.permute.xlu2 %1765 }
 0x386   : > { %v1358_v4 = vpop.f32.mrf.mxu2  ;;  %v1867_v21 = vmul.f32 0.5, %v1766_v58 }
 0x387   : > { %2385 = vmatmul.bf16.gmra.mxu0 %v2235_v2  ;;  %v1359_v16 = vadd.f32 %v5925_v33, %v1358_v4  ;;  %v2500_v13 = vmax.f32 %v2347_v12, 0.0  ;;  %v2058_v2 = vunpack.c.h.bf16 %v239_v56 }
 0x388   : > { %v1648_v48 = vpop.f32.mrf.mxu3  ;;  %v5159_v7 = vpop.eup %5158  ;;  %v1957_v12 = vmul.f32 1.442695, %v1867_v21 }
 0x389   : > { %v6164_v40 = vadd.f32 %v6057_v3, %v1648_v48  ;;  %v5161_v15 = vpop.eup %5160  ;;  %v2119_v27 = vmul.f32 %v5159_v7, %v2055_v6  ;;  %v1434_v8 = vmax.f32 %v1359_v16, 0.0 }
 0x38a   : > { %v2120_v41 = vmul.f32 %v5161_v15, %v2056_v14 }
 0x38b   : > { %1789 = vrot.lane.b32.xlu2 %v6164_v40, %s5390_s30  ;;  %v2183_v39 = vadd.f32 %v2119_v27, %v5986_v45  ;;  %v4699_v27 = vld [vmem:[%s6758_s1 + $0x180] sm:$0xff] }
 0x38c   : > { %v2348_v18 = vpop.f32.mrf.mxu0  ;;  %v2184_v43 = vadd.f32 %v2120_v41, %v5995_v60  ;;  %v2057_v60 = vunpack.c.l.bf16 %v239_v56  ;;  %3004 = vmatpush.bf16.msrb.mxu2 %v4699_v27 }
 0x38d   : > { %v1762_v19 = vpop.permute.xlu0 %1761  ;;  %v2349_v20 = vadd.f32 %v6118_v28, %v2348_v18 }
 0x38e   : > { %v1865_v22 = vmul.f32 0.5, %v1762_v19  ;;  %v1360_v0 = vpop.f32.mrf.mxu2  ;;  %v2236_v51 = vpack.c.bf16 %v2184_v43, %v2183_v39 }
 0x38f   : > { %v1361_v34 = vadd.f32 %v5925_v33, %v1360_v0  ;;  %v2501_v32 = vmax.f32 %v2349_v20, 0.0 }
 0x390   : > { %v1650_v9 = vpop.f32.mrf.mxu3  ;;  %v1953_v23 = vmul.f32 1.442695, %v1865_v22 }
 0x391   : > { %v1435_v29 = vmax.f32 %v1361_v34, 0.0  ;;  %v6174_v36 = vadd.f32 %v6057_v3, %v1650_v9  ;;  %v2562_v37 = vpack.c.bf16 %v2501_v32, %v2500_v13 }
 0x392   : > { %5162 = vpow2.f32 %v1953_v23 }
 0x393   : > { %v4973_v25 = vpack.c.bf16 %v6174_v36, %v6164_v40  ;;  %1791 = vrot.lane.b32.xlu0 %v6174_v36, %s5390_s30  ;;  %v1470_v53 = vpack.c.bf16 %v1435_v29, %v1434_v8  ;;  %2680 = vmatmul.bf16.gmra.mxu1 %v2562_v37  ;;  %v241_v37 = vld [vmem:[%s5454_s11 + $0x68] sm:$0xff]  }
 0x394   : > { %v2351_v59 = vpop.f32.mrf.mxu0 }
 0x395   : > { %5084 = vst [vmem:[%s5756_s10 + $0x98] sm:$0xff] %v4973_v25   ;;  %1692 = vmatmul.bf16.gmra.mxu3 %v1470_v53  ;;  %v1764_v46 = vpop.permute.xlu1 %1763  ;;  %v2352_v63 = vadd.f32 %v6118_v28, %v2351_v59 }
 0x396   : > { %v1866_v49 = vmul.f32 0.5, %v1764_v46  ;;  %v1363_v10 = vpop.f32.mrf.mxu2  ;;  %v5374_v46 = vld [vmem:[%s6759_s2 + $0x2] ss:$0 sm:$0xff] }
 0x397   : > { %2390 = vmatmul.bf16.gmra.mxu0 %v2236_v51  ;;  %v1364_v31 = vadd.f32 %v5925_v33, %v1363_v10  ;;  %v2502_v14 = vmax.f32 %v2352_v63, 0.0 }
 0x398   : > { %v1955_v45 = vmul.f32 1.442695, %v1866_v49  ;;  %v1653_v52 = vpop.f32.mrf.mxu3  ;;  %v5163_v62 = vpop.eup %5162 }
 0x399   : > { %v6185_v61 = vadd.f32 %v6057_v3, %v1653_v52  ;;  %v2121_v6 = vmul.f32 %v5163_v62, %v2057_v60  ;;  %v1436_v18 = vmax.f32 %v1364_v31, 0.0 }
 0x39a   : > { %5164 = vpow2.f32 %v1955_v45  ;;  %v2060_v45 = vunpack.c.h.bf16 %v241_v37 }
 0x39b   : > { %1793 = vrot.lane.b32.xlu1 %v6185_v61, %s5390_s30  ;;  %v2185_v13 = vadd.f32 %v2121_v6, %v6009_v17  ;;  %5166 = vpow2.f32 %v1957_v12  ;;  %v2059_v17 = vunpack.c.l.bf16 %v241_v37 }
 0x39c   : > { %v2353_v57 = vpop.f32.mrf.mxu0 }
 0x39d   : > { %v2354_v4 = vadd.f32 %v6118_v28, %v2353_v57  ;;  %v1772_v43 = vpop.permute.xlu2 %1771 }
 0x39e   : > { %v1365_v48 = vpop.f32.mrf.mxu2  ;;  %v1870_v62 = vmul.f32 0.5, %v1772_v43 }
 0x39f   : > { %v1366_v54 = vadd.f32 %v5925_v33, %v1365_v48  ;;  %v2503_v15 = vmax.f32 %v2354_v4, 0.0 }
 0x3a0   : > { %v5165_v7 = vpop.eup %5164  ;;  %v1655_v16 = vpop.f32.mrf.mxu3 }
 0x3a1   : > { %v1437_v19 = vmax.f32 %v1366_v54, 0.0  ;;  %v6194_v20 = vadd.f32 %v6057_v3, %v1655_v16  ;;  %v2122_v22 = vmul.f32 %v5165_v7, %v2058_v2  ;;  %v2563_v0 = vpack.c.bf16 %v2503_v15, %v2502_v14 }
 0x3a2   : > { %v1963_v15 = vmul.f32 1.442695, %v1870_v62 }
 0x3a3   : > { %v4978_v33 = vpack.c.bf16 %v6194_v20, %v6185_v61  ;;  %1795 = vrot.lane.b32.xlu2 %v6194_v20, %s5390_s30  ;;  %v1471_v34 = vpack.c.bf16 %v1437_v19, %v1436_v18  ;;  %v2186_v32 = vadd.f32 %v2122_v22, %v6018_v50  ;;  %2685 = vmatmul.bf16.gmra.mxu1 %v2563_v0  ;;  %v5167_v50 = vpop.eup %5166 }
 0x3a4   : > { %v2356_v9 = vpop.f32.mrf.mxu0  ;;  %v2123_v60 = vmul.f32 %v5167_v50, %v2059_v17 }
 0x3a5   : > { %5085 = vst [vmem:[%s5756_s10 + $0xa0] sm:$0xff] %v4978_v33   ;;  %1697 = vmatmul.bf16.gmra.mxu3 %v1471_v34  ;;  %v1768_v41 = vpop.permute.xlu0 %1767  ;;  %v2237_v8 = vpack.c.bf16 %v2186_v32, %v2185_v13  ;;  %v2357_v59 = vadd.f32 %v6118_v28, %v2356_v9  ;;  %v243_v13 = vld [vmem:[%s5454_s11 + $0x70] sm:$0xff]  }
 0x3a6   : > { %v1868_v29 = vmul.f32 0.5, %v1768_v41  ;;  %v1368_v23 = vpop.f32.mrf.mxu2  ;;  %v2187_v14 = vadd.f32 %v2123_v60, %v6031_v1  ;;  %v4709_v1 = vld [vmem:[%s6758_s1 + $0x1d0] sm:$0xff]  ;;  %v2062_v41 = vunpack.c.h.bf16 %v243_v13 }
 0x3a7   : > { %2395 = vmatmul.bf16.gmra.mxu0 %v2237_v8  ;;  %v1369_v49 = vadd.f32 %v5374_v46, %v1368_v23  ;;  %v2504_v31 = vmax.f32 %v2357_v59, 0.0  ;;  %3337 = vmatpush.bf16.msrb.mxu3 %v4709_v1 }
 0x3a8   : > { %v1959_v39 = vmul.f32 1.442695, %v1868_v29  ;;  %v1658_v25 = vpop.f32.mrf.mxu3 }
 0x3a9   : > { %v6208_v53 = vadd.f32 %v6057_v3, %v1658_v25  ;;  %v1438_v57 = vmax.f32 %v1369_v49, 0.0 }
 0x3aa   : > { %5168 = vpow2.f32 %v1959_v39 }
 0x3ab   : > { %1797 = vrot.lane.b32.xlu0 %v6208_v53, %s5390_s30 }
 0x3ac   : > { %v2358_v10 = vpop.f32.mrf.mxu0 }
 0x3ad   : > { %v1770_v51 = vpop.permute.xlu1 %1769  ;;  %v2359_v52 = vadd.f32 %v6118_v28, %v2358_v10 }
 0x3ae   : > { %v1869_v56 = vmul.f32 0.5, %v1770_v51  ;;  %v1370_v58 = vpop.f32.mrf.mxu2 }
 0x3af   : > { %v1371_v21 = vadd.f32 %v5374_v46, %v1370_v58  ;;  %v2505_v2 = vmax.f32 %v2359_v52, 0.0 }
 0x3b0   : > { %v5169_v63 = vpop.eup %5168  ;;  %v1660_v4 = vpop.f32.mrf.mxu3  ;;  %v1961_v48 = vmul.f32 1.442695, %v1869_v56 }
 0x3b1   : > { %v1439_v54 = vmax.f32 %v1371_v21, 0.0  ;;  %v6218_v6 = vadd.f32 %v6057_v3, %v1660_v4  ;;  %v2124_v7 = vmul.f32 %v5169_v63, %v2060_v45  ;;  %v2564_v12 = vpack.c.bf16 %v2505_v2, %v2504_v31 }
 0x3b2   : > { %5170 = vpow2.f32 %v1961_v48 }
 0x3b3   : > { %v4983_v16 = vpack.c.bf16 %v6218_v6, %v6208_v53  ;;  %1799 = vrot.lane.b32.xlu1 %v6218_v6, %s5390_s30  ;;  %v1472_v18 = vpack.c.bf16 %v1439_v54, %v1438_v57  ;;  %v2188_v19 = vadd.f32 %v2124_v7, %v6041_v35  ;;  %2690 = vmatmul.bf16.gmra.mxu1 %v2564_v12  ;;  %5172 = vpow2.f32 %v1963_v15  ;;  %v245_v54 = vld [vmem:[%s5454_s11 + $0x78] sm:$0xff]  }
 0x3b4   : > { %v2361_v22 = vpop.f32.mrf.mxu0  ;;  %v2061_v35 = vunpack.c.l.bf16 %v243_v13 }
 0x3b5   : > { %5086 = vst [vmem:[%s5756_s10 + $0xa8] sm:$0xff] %v4983_v16   ;;  %1702 = vmatmul.bf16.gmra.mxu3 %v1472_v18  ;;  %v2238_v0 = vpack.c.bf16 %v2188_v19, %v2187_v14  ;;  %v2362_v9 = vadd.f32 %v6118_v28, %v2361_v22  ;;  %v1778_v12 = vpop.permute.xlu2 %1777  ;;  %v2064_v18 = vunpack.c.h.bf16 %v245_v54 }
 0x3b6   : > { %v1373_v27 = vpop.f32.mrf.mxu2  ;;  %v1873_v19 = vmul.f32 0.5, %v1778_v12 }
 0x3b7   : > { %2400 = vmatmul.bf16.gmra.mxu0 %v2238_v0  ;;  %v1374_v29 = vadd.f32 %v5374_v46, %v1373_v27  ;;  %v2506_v59 = vmax.f32 %v2362_v9, 0.0 }
 0x3b8   : > { %v1663_v33 = vpop.f32.mrf.mxu3  ;;  %v5171_v32 = vpop.eup %5170  ;;  %v1969_v9 = vmul.f32 1.442695, %v1873_v19 }
 0x3b9   : > { %v6231_v34 = vadd.f32 %v6057_v3, %v1663_v33  ;;  %v5173_v8 = vpop.eup %5172  ;;  %v2125_v50 = vmul.f32 %v5171_v32, %v2061_v35  ;;  %v1440_v45 = vmax.f32 %v1374_v29, 0.0 }
 0x3ba   : > { %v2126_v51 = vmul.f32 %v5173_v8, %v2062_v41 }
 0x3bb   : > { %1801 = vrot.lane.b32.xlu2 %v6231_v34, %s5390_s30  ;;  %v2189_v62 = vadd.f32 %v2125_v50, %v6060_v11 }
 0x3bc   : > { %v2363_v23 = vpop.f32.mrf.mxu0  ;;  %v2190_v63 = vadd.f32 %v2126_v51, %v6067_v5  ;;  %v2063_v5 = vunpack.c.l.bf16 %v245_v54 }
 0x3bd   : > { %v1774_v37 = vpop.permute.xlu0 %1773  ;;  %v2364_v39 = vadd.f32 %v6118_v28, %v2363_v23 }
 0x3be   : > { %v1871_v25 = vmul.f32 0.5, %v1774_v37  ;;  %v1375_v17 = vpop.f32.mrf.mxu2  ;;  %v2239_v4 = vpack.c.bf16 %v2190_v63, %v2189_v62 }
 0x3bf   : > { %v1376_v43 = vadd.f32 %v5374_v46, %v1375_v17  ;;  %v2507_v49 = vmax.f32 %v2364_v39, 0.0 }
 0x3c0   : > { %v1665_v10 = vpop.f32.mrf.mxu3  ;;  %v1965_v58 = vmul.f32 1.442695, %v1871_v25 }
 0x3c1   : > { %v1441_v52 = vmax.f32 %v1376_v43, 0.0  ;;  %v6239_v56 = vadd.f32 %v6057_v3, %v1665_v10  ;;  %v2565_v60 = vpack.c.bf16 %v2507_v49, %v2506_v59  ;;  %v247_v59 = vld [vmem:[%s5454_s11 + $0x80] sm:$0xff]  }
 0x3c2   : > { %5174 = vpow2.f32 %v1965_v58  ;;  %v2066_v58 = vunpack.c.h.bf16 %v247_v59 }
 0x3c3   : > { %v4988_v21 = vpack.c.bf16 %v6239_v56, %v6231_v34  ;;  %1803 = vrot.lane.b32.xlu0 %v6239_v56, %s5390_s30  ;;  %v1473_v46 = vpack.c.bf16 %v1441_v52, %v1440_v45  ;;  %2695 = vmatmul.bf16.gmra.mxu1 %v2565_v60 }
 0x3c4   : > { %v2366_v31 = vpop.f32.mrf.mxu0 }
 0x3c5   : > { %5087 = vst [vmem:[%s5756_s10 + $0xb0] sm:$0xff] %v4988_v21   ;;  %1707 = vmatmul.bf16.gmra.mxu3 %v1473_v46  ;;  %v1776_v57 = vpop.permute.xlu1 %1775  ;;  %v2367_v15 = vadd.f32 %v6118_v28, %v2366_v31 }
 0x3c6   : > { %v1872_v2 = vmul.f32 0.5, %v1776_v57 }
 0x3c7   : > { %2405 = vmatmul.bf16.gmra.mxu0 %v2239_v4  ;;  %v2508_v27 = vmax.f32 %v2367_v15, 0.0 }
 0x3c8   : > { %v1967_v48 = vmul.f32 1.442695, %v1872_v2  ;;  %v1668_v11 = vpop.f32.mrf.mxu3  ;;  %v5175_v14 = vpop.eup %5174 }
 0x3c9   : > { %v6250_v7 = vadd.f32 %v6057_v3, %v1668_v11  ;;  %v2127_v0 = vmul.f32 %v5175_v14, %v2063_v5 }
 0x3ca   : > { %5176 = vpow2.f32 %v1967_v48 }
 0x3cb   : > { %1805 = vrot.lane.b32.xlu1 %v6250_v7, %s5390_s30  ;;  %v2191_v29 = vadd.f32 %v2127_v0, %v6078_v24  ;;  %5178 = vpow2.f32 %v1969_v9  ;;  %v2065_v24 = vunpack.c.l.bf16 %v247_v59  ;;  %v249_v0 = vld [vmem:[%s5454_s11 + $0x88] sm:$0xff]  }
 0x3cc   : > { %v2368_v16 = vpop.f32.mrf.mxu0 }
 0x3cd   : > { %v2369_v22 = vadd.f32 %v6118_v28, %v2368_v16  ;;  %v1784_v10 = vpop.permute.xlu2 %1783 }
 0x3ce   : > { %v1876_v21 = vmul.f32 0.5, %v1784_v10 }
 0x3cf   : > { %v2509_v33 = vmax.f32 %v2369_v22, 0.0 }
 0x3d0   : > { %v5177_v1 = vpop.eup %5176  ;;  %v1670_v13 = vpop.f32.mrf.mxu3  ;;  %v1975_v12 = vmul.f32 1.442695, %v1876_v21 }
 0x3d1   : > { %v6257_v35 = vadd.f32 %v6057_v3, %v1670_v13  ;;  %v2128_v32 = vmul.f32 %v5177_v1, %v2064_v18  ;;  %v2566_v41 = vpack.c.bf16 %v2509_v33, %v2508_v27  ;;  %v2067_v1 = vunpack.c.l.bf16 %v249_v0 }
 0x3d3   : > { %v4993_v8 = vpack.c.bf16 %v6257_v35, %v6250_v7  ;;  %1807 = vrot.lane.b32.xlu2 %v6257_v35, %s5390_s30  ;;  %v2192_v23 = vadd.f32 %v2128_v32, %v6085_v44  ;;  %2700 = vmatmul.bf16.gmra.mxu1 %v2566_v41  ;;  %v5179_v44 = vpop.eup %5178 }
 0x3d4   : > { %v2371_v37 = vpop.f32.mrf.mxu0  ;;  %v2129_v46 = vmul.f32 %v5179_v44, %v2065_v24  ;;  %v6303_v44 = vld [vmem:[%s6759_s2 + $0x5] ss:$0 sm:$0xff] }
 0x3d5   : > { %5088 = vst [vmem:[%s5756_s10 + $0xb8] sm:$0xff] %v4993_v8   ;;  %v1780_v39 = vpop.permute.xlu0 %1779  ;;  %v2240_v25 = vpack.c.bf16 %v2192_v23, %v2191_v29  ;;  %v2372_v51 = vadd.f32 %v6118_v28, %v2371_v37 }
 0x3d6   : > { %v1874_v17 = vmul.f32 0.5, %v1780_v39  ;;  %v2193_v14 = vadd.f32 %v2129_v46, %v6095_v38  ;;  %v251_v46 = vld [vmem:[%s5454_s11 + $0x90] sm:$0xff]  }
 0x3d7   : > { %2410 = vmatmul.bf16.gmra.mxu0 %v2240_v25  ;;  %v2510_v31 = vmax.f32 %v2372_v51, 0.0 }
 0x3d8   : > { %v1971_v50 = vmul.f32 1.442695, %v1874_v17  ;;  %v1673_v43 = vpop.f32.mrf.mxu3 }
 0x3d9   : > { %v6268_v49 = vadd.f32 %v6057_v3, %v1673_v43 }
 0x3da   : > { %5180 = vpow2.f32 %v1971_v50 }
 0x3db   : > { %1809 = vrot.lane.b32.xlu0 %v6268_v49, %s5390_s30 }
 0x3dc   : > { %v2373_v45 = vpop.f32.mrf.mxu0 }
 0x3dd   : > { %v1782_v52 = vpop.permute.xlu1 %1781  ;;  %v2374_v60 = vadd.f32 %v6118_v28, %v2373_v45 }
 0x3de   : > { %v1875_v62 = vmul.f32 0.5, %v1782_v52 }
 0x3df   : > { %v2511_v57 = vmax.f32 %v2374_v60, 0.0 }
 0x3e0   : > { %v5181_v63 = vpop.eup %5180  ;;  %v1675_v2 = vpop.f32.mrf.mxu3  ;;  %v1973_v4 = vmul.f32 1.442695, %v1875_v62 }
 0x3e1   : > { %v6275_v48 = vadd.f32 %v6057_v3, %v1675_v2  ;;  %v2130_v11 = vmul.f32 %v5181_v63, %v2066_v58  ;;  %v2567_v54 = vpack.c.bf16 %v2511_v57, %v2510_v31  ;;  %v2069_v2 = vunpack.c.l.bf16 %v251_v46 }
 0x3e2   : > { %5182 = vpow2.f32 %v1973_v4 }
 0x3e3   : > { %v4998_v5 = vpack.c.bf16 %v6275_v48, %v6268_v49  ;;  %1811 = vrot.lane.b32.xlu1 %v6275_v48, %s5390_s30  ;;  %v2194_v15 = vadd.f32 %v2130_v11, %v6103_v26  ;;  %2705 = vmatmul.bf16.gmra.mxu1 %v2567_v54  ;;  %5184 = vpow2.f32 %v1975_v12  ;;  %v2068_v26 = vunpack.c.h.bf16 %v249_v0 }
 0x3e4   : > { %v2376_v16 = vpop.f32.mrf.mxu0 }
 0x3e5   : > { %5089 = vst [vmem:[%s5756_s10 + $0xc0] sm:$0xff] %v4998_v5   ;;  %v2241_v18 = vpack.c.bf16 %v2194_v15, %v2193_v14  ;;  %v2377_v38 = vadd.f32 %v6118_v28, %v2376_v16  ;;  %v1790_v57 = vpop.permute.xlu2 %1789  ;;  %v2070_v14 = vunpack.c.h.bf16 %v251_v46 }
 0x3e6   : > { %v1879_v15 = vmul.f32 0.5, %v1790_v57 }
 0x3e7   : > { %2415 = vmatmul.bf16.gmra.mxu0 %v2241_v18  ;;  %v2512_v29 = vmax.f32 %v2377_v38, 0.0 }
 0x3e8   : > { %v1678_v19 = vpop.f32.mrf.mxu3  ;;  %v5183_v27 = vpop.eup %5182 }
 0x3e9   : > { %v6285_v22 = vadd.f32 %v6057_v3, %v1678_v19  ;;  %v5185_v33 = vpop.eup %5184  ;;  %v2131_v8 = vmul.f32 %v5183_v27, %v2067_v1 }
 0x3ea   : > { %v2132_v39 = vmul.f32 %v5185_v33, %v2068_v26 }
 0x3eb   : > { %1813 = vrot.lane.b32.xlu2 %v6285_v22, %s5390_s30  ;;  %v2195_v59 = vadd.f32 %v2131_v8, %v6122_v42  ;;  %v4708_v42 = vld [vmem:[%s6758_s1 + $0x1c8] sm:$0xff] }
 0x3ec   : > { %v2378_v13 = vpop.f32.mrf.mxu0  ;;  %v2196_v10 = vadd.f32 %v2132_v39, %v6131_v47  ;;  %3338 = vmatpush.bf16.msrb.mxu3 %v4708_v42 }
 0x3ed   : > { %v1786_v32 = vpop.permute.xlu0 %1785  ;;  %v2379_v9 = vadd.f32 %v6118_v28, %v2378_v13 }
 0x3ee   : > { %v1877_v41 = vmul.f32 0.5, %v1786_v32  ;;  %v2242_v58 = vpack.c.bf16 %v2196_v10, %v2195_v59  ;;  %v1981_v32 = vmul.f32 1.442695, %v1879_v15  ;;  %v253_v59 = vld [vmem:[%s5454_s11 + $0x98] sm:$0xff]  }
 0x3ef   : > { %v2513_v23 = vmax.f32 %v2379_v9, 0.0  ;;  %v2072_v46 = vunpack.c.h.bf16 %v253_v59 }
 0x3f0   : > { %v1680_v37 = vpop.f32.mrf.mxu3  ;;  %v2671_v17 = vpop.f32.mrf.mxu1  ;;  %v1977_v50 = vmul.f32 1.442695, %v1877_v41 }
 0x3f1   : > { %v6293_v25 = vadd.f32 %v6057_v3, %v1680_v37  ;;  %v2568_v43 = vpack.c.bf16 %v2513_v23, %v2512_v29  ;;  %v2672_v60 = vadd.f32 %v6303_v44, %v2671_v17 }
 0x3f2   : > { %5186 = vpow2.f32 %v1977_v50 }
 0x3f3   : > { %v5003_v24 = vpack.c.bf16 %v6293_v25, %v6285_v22  ;;  %1815 = vrot.lane.b32.xlu0 %v6293_v25, %s5390_s30  ;;  %2710 = vmatmul.bf16.gmra.mxu1 %v2568_v43  ;;  %v2831_v11 = vmax.f32 %v2672_v60, 0.0 }
 0x3f4   : > { %v2381_v51 = vpop.f32.mrf.mxu0 }
 0x3f5   : > { %5090 = vst [vmem:[%s5756_s10 + $0xc8] sm:$0xff] %v5003_v24   ;;  %v1788_v45 = vpop.permute.xlu1 %1787  ;;  %v2382_v54 = vadd.f32 %v6118_v28, %v2381_v51  ;;  %v6335_v24 = vld [vmem:[%s6759_s2 + $0x3] ss:$0 sm:$0xff]  ;;  %v2071_v51 = vunpack.c.l.bf16 %v253_v59 }
 0x3f6   : > { %v1878_v52 = vmul.f32 0.5, %v1788_v45 }
 0x3f7   : > { %2420 = vmatmul.bf16.gmra.mxu0 %v2242_v58  ;;  %v2514_v1 = vmax.f32 %v2382_v54, 0.0 }
 0x3f8   : > { %v1979_v62 = vmul.f32 1.442695, %v1878_v52  ;;  %v1683_v21 = vpop.f32.mrf.mxu3  ;;  %v2673_v47 = vpop.f32.mrf.mxu1 }
 0x3f9   : > { %v6313_v63 = vadd.f32 %v6057_v3, %v1683_v21  ;;  %v2674_v31 = vadd.f32 %v6303_v44, %v2673_v47  ;;  %v5187_v4 = vpop.eup %5186 }
 0x3fa   : > { %5188 = vpow2.f32 %v1979_v62  ;;  %v2133_v19 = vmul.f32 %v5187_v4, %v2069_v2 }
 0x3fb   : > { %1817 = vrot.lane.b32.xlu1 %v6313_v63, %s5390_s30  ;;  %v2832_v12 = vmax.f32 %v2674_v31, 0.0  ;;  %5190 = vpow2.f32 %v1981_v32 }
 0x3fc   : > { %v2383_v5 = vpop.f32.mrf.mxu0  ;;  %v2197_v8 = vadd.f32 %v2133_v19, %v6145_v30 }
 0x3fd   : > { %v2895_v16 = vpack.c.bf16 %v2832_v12, %v2831_v11  ;;  %v2384_v18 = vadd.f32 %v6118_v28, %v2383_v5  ;;  %v1796_v42 = vpop.permute.xlu2 %1795 }
 0x3fe   : > { %v1882_v2 = vmul.f32 0.5, %v1796_v42 }
 0x3ff   : > { %v2515_v27 = vmax.f32 %v2384_v18, 0.0  ;;  %3005 = vmatmul.bf16.vlgmr.msrb.gmra.mxu2 %v2895_v16 }
 0x400   : > { %v5189_v0 = vpop.eup %5188  ;;  %v1685_v38 = vpop.f32.mrf.mxu3 }
 0x401   : > { %v6321_v26 = vadd.f32 %v6057_v3, %v1685_v38  ;;  %v2676_v33 = vpop.f32.mrf.mxu1  ;;  %v2134_v13 = vmul.f32 %v5189_v0, %v2070_v14  ;;  %v2569_v9 = vpack.c.bf16 %v2515_v27, %v2514_v1  ;;  %v5191_v45 = vpop.eup %5190  ;;  %v1987_v0 = vmul.f32 1.442695, %v1882_v2 }
 0x402   : > { %v2677_v17 = vadd.f32 %v6303_v44, %v2676_v33  ;;  %v2135_v4 = vmul.f32 %v5191_v45, %v2071_v51 }
 0x403   : > { %v5008_v41 = vpack.c.bf16 %v6321_v26, %v6313_v63  ;;  %1819 = vrot.lane.b32.xlu2 %v6321_v26, %s5390_s30  ;;  %v2198_v29 = vadd.f32 %v2134_v13, %v6154_v55  ;;  %2715 = vmatmul.bf16.gmra.mxu1 %v2569_v9 }
 0x404   : > { %v2386_v23 = vpop.f32.mrf.mxu0  ;;  %v2833_v52 = vmax.f32 %v2677_v17, 0.0  ;;  %v2199_v27 = vadd.f32 %v2135_v4, %v6164_v40 }
 0x405   : > { %5091 = vst [vmem:[%s5756_s10 + $0xd0] sm:$0xff] %v5008_v41   ;;  %v1792_v3 = vpop.permute.xlu0 %1791  ;;  %v2243_v37 = vpack.c.bf16 %v2198_v29, %v2197_v8  ;;  %v2387_v58 = vadd.f32 %v6118_v28, %v2386_v23  ;;  %v255_v29 = vld [vmem:[%s5454_s11 + $0xa0] sm:$0xff]  }
 0x406   : > { %v1880_v39 = vmul.f32 0.5, %v1792_v3  ;;  %v2073_v40 = vunpack.c.l.bf16 %v255_v29  ;;  %v2074_v17 = vunpack.c.h.bf16 %v255_v29 }
 0x407   : > { %2425 = vmatmul.bf16.gmra.mxu0 %v2243_v37  ;;  %v2516_v54 = vmax.f32 %v2387_v58, 0.0 }
 0x408   : > { %v1983_v50 = vmul.f32 1.442695, %v1880_v39  ;;  %v1688_v43 = vpop.f32.mrf.mxu3 }
 0x409   : > { %v6338_v30 = vadd.f32 %v6335_v24, %v1688_v43  ;;  %v2678_v55 = vpop.f32.mrf.mxu1 }
 0x40a   : > { %5192 = vpow2.f32 %v1983_v50  ;;  %v2679_v10 = vadd.f32 %v6303_v44, %v2678_v55 }
 0x40b   : > { %1821 = vrot.lane.b32.xlu0 %v6338_v30, %s5390_s30 }
 0x40c   : > { %v2834_v60 = vmax.f32 %v2679_v10, 0.0  ;;  %v2388_v62 = vpop.f32.mrf.mxu0 }
 0x40d   : > { %v1794_v21 = vpop.permute.xlu1 %1793  ;;  %v2389_v47 = vadd.f32 %v6118_v28, %v2388_v62 }
 0x40e   : > { %v1881_v31 = vmul.f32 0.5, %v1794_v21  ;;  %v2896_v57 = vpack.c.bf16 %v2834_v60, %v2833_v52 }
 0x40f   : > { %v2517_v12 = vmax.f32 %v2389_v47, 0.0 }
 0x410   : > { %v5193_v11 = vpop.eup %5192  ;;  %3010 = vmatmul.bf16.gmra.mxu2 %v2896_v57  ;;  %v1690_v5 = vpop.f32.mrf.mxu3  ;;  %v1985_v14 = vmul.f32 1.442695, %v1881_v31 }
 0x411   : > { %v6346_v15 = vadd.f32 %v6335_v24, %v1690_v5  ;;  %v2681_v16 = vpop.f32.mrf.mxu1  ;;  %v2136_v18 = vmul.f32 %v5193_v11, %v2072_v46  ;;  %v2570_v19 = vpack.c.bf16 %v2517_v12, %v2516_v54 }
 0x412   : > { %5194 = vpow2.f32 %v1985_v14  ;;  %v2682_v32 = vadd.f32 %v6303_v44, %v2681_v16  ;;  %v257_v14 = vld [vmem:[%s5454_s11 + $0xa8] sm:$0xff]  }
 0x413   : > { %v5013_v1 = vpack.c.bf16 %v6346_v15, %v6338_v30  ;;  %1823 = vrot.lane.b32.xlu1 %v6346_v15, %s5390_s30  ;;  %v2200_v38 = vadd.f32 %v2136_v18, %v6174_v36  ;;  %2720 = vmatmul.bf16.gmra.mxu1 %v2570_v19  ;;  %5196 = vpow2.f32 %v1987_v0  ;;  %v2075_v0 = vunpack.c.l.bf16 %v257_v14 }
 0x414   : > { %v2391_v33 = vpop.f32.mrf.mxu0  ;;  %v2835_v36 = vmax.f32 %v2682_v32, 0.0 }
 0x415   : > { %5092 = vst [vmem:[%s5756_s10 + $0xd8] sm:$0xff] %v5013_v1   ;;  %v2244_v13 = vpack.c.bf16 %v2200_v38, %v2199_v27  ;;  %v2392_v37 = vadd.f32 %v6118_v28, %v2391_v33  ;;  %v6386_v38 = vld [vmem:[%s6759_s2 + $0x4] ss:$0 sm:$0xff] }
 0x417   : > { %2430 = vmatmul.bf16.gmra.mxu0 %v2244_v13  ;;  %v2518_v42 = vmax.f32 %v2392_v37, 0.0 }
 0x418   : > { %v1693_v9 = vpop.f32.mrf.mxu3  ;;  %v5195_v3 = vpop.eup %5194 }
 0x419   : > { %v6357_v41 = vadd.f32 %v6335_v24, %v1693_v9  ;;  %v2683_v8 = vpop.f32.mrf.mxu1  ;;  %v5197_v50 = vpop.eup %5196  ;;  %v2137_v45 = vmul.f32 %v5195_v3, %v2073_v40  ;;  %v2076_v9 = vunpack.c.h.bf16 %v257_v14 }
 0x41a   : > { %v2684_v23 = vadd.f32 %v6303_v44, %v2683_v8  ;;  %v2138_v60 = vmul.f32 %v5197_v50, %v2074_v17 }
 0x41b   : > { %1825 = vrot.lane.b32.xlu2 %v6357_v41, %s5390_s30  ;;  %v2201_v31 = vadd.f32 %v2137_v45, %v6185_v61 }
 0x41c   : > { %v2836_v39 = vmax.f32 %v2684_v23, 0.0  ;;  %v2393_v43 = vpop.f32.mrf.mxu0  ;;  %v2202_v57 = vadd.f32 %v2138_v60, %v6194_v20  ;;  %v1802_v20 = vpop.permute.xlu2 %1801  ;;  %v4707_v60 = vld [vmem:[%s6758_s1 + $0x1c0] sm:$0xff] }
 0x41d   : > { %v1798_v59 = vpop.permute.xlu0 %1797  ;;  %v2394_v55 = vadd.f32 %v6118_v28, %v2393_v43  ;;  %v1885_v8 = vmul.f32 0.5, %v1802_v20  ;;  %3339 = vmatpush.bf16.msrb.mxu3 %v4707_v60 }
 0x41e   : > { %v1883_v10 = vmul.f32 0.5, %v1798_v59  ;;  %v2897_v51 = vpack.c.bf16 %v2836_v39, %v2835_v36  ;;  %v2245_v54 = vpack.c.bf16 %v2202_v57, %v2201_v31 }
 0x41f   : > { %v2519_v52 = vmax.f32 %v2394_v55, 0.0  ;;  %v1993_v59 = vmul.f32 1.442695, %v1885_v8 }
 0x420   : > { %3015 = vmatmul.bf16.gmra.mxu2 %v2897_v51  ;;  %v1695_v58 = vpop.f32.mrf.mxu3  ;;  %v1989_v46 = vmul.f32 1.442695, %v1883_v10 }
 0x421   : > { %v6366_v62 = vadd.f32 %v6335_v24, %v1695_v58  ;;  %v2686_v21 = vpop.f32.mrf.mxu1  ;;  %v2571_v47 = vpack.c.bf16 %v2519_v52, %v2518_v42 }
 0x422   : > { %5198 = vpow2.f32 %v1989_v46  ;;  %v2687_v12 = vadd.f32 %v6303_v44, %v2686_v21 }
 0x423   : > { %v5018_v28 = vpack.c.bf16 %v6366_v62, %v6357_v41  ;;  %1827 = vrot.lane.b32.xlu0 %v6366_v62, %s5390_s30  ;;  %2725 = vmatmul.bf16.gmra.mxu1 %v2571_v47 }
 0x424   : > { %v2396_v2 = vpop.f32.mrf.mxu0  ;;  %v2837_v27 = vmax.f32 %v2687_v12, 0.0 }
 0x425   : > { %5093 = vst [vmem:[%s5756_s10 + $0xe0] sm:$0xff] %v5018_v28   ;;  %v1800_v4 = vpop.permute.xlu1 %1799  ;;  %v2397_v33 = vadd.f32 %v6386_v38, %v2396_v2 }
 0x426   : > { %v1884_v11 = vmul.f32 0.5, %v1800_v4 }
 0x427   : > { %2435 = vmatmul.bf16.gmra.mxu0 %v2245_v54  ;;  %v2520_v36 = vmax.f32 %v2397_v33, 0.0 }
 0x428   : > { %v1991_v5 = vmul.f32 1.442695, %v1884_v11  ;;  %v1698_v61 = vpop.f32.mrf.mxu3  ;;  %v5199_v1 = vpop.eup %5198 }
 0x429   : > { %v6378_v16 = vadd.f32 %v6335_v24, %v1698_v61  ;;  %v2688_v18 = vpop.f32.mrf.mxu1  ;;  %v2139_v40 = vmul.f32 %v5199_v1, %v2075_v0 }
 0x42a   : > { %5200 = vpow2.f32 %v1991_v5  ;;  %v2689_v19 = vadd.f32 %v6303_v44, %v2688_v18 }
 0x42b   : > { %1829 = vrot.lane.b32.xlu1 %v6378_v16, %s5390_s30  ;;  %v2203_v51 = vadd.f32 %v2139_v40, %v6208_v53  ;;  %5202 = vpow2.f32 %v1993_v59  ;;  %v259_v53 = vld [vmem:[%s5454_s11 + $0xb0] sm:$0xff]  }
 0x42c   : > { %v2838_v13 = vmax.f32 %v2689_v19, 0.0  ;;  %v2398_v32 = vpop.f32.mrf.mxu0  ;;  %v2077_v2 = vunpack.c.l.bf16 %v259_v53  ;;  %v2078_v18 = vunpack.c.h.bf16 %v259_v53 }
 0x42d   : > { %v2399_v29 = vadd.f32 %v6386_v38, %v2398_v32  ;;  %v1808_v11 = vpop.permute.xlu2 %1807 }
 0x42e   : > { %v2898_v23 = vpack.c.bf16 %v2838_v13, %v2837_v27  ;;  %v1888_v1 = vmul.f32 0.5, %v1808_v11 }
 0x42f   : > { %v2521_v37 = vmax.f32 %v2399_v29, 0.0 }
 0x430   : > { %v5201_v3 = vpop.eup %5200  ;;  %3020 = vmatmul.bf16.gmra.mxu2 %v2898_v23  ;;  %v1700_v39 = vpop.f32.mrf.mxu3 }
 0x431   : > { %v6391_v17 = vadd.f32 %v6335_v24, %v1700_v39  ;;  %v2691_v50 = vpop.f32.mrf.mxu1  ;;  %v2140_v43 = vmul.f32 %v5201_v3, %v2076_v9  ;;  %v2572_v55 = vpack.c.bf16 %v2521_v37, %v2520_v36  ;;  %v5203_v4 = vpop.eup %5202  ;;  %v1999_v36 = vmul.f32 1.442695, %v1888_v1 }
 0x432   : > { %v2692_v46 = vadd.f32 %v6303_v44, %v2691_v50  ;;  %v2141_v27 = vmul.f32 %v5203_v4, %v2077_v2 }
 0x433   : > { %v5023_v10 = vpack.c.bf16 %v6391_v17, %v6378_v16  ;;  %1831 = vrot.lane.b32.xlu2 %v6391_v17, %s5390_s30  ;;  %v2204_v45 = vadd.f32 %v2140_v43, %v6218_v6  ;;  %2730 = vmatmul.bf16.gmra.mxu1 %v2572_v55 }
 0x434   : > { %v2401_v42 = vpop.f32.mrf.mxu0  ;;  %v2839_v54 = vmax.f32 %v2692_v46, 0.0  ;;  %v2205_v39 = vadd.f32 %v2141_v27, %v6231_v34 }
 0x435   : > { %5094 = vst [vmem:[%s5756_s10 + $0xe8] sm:$0xff] %v5023_v10   ;;  %v1804_v52 = vpop.permute.xlu0 %1803  ;;  %v2246_v58 = vpack.c.bf16 %v2204_v45, %v2203_v51  ;;  %v2402_v12 = vadd.f32 %v6386_v38, %v2401_v42  ;;  %v261_v42 = vld [vmem:[%s5454_s11 + $0xb8] sm:$0xff]  }
 0x436   : > { %v1886_v21 = vmul.f32 0.5, %v1804_v52  ;;  %v2079_v34 = vunpack.c.l.bf16 %v261_v42  ;;  %v2080_v46 = vunpack.c.h.bf16 %v261_v42 }
 0x437   : > { %2440 = vmatmul.bf16.gmra.mxu0 %v2246_v58  ;;  %v2522_v13 = vmax.f32 %v2402_v12, 0.0 }
 0x438   : > { %v1995_v47 = vmul.f32 1.442695, %v1886_v21  ;;  %v1703_v31 = vpop.f32.mrf.mxu3 }
 0x439   : > { %v6406_v6 = vadd.f32 %v6335_v24, %v1703_v31  ;;  %v2693_v28 = vpop.f32.mrf.mxu1 }
 0x43a   : > { %5204 = vpow2.f32 %v1995_v47  ;;  %v2694_v57 = vadd.f32 %v6303_v44, %v2693_v28 }
 0x43b   : > { %1833 = vrot.lane.b32.xlu0 %v6406_v6, %s5390_s30 }
 0x43c   : > { %v2840_v5 = vmax.f32 %v2694_v57, 0.0  ;;  %v2403_v61 = vpop.f32.mrf.mxu0 }
 0x43d   : > { %v1806_v14 = vpop.permute.xlu1 %1805  ;;  %v2404_v19 = vadd.f32 %v6386_v38, %v2403_v61 }
 0x43e   : > { %v1887_v20 = vmul.f32 0.5, %v1806_v14  ;;  %v2899_v0 = vpack.c.bf16 %v2840_v5, %v2839_v54 }
 0x43f   : > { %v2523_v32 = vmax.f32 %v2404_v19, 0.0 }
 0x440   : > { %v5205_v33 = vpop.eup %5204  ;;  %3025 = vmatmul.bf16.gmra.mxu2 %v2899_v0  ;;  %v1705_v9 = vpop.f32.mrf.mxu3  ;;  %v1997_v8 = vmul.f32 1.442695, %v1887_v20 }
 0x441   : > { %v6414_v29 = vadd.f32 %v6335_v24, %v1705_v9  ;;  %v2696_v23 = vpop.f32.mrf.mxu1  ;;  %v2142_v40 = vmul.f32 %v5205_v33, %v2078_v18  ;;  %v2573_v3 = vpack.c.bf16 %v2523_v32, %v2522_v13 }
 0x442   : > { %5206 = vpow2.f32 %v1997_v8  ;;  %v2697_v55 = vadd.f32 %v6303_v44, %v2696_v23 }
 0x443   : > { %v5028_v37 = vpack.c.bf16 %v6414_v29, %v6406_v6  ;;  %1835 = vrot.lane.b32.xlu1 %v6414_v29, %s5390_s30  ;;  %v2206_v50 = vadd.f32 %v2142_v40, %v6239_v56  ;;  %2735 = vmatmul.bf16.gmra.mxu1 %v2573_v3  ;;  %5208 = vpow2.f32 %v1999_v36 }
 0x444   : > { %v2406_v43 = vpop.f32.mrf.mxu0  ;;  %v2841_v56 = vmax.f32 %v2697_v55, 0.0 }
 0x445   : > { %5095 = vst [vmem:[%s5756_s10 + $0xf0] sm:$0xff] %v5028_v37   ;;  %v2247_v59 = vpack.c.bf16 %v2206_v50, %v2205_v39  ;;  %v2407_v60 = vadd.f32 %v6386_v38, %v2406_v43  ;;  %v1814_v40 = vpop.permute.xlu2 %1813 }
 0x447   : > { %2445 = vmatmul.bf16.gmra.mxu0 %v2247_v59  ;;  %v2524_v11 = vmax.f32 %v2407_v60, 0.0  ;;  %v1891_v59 = vmul.f32 0.5, %v1814_v40 }
 0x448   : > { %v1708_v10 = vpop.f32.mrf.mxu3  ;;  %v5207_v58 = vpop.eup %5206 }
 0x449   : > { %v6425_v51 = vadd.f32 %v6335_v24, %v1708_v10  ;;  %v2698_v45 = vpop.f32.mrf.mxu1  ;;  %v5209_v47 = vpop.eup %5208  ;;  %v2143_v4 = vmul.f32 %v5207_v58, %v2079_v34  ;;  %v2005_v60 = vmul.f32 1.442695, %v1891_v59 }
 0x44a   : > { %v2699_v52 = vadd.f32 %v6303_v44, %v2698_v45  ;;  %v2144_v5 = vmul.f32 %v5209_v47, %v2080_v46 }
 0x44b   : > { %1837 = vrot.lane.b32.xlu2 %v6425_v51, %s5390_s30  ;;  %v2207_v20 = vadd.f32 %v2143_v4, %v6250_v7  ;;  %v263_v7 = vld [vmem:[%s5454_s11 + $0xc0] sm:$0xff]  }
 0x44c   : > { %v2842_v21 = vmax.f32 %v2699_v52, 0.0  ;;  %v2408_v31 = vpop.f32.mrf.mxu0  ;;  %v2208_v1 = vadd.f32 %v2144_v5, %v6257_v35  ;;  %v2081_v3 = vunpack.c.l.bf16 %v263_v7  ;;  %v2082_v43 = vunpack.c.h.bf16 %v263_v7 }
 0x44d   : > { %v1810_v53 = vpop.permute.xlu0 %1809  ;;  %v2409_v28 = vadd.f32 %v6386_v38, %v2408_v31 }
 0x44e   : > { %v1889_v57 = vmul.f32 0.5, %v1810_v53  ;;  %v2900_v2 = vpack.c.bf16 %v2842_v21, %v2841_v56  ;;  %v2248_v13 = vpack.c.bf16 %v2208_v1, %v2207_v20 }
 0x44f   : > { %v2525_v54 = vmax.f32 %v2409_v28, 0.0 }
 0x450   : > { %3030 = vmatmul.bf16.gmra.mxu2 %v2900_v2  ;;  %v1710_v12 = vpop.f32.mrf.mxu3  ;;  %v2001_v18 = vmul.f32 1.442695, %v1889_v57 }
 0x451   : > { %v6434_v61 = vadd.f32 %v6335_v24, %v1710_v12  ;;  %v2701_v14 = vpop.f32.mrf.mxu1  ;;  %v2574_v19 = vpack.c.bf16 %v2525_v54, %v2524_v11  ;;  %v265_v11 = vld [vmem:[%s5454_s11 + $0xc8] sm:$0xff]  }
 0x452   : > { %5210 = vpow2.f32 %v2001_v18  ;;  %v2702_v32 = vadd.f32 %v6303_v44, %v2701_v14  ;;  %v2083_v5 = vunpack.c.l.bf16 %v265_v11  ;;  %v2084_v1 = vunpack.c.h.bf16 %v265_v11 }
 0x453   : > { %v5033_v0 = vpack.c.bf16 %v6434_v61, %v6425_v51  ;;  %1839 = vrot.lane.b32.xlu0 %v6434_v61, %s5390_s30  ;;  %2740 = vmatmul.bf16.gmra.mxu1 %v2574_v19 }
 0x454   : > { %v2411_v27 = vpop.f32.mrf.mxu0  ;;  %v2843_v37 = vmax.f32 %v2702_v32, 0.0 }
 0x455   : > { %5096 = vst [vmem:[%s5756_s10 + $0xf8] sm:$0xff] %v5033_v0   ;;  %v1812_v33 = vpop.permute.xlu1 %1811  ;;  %v2412_v35 = vadd.f32 %v6386_v38, %v2411_v27 }
 0x456   : > { %v1890_v24 = vmul.f32 0.5, %v1812_v33 }
 0x457   : > { %2450 = vmatmul.bf16.gmra.mxu0 %v2248_v13  ;;  %v2526_v52 = vmax.f32 %v2412_v35, 0.0 }
 0x458   : > { %v2003_v9 = vmul.f32 1.442695, %v1890_v24  ;;  %v5211_v36 = vpop.eup %5210 }
 0x459   : > { %v2703_v8 = vpop.f32.mrf.mxu1  ;;  %v2145_v45 = vmul.f32 %v5211_v36, %v2081_v3 }
 0x45a   : > { %5212 = vpow2.f32 %v2003_v9  ;;  %v2704_v23 = vadd.f32 %v6303_v44, %v2703_v8 }
 0x45b   : > { %v2209_v46 = vadd.f32 %v2145_v45, %v6268_v49  ;;  %5214 = vpow2.f32 %v2005_v60 }
 0x45c   : > { %v2844_v39 = vmax.f32 %v2704_v23, 0.0  ;;  %v2413_v50 = vpop.f32.mrf.mxu0 }
 0x45d   : > { %v2414_v55 = vadd.f32 %v6386_v38, %v2413_v50  ;;  %v1820_v49 = vpop.permute.xlu2 %1819 }
 0x45e   : > { %v2901_v10 = vpack.c.bf16 %v2844_v39, %v2843_v37  ;;  %v1894_v13 = vmul.f32 0.5, %v1820_v49 }
 0x45f   : > { %v2527_v34 = vmax.f32 %v2414_v55, 0.0 }
 0x460   : > { %v5213_v42 = vpop.eup %5212  ;;  %3035 = vmatmul.bf16.gmra.mxu2 %v2901_v10  ;;  %v2011_v37 = vmul.f32 1.442695, %v1894_v13  ;;  %v267_v10 = vld [vmem:[%s5454_s11 + $0xd0] sm:$0xff]  }
 0x461   : > { %v2706_v58 = vpop.f32.mrf.mxu1  ;;  %v2146_v56 = vmul.f32 %v5213_v42, %v2082_v43  ;;  %v2575_v21 = vpack.c.bf16 %v2527_v34, %v2526_v52  ;;  %v5215_v14 = vpop.eup %5214  ;;  %v2085_v42 = vunpack.c.l.bf16 %v267_v10 }
 0x462   : > { %v2707_v2 = vadd.f32 %v6303_v44, %v2706_v58  ;;  %v2147_v32 = vmul.f32 %v5215_v14, %v2083_v5 }
 0x463   : > { %v2210_v47 = vadd.f32 %v2146_v56, %v6275_v48  ;;  %2745 = vmatmul.bf16.gmra.mxu1 %v2575_v21  ;;  %v2086_v56 = vunpack.c.h.bf16 %v267_v10 }
 0x464   : > { %v2416_v31 = vpop.f32.mrf.mxu0  ;;  %v2845_v18 = vmax.f32 %v2707_v2, 0.0  ;;  %v2211_v35 = vadd.f32 %v2147_v32, %v6285_v22 }
 0x465   : > { %v1816_v53 = vpop.permute.xlu0 %1815  ;;  %v2249_v28 = vpack.c.bf16 %v2210_v47, %v2209_v46  ;;  %v2417_v48 = vadd.f32 %v6386_v38, %v2416_v31 }
 0x466   : > { %v1892_v57 = vmul.f32 0.5, %v1816_v53 }
 0x467   : > { %2455 = vmatmul.bf16.gmra.mxu0 %v2249_v28  ;;  %v2528_v7 = vmax.f32 %v2417_v48, 0.0  ;;  %v6467_v48 = vld [vmem:[%s6759_s2 + $0x6] ss:$0 sm:$0xff] }
 0x468   : > { %v2007_v4 = vmul.f32 1.442695, %v1892_v57 }
 0x469   : > { %v2708_v54 = vpop.f32.mrf.mxu1 }
 0x46a   : > { %5216 = vpow2.f32 %v2007_v4  ;;  %v2709_v12 = vadd.f32 %v6303_v44, %v2708_v54 }
 0x46c   : > { %v2846_v19 = vmax.f32 %v2709_v12, 0.0  ;;  %v2418_v20 = vpop.f32.mrf.mxu0 }
 0x46d   : > { %v1818_v0 = vpop.permute.xlu1 %1817  ;;  %v2419_v27 = vadd.f32 %v6386_v38, %v2418_v20 }
 0x46e   : > { %v1893_v33 = vmul.f32 0.5, %v1818_v0  ;;  %v2902_v24 = vpack.c.bf16 %v2846_v19, %v2845_v18 }
 0x46f   : > { %v2529_v8 = vmax.f32 %v2419_v27, 0.0  ;;  %v269_v27 = vld [vmem:[%s5454_s11 + $0xd8] sm:$0xff]  }
 0x470   : > { %v5217_v9 = vpop.eup %5216  ;;  %3040 = vmatmul.bf16.gmra.mxu2 %v2902_v24  ;;  %v2009_v23 = vmul.f32 1.442695, %v1893_v33  ;;  %v2087_v32 = vunpack.c.l.bf16 %v269_v27 }
 0x471   : > { %v2711_v40 = vpop.f32.mrf.mxu1  ;;  %v2148_v3 = vmul.f32 %v5217_v9, %v2084_v1  ;;  %v2576_v36 = vpack.c.bf16 %v2529_v8, %v2528_v7 }
 0x472   : > { %5218 = vpow2.f32 %v2009_v23  ;;  %v2712_v59 = vadd.f32 %v6303_v44, %v2711_v40 }
 0x473   : > { %v2212_v39 = vadd.f32 %v2148_v3, %v6293_v25  ;;  %2750 = vmatmul.bf16.gmra.mxu1 %v2576_v36  ;;  %5220 = vpow2.f32 %v2011_v37  ;;  %v2088_v37 = vunpack.c.h.bf16 %v269_v27 }
 0x474   : > { %v2421_v50 = vpop.f32.mrf.mxu0  ;;  %v2847_v34 = vmax.f32 %v2712_v59, 0.0 }
 0x475   : > { %v2250_v43 = vpack.c.bf16 %v2212_v39, %v2211_v35  ;;  %v2422_v58 = vadd.f32 %v6386_v38, %v2421_v50  ;;  %v1826_v33 = vpop.permute.xlu2 %1825 }
 0x476   : > { %v1897_v3 = vmul.f32 0.5, %v1826_v33 }
 0x477   : > { %2460 = vmatmul.bf16.gmra.mxu0 %v2250_v43  ;;  %v2530_v28 = vmax.f32 %v2422_v58, 0.0 }
 0x478   : > { %v5219_v52 = vpop.eup %5218  ;;  %v2017_v58 = vmul.f32 1.442695, %v1897_v3 }
 0x479   : > { %v2713_v55 = vpop.f32.mrf.mxu1  ;;  %v5221_v25 = vpop.eup %5220  ;;  %v2149_v53 = vmul.f32 %v5219_v52, %v2085_v42 }
 0x47a   : > { %v2714_v45 = vadd.f32 %v6303_v44, %v2713_v55  ;;  %v2150_v2 = vmul.f32 %v5221_v25, %v2086_v56 }
 0x47b   : > { %v2213_v12 = vadd.f32 %v2149_v53, %v6313_v63 }
 0x47c   : > { %v2848_v22 = vmax.f32 %v2714_v45, 0.0  ;;  %v2423_v60 = vpop.f32.mrf.mxu0  ;;  %v2214_v14 = vadd.f32 %v2150_v2, %v6321_v26 }
 0x47d   : > { %v1822_v21 = vpop.permute.xlu0 %1821  ;;  %v2424_v46 = vadd.f32 %v6386_v38, %v2423_v60 }
 0x47e   : > { %v1895_v47 = vmul.f32 0.5, %v1822_v21  ;;  %v2903_v31 = vpack.c.bf16 %v2848_v22, %v2847_v34  ;;  %v2251_v20 = vpack.c.bf16 %v2214_v14, %v2213_v12 }
 0x47f   : > { %v2531_v57 = vmax.f32 %v2424_v46, 0.0 }
 0x480   : > { %3045 = vmatmul.bf16.gmra.mxu2 %v2903_v31  ;;  %v2013_v11 = vmul.f32 1.442695, %v1895_v47 }
 0x481   : > { %v2716_v4 = vpop.f32.mrf.mxu1  ;;  %v2577_v54 = vpack.c.bf16 %v2531_v57, %v2530_v28  ;;  %v271_v57 = vld [vmem:[%s5454_s11 + $0xe0] sm:$0xff]  }
 0x482   : > { %v3006_v5 = vpop.f32.mrf.mxu2  ;;  %5222 = vpow2.f32 %v2013_v11  ;;  %v2717_v0 = vadd.f32 %v6303_v44, %v2716_v4 }
 0x483   : > { %2755 = vmatmul.bf16.gmra.mxu1 %v2577_v54  ;;  %v3007_v24 = vadd.f32 %v6467_v48, %v3006_v5  ;;  %v2089_v54 = vunpack.c.l.bf16 %v271_v57 }
 0x484   : > { %v2426_v49 = vpop.f32.mrf.mxu0  ;;  %v2849_v7 = vmax.f32 %v2717_v0, 0.0 }
 0x485   : > { %v1824_v18 = vpop.permute.xlu1 %1823  ;;  %v2427_v8 = vadd.f32 %v6386_v38, %v2426_v49  ;;  %v3166_v35 = vmax.f32 %v3007_v24, 0.0 }
 0x486   : > { %v1896_v19 = vmul.f32 0.5, %v1824_v18 }
 0x487   : > { %2465 = vmatmul.bf16.gmra.mxu0 %v2251_v20  ;;  %v2532_v10 = vmax.f32 %v2427_v8, 0.0 }
 0x488   : > { %v2015_v1 = vmul.f32 1.442695, %v1896_v19  ;;  %v5223_v9 = vpop.eup %5222 }
 0x489   : > { %v2718_v63 = vpop.f32.mrf.mxu1  ;;  %v2151_v59 = vmul.f32 %v5223_v9, %v2087_v32 }
 0x48a   : > { %5224 = vpow2.f32 %v2015_v1  ;;  %v2719_v26 = vadd.f32 %v6303_v44, %v2718_v63  ;;  %v3008_v13 = vpop.f32.mrf.mxu2  ;;  %v2090_v1 = vunpack.c.h.bf16 %v271_v57 }
 0x48b   : > { %v3009_v40 = vadd.f32 %v6467_v48, %v3008_v13  ;;  %v2215_v25 = vadd.f32 %v2151_v59, %v6338_v30  ;;  %5226 = vpow2.f32 %v2017_v58 }
 0x48c   : > { %v2850_v23 = vmax.f32 %v2719_v26, 0.0  ;;  %v2428_v36 = vpop.f32.mrf.mxu0 }
 0x48d   : > { %v3167_v39 = vmax.f32 %v3009_v40, 0.0  ;;  %v2429_v50 = vadd.f32 %v6386_v38, %v2428_v36  ;;  %v1832_v12 = vpop.permute.xlu2 %1831 }
 0x48e   : > { %v2904_v43 = vpack.c.bf16 %v2850_v23, %v2849_v7  ;;  %v1900_v26 = vmul.f32 0.5, %v1832_v12 }
 0x48f   : > { %v3230_v45 = vpack.c.bf16 %v3167_v39, %v3166_v35  ;;  %v2533_v42 = vmax.f32 %v2429_v50, 0.0 }
 0x490   : > { %v5225_v55 = vpop.eup %5224  ;;  %3050 = vmatmul.bf16.gmra.mxu2 %v2904_v43 }
 0x491   : > { %v2721_v52 = vpop.f32.mrf.mxu1  ;;  %v2152_v34 = vmul.f32 %v5225_v55, %v2088_v37  ;;  %3340 = vmatmul.bf16.vlgmr.msrb.gmra.mxu3 %v3230_v45  ;;  %v2578_v22 = vpack.c.bf16 %v2533_v42, %v2532_v10  ;;  %v2023_v37 = vmul.f32 1.442695, %v1900_v26  ;;  %v273_v10 = vld [vmem:[%s5454_s11 + $0xe8] sm:$0xff]  }
 0x492   : > { %v2722_v53 = vadd.f32 %v6303_v44, %v2721_v52  ;;  %v2091_v52 = vunpack.c.l.bf16 %v273_v10 }
 0x493   : > { %v3011_v56 = vpop.f32.mrf.mxu2  ;;  %v2216_v60 = vadd.f32 %v2152_v34, %v6346_v15  ;;  %2760 = vmatmul.bf16.gmra.mxu1 %v2578_v22  ;;  %v5227_v15 = vpop.eup %5226 }
 0x494   : > { %v2431_v21 = vpop.f32.mrf.mxu0  ;;  %v3012_v2 = vadd.f32 %v6467_v48, %v3011_v56  ;;  %v2851_v5 = vmax.f32 %v2722_v53, 0.0  ;;  %v2153_v13 = vmul.f32 %v5227_v15, %v2089_v54 }
 0x495   : > { %v1828_v46 = vpop.permute.xlu0 %1827  ;;  %v2252_v47 = vpack.c.bf16 %v2216_v60, %v2215_v25  ;;  %v2432_v14 = vadd.f32 %v6386_v38, %v2431_v21 }
 0x496   : > { %v1898_v31 = vmul.f32 0.5, %v1828_v46  ;;  %v3168_v19 = vmax.f32 %v3012_v2, 0.0  ;;  %v2217_v39 = vadd.f32 %v2153_v13, %v6357_v41  ;;  %v2092_v41 = vunpack.c.h.bf16 %v273_v10 }
 0x497   : > { %2470 = vmatmul.bf16.gmra.mxu0 %v2252_v47  ;;  %v2534_v9 = vmax.f32 %v2432_v14, 0.0 }
 0x498   : > { %v2019_v28 = vmul.f32 1.442695, %v1898_v31 }
 0x499   : > { %v2723_v4 = vpop.f32.mrf.mxu1 }
 0x49a   : > { %5228 = vpow2.f32 %v2019_v28  ;;  %v2724_v11 = vadd.f32 %v6303_v44, %v2723_v4 }
 0x49b   : > { %v3013_v30 = vpop.f32.mrf.mxu2 }
 0x49c   : > { %v2852_v49 = vmax.f32 %v2724_v11, 0.0  ;;  %v3014_v18 = vadd.f32 %v6467_v48, %v3013_v30  ;;  %v2433_v20 = vpop.f32.mrf.mxu0 }
 0x49d   : > { %v1830_v0 = vpop.permute.xlu1 %1829  ;;  %v2434_v63 = vadd.f32 %v6386_v38, %v2433_v20 }
 0x49e   : > { %v3169_v27 = vmax.f32 %v3014_v18, 0.0  ;;  %v1899_v33 = vmul.f32 0.5, %v1830_v0  ;;  %v2905_v24 = vpack.c.bf16 %v2852_v49, %v2851_v5 }
 0x49f   : > { %v2535_v7 = vmax.f32 %v2434_v63, 0.0 }
 0x4a0   : > { %v5229_v32 = vpop.eup %5228  ;;  %v2021_v8 = vmul.f32 1.442695, %v1899_v33  ;;  %3055 = vmatmul.bf16.gmra.mxu2 %v2905_v24  ;;  %v3231_v23 = vpack.c.bf16 %v3169_v27, %v3168_v19  ;;  %v276_v33 = vld [vmem:[%s5454_s11 + $0xf0] sm:$0xff]  }
 0x4a1   : > { %v2726_v40 = vpop.f32.mrf.mxu1  ;;  %v2154_v3 = vmul.f32 %v5229_v32, %v2090_v1  ;;  %v2579_v36 = vpack.c.bf16 %v2535_v7, %v2534_v9  ;;  %v2093_v7 = vunpack.c.l.bf16 %v276_v33 }
 0x4a2   : > { %3345 = vmatmul.bf16.gmra.mxu3 %v3231_v23  ;;  %5230 = vpow2.f32 %v2021_v8  ;;  %v2727_v55 = vadd.f32 %v6303_v44, %v2726_v40 }
 0x4a3   : > { %v3016_v35 = vpop.f32.mrf.mxu2  ;;  %v2218_v50 = vadd.f32 %v2154_v3, %v6366_v62  ;;  %2765 = vmatmul.bf16.gmra.mxu1 %v2579_v36  ;;  %5232 = vpow2.f32 %v2023_v37  ;;  %v2094_v37 = vunpack.c.h.bf16 %v276_v33 }
 0x4a4   : > { %v2436_v43 = vpop.f32.mrf.mxu0  ;;  %v3017_v45 = vadd.f32 %v6467_v48, %v3016_v35  ;;  %v2853_v56 = vmax.f32 %v2727_v55, 0.0 }
 0x4a5   : > { %v2253_v59 = vpack.c.bf16 %v2218_v50, %v2217_v39  ;;  %v2437_v62 = vadd.f32 %v6386_v38, %v2436_v43  ;;  %v1838_v13 = vpop.permute.xlu2 %1837 }
 0x4a6   : > { %v3170_v46 = vmax.f32 %v3017_v45, 0.0  ;;  %v1903_v36 = vmul.f32 0.5, %v1838_v13 }
 0x4a7   : > { %2475 = vmatmul.bf16.gmra.mxu0 %v2253_v59  ;;  %v2536_v11 = vmax.f32 %v2437_v62, 0.0 }
 0x4a8   : > { %v5231_v34 = vpop.eup %5230 }
 0x4a9   : > { %v2728_v42 = vpop.f32.mrf.mxu1  ;;  %v5233_v21 = vpop.eup %5232  ;;  %v2155_v53 = vmul.f32 %v5231_v34, %v2091_v52 }
 0x4aa   : > { %v2729_v58 = vadd.f32 %v6303_v44, %v2728_v42  ;;  %v2156_v15 = vmul.f32 %v5233_v21, %v2092_v41 }
 0x4ab   : > { %v3018_v22 = vpop.f32.mrf.mxu2  ;;  %v2219_v49 = vadd.f32 %v2155_v53, %v6378_v16  ;;  %v6502_v16 = vld [vmem:[%s6759_s2 + $0x5] ss:$0 sm:$0xff] }
 0x4ac   : > { %v2854_v25 = vmax.f32 %v2729_v58, 0.0  ;;  %v3019_v60 = vadd.f32 %v6467_v48, %v3018_v22  ;;  %v2438_v47 = vpop.f32.mrf.mxu0  ;;  %v2220_v19 = vadd.f32 %v2156_v15, %v6391_v17  ;;  %v2029_v22 = vmul.f32 1.442695, %v1903_v36 }
 0x4ad   : > { %v1834_v31 = vpop.permute.xlu0 %1833  ;;  %v2439_v57 = vadd.f32 %v6386_v38, %v2438_v47 }
 0x4ae   : > { %v3171_v28 = vmax.f32 %v3019_v60, 0.0  ;;  %v1901_v2 = vmul.f32 0.5, %v1834_v31  ;;  %v2906_v4 = vpack.c.bf16 %v2854_v25, %v2853_v56  ;;  %v2254_v27 = vpack.c.bf16 %v2220_v19, %v2219_v49  ;;  %v277_v31 = vld [vmem:[%s5454_s11 + $0xf8] sm:$0xff]  }
 0x4af   : > { %v2537_v30 = vmax.f32 %v2439_v57, 0.0 }
 0x4b0   : > { %3060 = vmatmul.bf16.gmra.mxu2 %v2906_v4  ;;  %v3232_v54 = vpack.c.bf16 %v3171_v28, %v3170_v46  ;;  %v2025_v14 = vmul.f32 1.442695, %v1901_v2 }
 0x4b1   : > { %v2731_v12 = vpop.f32.mrf.mxu1  ;;  %v2580_v5 = vpack.c.bf16 %v2537_v30, %v2536_v11 }
 0x4b2   : > { %3350 = vmatmul.bf16.gmra.mxu3 %v3232_v54  ;;  %5234 = vpow2.f32 %v2025_v14  ;;  %v2732_v63 = vadd.f32 %v6303_v44, %v2731_v12 }
 0x4b3   : > { %v3021_v18 = vpop.f32.mrf.mxu2  ;;  %2770 = vmatmul.bf16.gmra.mxu1 %v2580_v5  ;;  %v2096_v5 = vunpack.c.h.bf16 %v277_v31 }
 0x4b4   : > { %v2441_v20 = vpop.f32.mrf.mxu0  ;;  %v3022_v32 = vadd.f32 %v6467_v48, %v3021_v18  ;;  %v2855_v23 = vmax.f32 %v2732_v63, 0.0 }
 0x4b5   : > { %v1836_v0 = vpop.permute.xlu1 %1835  ;;  %v2442_v44 = vadd.f32 %v6386_v38, %v2441_v20 }
 0x4b6   : > { %v1902_v1 = vmul.f32 0.5, %v1836_v0  ;;  %v3172_v39 = vmax.f32 %v3022_v32, 0.0 }
 0x4b7   : > { %2480 = vmatmul.bf16.gmra.mxu0 %v2254_v27  ;;  %v2538_v45 = vmax.f32 %v2442_v44, 0.0 }
 0x4b8   : > { %v2027_v24 = vmul.f32 1.442695, %v1902_v1  ;;  %v5235_v8 = vpop.eup %5234 }
 0x4b9   : > { %v2733_v26 = vpop.f32.mrf.mxu1  ;;  %v2157_v55 = vmul.f32 %v5235_v8, %v2093_v7 }
 0x4ba   : > { %5236 = vpow2.f32 %v2027_v24  ;;  %v2734_v17 = vadd.f32 %v6502_v16, %v2733_v26 }
 0x4bb   : > { %v3023_v9 = vpop.f32.mrf.mxu2  ;;  %v2221_v62 = vadd.f32 %v2157_v55, %v6406_v6  ;;  %5238 = vpow2.f32 %v2029_v22  ;;  %v2095_v6 = vunpack.c.l.bf16 %v277_v31 }
 0x4bc   : > { %v2856_v40 = vmax.f32 %v2734_v17, 0.0  ;;  %v3024_v3 = vadd.f32 %v6467_v48, %v3023_v9  ;;  %v2443_v35 = vpop.f32.mrf.mxu0 }
 0x4bd   : > { %v2444_v43 = vadd.f32 %v6386_v38, %v2443_v35 }
 0x4be   : > { %v3173_v50 = vmax.f32 %v3024_v3, 0.0  ;;  %v2907_v59 = vpack.c.bf16 %v2856_v40, %v2855_v23 }
 0x4bf   : > { %v2539_v42 = vmax.f32 %v2444_v43, 0.0 }
 0x4c0   : > { %v5237_v10 = vpop.eup %5236  ;;  %3065 = vmatmul.bf16.gmra.mxu2 %v2907_v59  ;;  %v3233_v52 = vpack.c.bf16 %v3173_v50, %v3172_v39 }
 0x4c1   : > { %v2158_v34 = vmul.f32 %v5237_v10, %v2094_v37  ;;  %v2736_v58 = vpop.f32.mrf.mxu1  ;;  %v2581_v41 = vpack.c.bf16 %v2539_v42, %v2538_v45 }
 0x4c2   : > { %3355 = vmatmul.bf16.gmra.mxu3 %v3233_v52  ;;  %v2737_v53 = vadd.f32 %v6502_v16, %v2736_v58 }
 0x4c3   : > { %v3026_v56 = vpop.f32.mrf.mxu2  ;;  %v2222_v25 = vadd.f32 %v2158_v34, %v6414_v29  ;;  %2775 = vmatmul.bf16.gmra.mxu1 %v2581_v41  ;;  %v5239_v29 = vpop.eup %5238 }
 0x4c4   : > { %v2446_v60 = vpop.f32.mrf.mxu0  ;;  %v3027_v2 = vadd.f32 %v6467_v48, %v3026_v56  ;;  %v2857_v30 = vmax.f32 %v2737_v53, 0.0  ;;  %v2159_v0 = vmul.f32 %v5239_v29, %v2095_v6 }
 0x4c5   : > { %v1840_v21 = vpop.permute.xlu0 %1839  ;;  %v2255_v46 = vpack.c.bf16 %v2222_v25, %v2221_v62  ;;  %v2447_v54 = vadd.f32 %v6386_v38, %v2446_v60 }
 0x4c6   : > { %v1904_v47 = vmul.f32 0.5, %v1840_v21  ;;  %v3174_v49 = vmax.f32 %v3027_v2, 0.0  ;;  %v2223_v17 = vadd.f32 %v2159_v0, %v6425_v51 }
 0x4c7   : > { %2485 = vmatmul.bf16.gmra.mxu0 %v2255_v46  ;;  %v2540_v27 = vmax.f32 %v2447_v54, 0.0 }
 0x4c8   : > { %v2031_v28 = vmul.f32 1.442695, %v1904_v47 }
 0x4c9   : > { %v2738_v57 = vpop.f32.mrf.mxu1 }
 0x4ca   : > { %5240 = vpow2.f32 %v2031_v28  ;;  %v2739_v4 = vadd.f32 %v6502_v16, %v2738_v57 }
 0x4cb   : > { %v3028_v11 = vpop.f32.mrf.mxu2 }
 0x4cc   : > { %v2858_v15 = vmax.f32 %v2739_v4, 0.0  ;;  %v3029_v12 = vadd.f32 %v6467_v48, %v3028_v11  ;;  %v2448_v14 = vpop.f32.mrf.mxu0 }
 0x4cd   : > { %v2449_v19 = vadd.f32 %v6386_v38, %v2448_v14 }
 0x4ce   : > { %v3175_v18 = vmax.f32 %v3029_v12, 0.0  ;;  %v2908_v20 = vpack.c.bf16 %v2858_v15, %v2857_v30 }
 0x4cf   : > { %v2541_v63 = vmax.f32 %v2449_v19, 0.0 }
 0x4d0   : > { %v5241_v1 = vpop.eup %5240  ;;  %3070 = vmatmul.bf16.gmra.mxu2 %v2908_v20  ;;  %v3234_v33 = vpack.c.bf16 %v3175_v18, %v3174_v49 }
 0x4d1   : > { %v2160_v24 = vmul.f32 %v5241_v1, %v2096_v5  ;;  %v2741_v26 = vpop.f32.mrf.mxu1  ;;  %v2582_v13 = vpack.c.bf16 %v2541_v63, %v2540_v27 }
 0x4d2   : > { %3360 = vmatmul.bf16.gmra.mxu3 %v3234_v33  ;;  %v2742_v23 = vadd.f32 %v6502_v16, %v2741_v26 }
 0x4d3   : > { %v3031_v32 = vpop.f32.mrf.mxu2  ;;  %v2224_v9 = vadd.f32 %v2160_v24, %v6434_v61  ;;  %2780 = vmatmul.bf16.gmra.mxu1 %v2582_v13 }
 0x4d4   : > { %v2451_v7 = vpop.f32.mrf.mxu0  ;;  %v3032_v40 = vadd.f32 %v6467_v48, %v3031_v32  ;;  %v2859_v37 = vmax.f32 %v2742_v23, 0.0 }
 0x4d5   : > { %v2256_v8 = vpack.c.bf16 %v2224_v9, %v2223_v17  ;;  %v2452_v35 = vadd.f32 %v6386_v38, %v2451_v7 }
 0x4d6   : > { %v3176_v61 = vmax.f32 %v3032_v40, 0.0 }
 0x4d7   : > { %2490 = vmatmul.bf16.gmra.mxu0 %v2256_v8  ;;  %v2542_v10 = vmax.f32 %v2452_v35, 0.0 }
 0x4d9   : > { %v2743_v44 = vpop.f32.mrf.mxu1 }
 0x4da   : > { %v2744_v3 = vadd.f32 %v6502_v16, %v2743_v44 }
 0x4db   : > { %v3033_v36 = vpop.f32.mrf.mxu2 }
 0x4dc   : > { %v2860_v39 = vmax.f32 %v2744_v3, 0.0  ;;  %v3034_v51 = vadd.f32 %v6467_v48, %v3033_v36  ;;  %v2453_v50 = vpop.f32.mrf.mxu0 }
 0x4dd   : > { %v2454_v59 = vadd.f32 %v6386_v38, %v2453_v50 }
 0x4de   : > { %v3177_v43 = vmax.f32 %v3034_v51, 0.0  ;;  %v2909_v55 = vpack.c.bf16 %v2860_v39, %v2859_v37  ;;  %v6543_v39 = vld [vmem:[%s6759_s2 + $0x4] ss:$0 sm:$0xff] }
 0x4df   : > { %v2543_v45 = vmax.f32 %v2454_v59, 0.0 }
 0x4e0   : > { %3075 = vmatmul.bf16.gmra.mxu2 %v2909_v55  ;;  %v3235_v42 = vpack.c.bf16 %v3177_v43, %v3176_v61 }
 0x4e1   : > { %v2746_v52 = vpop.f32.mrf.mxu1  ;;  %v2583_v34 = vpack.c.bf16 %v2543_v45, %v2542_v10 }
 0x4e2   : > { %3365 = vmatmul.bf16.gmra.mxu3 %v3235_v42  ;;  %v2747_v41 = vadd.f32 %v6502_v16, %v2746_v52 }
 0x4e3   : > { %v3036_v58 = vpop.f32.mrf.mxu2  ;;  %2785 = vmatmul.bf16.gmra.mxu1 %v2583_v34 }
 0x4e4   : > { %v2456_v22 = vpop.f32.mrf.mxu0  ;;  %v3037_v62 = vadd.f32 %v6467_v48, %v3036_v58  ;;  %v2861_v21 = vmax.f32 %v2747_v41, 0.0  ;;  %v6551_v41 = vld [vmem:[%s6759_s2 + $0x7] ss:$0 sm:$0xff] }
 0x4e5   : > { %v2457_v46 = vadd.f32 %v6386_v38, %v2456_v22 }
 0x4e6   : > { %v3178_v28 = vmax.f32 %v3037_v62, 0.0 }
 0x4e7   : > { %v2544_v6 = vmax.f32 %v2457_v46, 0.0 }
 0x4e9   : > { %v2748_v56 = vpop.f32.mrf.mxu1 }
 0x4ea   : > { %v2749_v25 = vadd.f32 %v6502_v16, %v2748_v56 }
 0x4eb   : > { %v3038_v60 = vpop.f32.mrf.mxu2 }
 0x4ec   : > { %v2862_v47 = vmax.f32 %v2749_v25, 0.0  ;;  %v3039_v31 = vadd.f32 %v6467_v48, %v3038_v60  ;;  %v2458_v53 = vpop.f32.mrf.mxu0 }
 0x4ed   : > { %v2459_v2 = vadd.f32 %v6386_v38, %v2458_v53 }
 0x4ee   : > { %v3179_v57 = vmax.f32 %v3039_v31, 0.0  ;;  %v2910_v4 = vpack.c.bf16 %v2862_v47, %v2861_v21 }
 0x4ef   : > { %v2545_v11 = vmax.f32 %v2459_v2, 0.0 }
 0x4f0   : > { %3080 = vmatmul.bf16.gmra.mxu2 %v2910_v4  ;;  %v3236_v29 = vpack.c.bf16 %v3179_v57, %v3178_v28 }
 0x4f1   : > { %v2751_v30 = vpop.f32.mrf.mxu1  ;;  %v2584_v54 = vpack.c.bf16 %v2545_v11, %v2544_v6 }
 0x4f2   : > { %3370 = vmatmul.bf16.gmra.mxu3 %v3236_v29  ;;  %v2752_v5 = vadd.f32 %v6502_v16, %v2751_v30 }
 0x4f3   : > { %v3041_v15 = vpop.f32.mrf.mxu2  ;;  %2790 = vmatmul.bf16.gmra.mxu1 %v2584_v54 }
 0x4f4   : > { %v2461_v12 = vpop.f32.mrf.mxu0  ;;  %v3042_v49 = vadd.f32 %v6467_v48, %v3041_v15  ;;  %v2863_v20 = vmax.f32 %v2752_v5, 0.0 }
 0x4f5   : > { %v2462_v0 = vadd.f32 %v6386_v38, %v2461_v12 }
 0x4f6   : > { %v3180_v33 = vmax.f32 %v3042_v49, 0.0 }
 0x4f7   : > { %v2546_v32 = vmax.f32 %v2462_v0, 0.0 }
 0x4f9   : > { %v2753_v14 = vpop.f32.mrf.mxu1 }
 0x4fa   : > { %v2754_v18 = vadd.f32 %v6502_v16, %v2753_v14 }
 0x4fb   : > { %v3043_v19 = vpop.f32.mrf.mxu2 }
 0x4fc   : > { %v2864_v1 = vmax.f32 %v2754_v18, 0.0  ;;  %v3044_v27 = vadd.f32 %v6467_v48, %v3043_v19  ;;  %v2463_v63 = vpop.f32.mrf.mxu0 }
 0x4fd   : > { %v2464_v26 = vadd.f32 %v6386_v38, %v2463_v63 }
 0x4fe   : > { %v3181_v24 = vmax.f32 %v3044_v27, 0.0  ;;  %v2911_v13 = vpack.c.bf16 %v2864_v1, %v2863_v20 }
 0x4ff   : > { %v2547_v17 = vmax.f32 %v2464_v26, 0.0 }
 0x500   : > { %3085 = vmatmul.bf16.gmra.mxu2 %v2911_v13  ;;  %v3237_v9 = vpack.c.bf16 %v3181_v24, %v3180_v33 }
 0x501   : > { %v2756_v7 = vpop.f32.mrf.mxu1  ;;  %v2585_v8 = vpack.c.bf16 %v2547_v17, %v2546_v32 }
 0x502   : > { %3375 = vmatmul.bf16.gmra.mxu3 %v3237_v9  ;;  %v2757_v40 = vadd.f32 %v6502_v16, %v2756_v7 }
 0x503   : > { %v3046_v23 = vpop.f32.mrf.mxu2  ;;  %2795 = vmatmul.bf16.gmra.mxu1 %v2585_v8 }
 0x504   : > { %v2466_v44 = vpop.f32.mrf.mxu0  ;;  %v3047_v36 = vadd.f32 %v6467_v48, %v3046_v23  ;;  %v2865_v38 = vmax.f32 %v2757_v40, 0.0 }
 0x505   : > { %v2467_v51 = vadd.f32 %v6543_v39, %v2466_v44 }
 0x506   : > { %v3182_v59 = vmax.f32 %v3047_v36, 0.0 }
 0x507   : > { %v2548_v42 = vmax.f32 %v2467_v51, 0.0 }
 0x509   : > { %v2758_v3 = vpop.f32.mrf.mxu1 }
 0x50a   : > { %v2759_v37 = vadd.f32 %v6502_v16, %v2758_v3 }
 0x50b   : > { %v3048_v35 = vpop.f32.mrf.mxu2 }
 0x50c   : > { %v2866_v50 = vmax.f32 %v2759_v37, 0.0  ;;  %v3049_v61 = vadd.f32 %v6467_v48, %v3048_v35  ;;  %v2468_v43 = vpop.f32.mrf.mxu0 }
 0x50d   : > { %v2469_v10 = vadd.f32 %v6543_v39, %v2468_v43 }
 0x50e   : > { %v3183_v55 = vmax.f32 %v3049_v61, 0.0  ;;  %v2912_v45 = vpack.c.bf16 %v2866_v50, %v2865_v38 }
 0x50f   : > { %v2549_v52 = vmax.f32 %v2469_v10, 0.0 }
 0x510   : > { %3090 = vmatmul.bf16.gmra.mxu2 %v2912_v45  ;;  %v3238_v34 = vpack.c.bf16 %v3183_v55, %v3182_v59 }
 0x511   : > { %v2761_v58 = vpop.f32.mrf.mxu1  ;;  %v2586_v22 = vpack.c.bf16 %v2549_v52, %v2548_v42 }
 0x512   : > { %3380 = vmatmul.bf16.gmra.mxu3 %v3238_v34  ;;  %v2762_v21 = vadd.f32 %v6502_v16, %v2761_v58 }
 0x513   : > { %v3051_v56 = vpop.f32.mrf.mxu2  ;;  %2800 = vmatmul.bf16.gmra.mxu1 %v2586_v22 }
 0x514   : > { %v2471_v62 = vpop.f32.mrf.mxu0  ;;  %v3341_v25 = vpop.f32.mrf.mxu3  ;;  %v3052_v46 = vadd.f32 %v6467_v48, %v3051_v56  ;;  %v2867_v57 = vmax.f32 %v2762_v21, 0.0 }
 0x515   : > { %v3342_v60 = vadd.f32 %v6551_v41, %v3341_v25  ;;  %v2472_v2 = vadd.f32 %v6543_v39, %v2471_v62 }
 0x516   : > { %v3184_v11 = vmax.f32 %v3052_v46, 0.0 }
 0x517   : > { %v3501_v47 = vmul.f32 0.5, %v3342_v60  ;;  %v2550_v14 = vmax.f32 %v2472_v2, 0.0 }
 0x519   : > { %v2763_v31 = vpop.f32.mrf.mxu1  ;;  %5242 = vtanh.f32 %v3501_v47 }
 0x51a   : > { %v2764_v53 = vadd.f32 %v6502_v16, %v2763_v31 }
 0x51b   : > { %v3053_v28 = vpop.f32.mrf.mxu2 }
 0x51c   : > { %v2868_v4 = vmax.f32 %v2764_v53, 0.0  ;;  %v3054_v6 = vadd.f32 %v6467_v48, %v3053_v28  ;;  %v2473_v29 = vpop.f32.mrf.mxu0  ;;  %v3343_v30 = vpop.f32.mrf.mxu3 }
 0x51d   : > { %v2474_v15 = vadd.f32 %v6543_v39, %v2473_v29  ;;  %v3344_v12 = vadd.f32 %v6551_v41, %v3343_v30 }
 0x51e   : > { %v3185_v54 = vmax.f32 %v3054_v6, 0.0  ;;  %v2913_v5 = vpack.c.bf16 %v2868_v4, %v2867_v57 }
 0x51f   : > { %v2551_v49 = vmax.f32 %v2474_v15, 0.0  ;;  %v3502_v18 = vmul.f32 0.5, %v3344_v12  ;;  %v5243_v1 = vpop.eup %5242 }
 0x520   : > { %3095 = vmatmul.bf16.gmra.mxu2 %v2913_v5  ;;  %v3239_v19 = vpack.c.bf16 %v3185_v54, %v3184_v11  ;;  %v3629_v26 = vadd.f32 1.0, %v5243_v1 }
 0x521   : > { %v2766_v20 = vpop.f32.mrf.mxu1  ;;  %v2587_v0 = vpack.c.bf16 %v2551_v49, %v2550_v14  ;;  %5244 = vtanh.f32 %v3502_v18 }
 0x522   : > { %3385 = vmatmul.bf16.gmra.mxu3 %v3239_v19  ;;  %v2767_v32 = vadd.f32 %v6502_v16, %v2766_v20  ;;  %v3693_v44 = vmul.f32 0.5, %v3629_v26 }
 0x523   : > { %v3056_v27 = vpop.f32.mrf.mxu2  ;;  %2805 = vmatmul.bf16.gmra.mxu1 %v2587_v0 }
 0x524   : > { %v2476_v63 = vpop.f32.mrf.mxu0  ;;  %v3057_v9 = vadd.f32 %v6467_v48, %v3056_v27  ;;  %v2869_v36 = vmax.f32 %v2767_v32, 0.0 }
 0x525   : > { %v3346_v33 = vpop.f32.mrf.mxu3  ;;  %v2477_v37 = vadd.f32 %v6543_v39, %v2476_v63 }
 0x526   : > { %v3347_v24 = vadd.f32 %v6551_v41, %v3346_v33  ;;  %v3186_v50 = vmax.f32 %v3057_v9, 0.0 }
 0x527   : > { %v5245_v13 = vpop.eup %5244  ;;  %v2552_v42 = vmax.f32 %v2477_v37, 0.0 }
 0x528   : > { %v3630_v17 = vadd.f32 1.0, %v5245_v13  ;;  %v3503_v7 = vmul.f32 0.5, %v3347_v24 }
 0x529   : > { %v2768_v8 = vpop.f32.mrf.mxu1 }
 0x52a   : > { %v2769_v23 = vadd.f32 %v6502_v16, %v2768_v8  ;;  %v3694_v40 = vmul.f32 0.5, %v3630_v17  ;;  %5246 = vtanh.f32 %v3503_v7 }
 0x52b   : > { %v3058_v3 = vpop.f32.mrf.mxu2 }
 0x52c   : > { %v2870_v35 = vmax.f32 %v2769_v23, 0.0  ;;  %v3059_v38 = vadd.f32 %v6467_v48, %v3058_v3  ;;  %v4718_v51 = vpack.c.bf16 %v3694_v40, %v3693_v44  ;;  %v2478_v61 = vpop.f32.mrf.mxu0 }
 0x52d   : > { %v3348_v43 = vpop.f32.mrf.mxu3  ;;  %v2479_v55 = vadd.f32 %v6543_v39, %v2478_v61 }
 0x52e   : > { %v3187_v59 = vmax.f32 %v3059_v38, 0.0  ;;  %v3349_v10 = vadd.f32 %v6551_v41, %v3348_v43  ;;  %v2914_v45 = vpack.c.bf16 %v2870_v35, %v2869_v36  ;;  %4719 = vst [vmem:[%s6569_s28] sm:$0xff] %v4718_v51  }
 0x52f   : > { %v2553_v52 = vmax.f32 %v2479_v55, 0.0 }
 0x530   : > { %v3504_v34 = vmul.f32 0.5, %v3349_v10  ;;  %3100 = vmatmul.bf16.gmra.mxu2 %v2914_v45  ;;  %v3240_v58 = vpack.c.bf16 %v3187_v59, %v3186_v50  ;;  %v5247_v62 = vpop.eup %5246 }
 0x531   : > { %v2771_v22 = vpop.f32.mrf.mxu1  ;;  %v2588_v56 = vpack.c.bf16 %v2553_v52, %v2552_v42  ;;  %v3631_v47 = vadd.f32 1.0, %v5247_v62 }
 0x532   : > { %5248 = vtanh.f32 %v3504_v34  ;;  %3390 = vmatmul.bf16.gmra.mxu3 %v3240_v58  ;;  %v2772_v53 = vadd.f32 %v6502_v16, %v2771_v22 }
 0x533   : > { %v3061_v25 = vpop.f32.mrf.mxu2  ;;  %2810 = vmatmul.bf16.gmra.mxu1 %v2588_v56  ;;  %v3695_v11 = vmul.f32 0.5, %v3631_v47 }
 0x534   : > { %v2481_v60 = vpop.f32.mrf.mxu0  ;;  %v3062_v57 = vadd.f32 %v6467_v48, %v3061_v25  ;;  %v2871_v54 = vmax.f32 %v2772_v53, 0.0 }
 0x535   : > { %v3351_v21 = vpop.f32.mrf.mxu3  ;;  %v2482_v15 = vadd.f32 %v6543_v39, %v2481_v60 }
 0x536   : > { %v3352_v46 = vadd.f32 %v6551_v41, %v3351_v21  ;;  %v3188_v49 = vmax.f32 %v3062_v57, 0.0 }
 0x537   : > { %v2554_v63 = vmax.f32 %v2482_v15, 0.0 }
 0x538   : > { %v5249_v31 = vpop.eup %5248  ;;  %v3505_v2 = vmul.f32 0.5, %v3352_v46 }
 0x539   : > { %v3632_v28 = vadd.f32 1.0, %v5249_v31  ;;  %v2773_v4 = vpop.f32.mrf.mxu1 }
 0x53a   : > { %v2774_v6 = vadd.f32 %v6502_v16, %v2773_v4  ;;  %5250 = vtanh.f32 %v3505_v2 }
 0x53b   : > { %v3696_v29 = vmul.f32 0.5, %v3632_v28  ;;  %v3063_v30 = vpop.f32.mrf.mxu2 }
 0x53c   : > { %v2872_v12 = vmax.f32 %v2774_v6, 0.0  ;;  %v3064_v5 = vadd.f32 %v6467_v48, %v3063_v30  ;;  %v2483_v18 = vpop.f32.mrf.mxu0 }
 0x53d   : > { %v4723_v14 = vpack.c.bf16 %v3696_v29, %v3695_v11  ;;  %v3353_v19 = vpop.f32.mrf.mxu3  ;;  %v2484_v1 = vadd.f32 %v6543_v39, %v2483_v18 }
 0x53e   : > { %v2915_v20 = vpack.c.bf16 %v2872_v12, %v2871_v54  ;;  %v3189_v0 = vmax.f32 %v3064_v5, 0.0  ;;  %v3354_v27 = vadd.f32 %v6551_v41, %v3353_v19 }
 0x53f   : > { %5035 = vst [vmem:[%s6569_s28 + $0x8] sm:$0xff] %v4723_v14   ;;  %v2555_v33 = vmax.f32 %v2484_v1, 0.0 }
 0x540   : > { %v3506_v24 = vmul.f32 0.5, %v3354_v27  ;;  %3105 = vmatmul.bf16.gmra.mxu2 %v2915_v20  ;;  %v3241_v26 = vpack.c.bf16 %v3189_v0, %v3188_v49  ;;  %v5251_v17 = vpop.eup %5250 }
 0x541   : > { %v2776_v13 = vpop.f32.mrf.mxu1  ;;  %v2589_v32 = vpack.c.bf16 %v2555_v33, %v2554_v63  ;;  %v3633_v44 = vadd.f32 1.0, %v5251_v17 }
 0x542   : > { %5252 = vtanh.f32 %v3506_v24  ;;  %3395 = vmatmul.bf16.gmra.mxu3 %v3241_v26  ;;  %v2777_v3 = vadd.f32 %v6502_v16, %v2776_v13 }
 0x543   : > { %v3066_v9 = vpop.f32.mrf.mxu2  ;;  %2815 = vmatmul.bf16.gmra.mxu1 %v2589_v32  ;;  %v3697_v50 = vmul.f32 0.5, %v3633_v44 }
 0x544   : > { %v2486_v7 = vpop.f32.mrf.mxu0  ;;  %v3067_v37 = vadd.f32 %v6467_v48, %v3066_v9  ;;  %v2873_v59 = vmax.f32 %v2777_v3, 0.0 }
 0x545   : > { %v3356_v8 = vpop.f32.mrf.mxu3  ;;  %v2487_v55 = vadd.f32 %v6543_v39, %v2486_v7 }
 0x546   : > { %v3357_v23 = vadd.f32 %v6551_v41, %v3356_v8  ;;  %v3190_v52 = vmax.f32 %v3067_v37, 0.0 }
 0x547   : > { %v2556_v60 = vmax.f32 %v2487_v55, 0.0 }
 0x548   : > { %v5253_v40 = vpop.eup %5252  ;;  %v3507_v35 = vmul.f32 0.5, %v3357_v23 }
 0x549   : > { %v3634_v36 = vadd.f32 1.0, %v5253_v40  ;;  %v2778_v38 = vpop.f32.mrf.mxu1 }
 0x54a   : > { %v2779_v51 = vadd.f32 %v6502_v16, %v2778_v38  ;;  %5254 = vtanh.f32 %v3507_v35 }
 0x54b   : > { %v3698_v61 = vmul.f32 0.5, %v3634_v36  ;;  %v3068_v43 = vpop.f32.mrf.mxu2 }
 0x54c   : > { %v2874_v10 = vmax.f32 %v2779_v51, 0.0  ;;  %v3069_v45 = vadd.f32 %v6467_v48, %v3068_v43  ;;  %v2488_v34 = vpop.f32.mrf.mxu0 }
 0x54d   : > { %v4728_v42 = vpack.c.bf16 %v3698_v61, %v3697_v50  ;;  %v3358_v58 = vpop.f32.mrf.mxu3  ;;  %v2489_v62 = vadd.f32 %v6543_v39, %v2488_v34 }
 0x54e   : > { %v2916_v22 = vpack.c.bf16 %v2874_v10, %v2873_v59  ;;  %v3191_v56 = vmax.f32 %v3069_v45, 0.0  ;;  %v3359_v25 = vadd.f32 %v6551_v41, %v3358_v58 }
 0x54f   : > { %5036 = vst [vmem:[%s6569_s28 + $0x10] sm:$0xff] %v4728_v42   ;;  %v2557_v21 = vmax.f32 %v2489_v62, 0.0 }
 0x550   : > { %v3508_v46 = vmul.f32 0.5, %v3359_v25  ;;  %3110 = vmatmul.bf16.gmra.mxu2 %v2916_v22  ;;  %v3242_v47 = vpack.c.bf16 %v3191_v56, %v3190_v52  ;;  %v5255_v28 = vpop.eup %5254  ;;  %v6610_v22 = vld [vmem:[%s6759_s2 + $0x6] ss:$0 sm:$0xff] }
 0x551   : > { %v2781_v31 = vpop.f32.mrf.mxu1  ;;  %v2590_v53 = vpack.c.bf16 %v2557_v21, %v2556_v60  ;;  %v3635_v11 = vadd.f32 1.0, %v5255_v28 }
 0x552   : > { %5256 = vtanh.f32 %v3508_v46  ;;  %3400 = vmatmul.bf16.gmra.mxu3 %v3242_v47  ;;  %v2782_v30 = vadd.f32 %v6502_v16, %v2781_v31 }
 0x553   : > { %v3071_v57 = vpop.f32.mrf.mxu2  ;;  %2820 = vmatmul.bf16.gmra.mxu1 %v2590_v53  ;;  %v3699_v49 = vmul.f32 0.5, %v3635_v11 }
 0x554   : > { %v2491_v2 = vpop.f32.mrf.mxu0  ;;  %v3072_v15 = vadd.f32 %v6467_v48, %v3071_v57  ;;  %v2875_v20 = vmax.f32 %v2782_v30, 0.0 }
 0x555   : > { %v3361_v4 = vpop.f32.mrf.mxu3  ;;  %v2492_v0 = vadd.f32 %v6543_v39, %v2491_v2 }
 0x556   : > { %v3362_v6 = vadd.f32 %v6551_v41, %v3361_v4  ;;  %v3192_v33 = vmax.f32 %v3072_v15, 0.0 }
 0x557   : > { %v2558_v7 = vmax.f32 %v2492_v0, 0.0 }
 0x558   : > { %v5257_v29 = vpop.eup %5256  ;;  %v3509_v12 = vmul.f32 0.5, %v3362_v6 }
 0x559   : > { %v3636_v54 = vadd.f32 1.0, %v5257_v29  ;;  %v2783_v5 = vpop.f32.mrf.mxu1 }
 0x55a   : > { %v2784_v14 = vadd.f32 %v6502_v16, %v2783_v5  ;;  %5258 = vtanh.f32 %v3509_v12 }
 0x55b   : > { %v3700_v18 = vmul.f32 0.5, %v3636_v54  ;;  %v3073_v19 = vpop.f32.mrf.mxu2 }
 0x55c   : > { %v2876_v1 = vmax.f32 %v2784_v14, 0.0  ;;  %v3074_v27 = vadd.f32 %v6467_v48, %v3073_v19  ;;  %v2493_v24 = vpop.f32.mrf.mxu0 }
 0x55d   : > { %v4733_v63 = vpack.c.bf16 %v3700_v18, %v3699_v49  ;;  %v3363_v26 = vpop.f32.mrf.mxu3  ;;  %v2494_v17 = vadd.f32 %v6543_v39, %v2493_v24 }
 0x55e   : > { %v2917_v13 = vpack.c.bf16 %v2876_v1, %v2875_v20  ;;  %v3193_v32 = vmax.f32 %v3074_v27, 0.0  ;;  %v3364_v9 = vadd.f32 %v6551_v41, %v3363_v26 }
 0x55f   : > { %5037 = vst [vmem:[%s6569_s28 + $0x18] sm:$0xff] %v4733_v63   ;;  %v2559_v8 = vmax.f32 %v2494_v17, 0.0 }
 0x560   : > { %v3510_v23 = vmul.f32 0.5, %v3364_v9  ;;  %3115 = vmatmul.bf16.gmra.mxu2 %v2917_v13  ;;  %v3243_v44 = vpack.c.bf16 %v3193_v32, %v3192_v33  ;;  %v5259_v36 = vpop.eup %5258 }
 0x561   : > { %v2786_v40 = vpop.f32.mrf.mxu1  ;;  %v2591_v3 = vpack.c.bf16 %v2559_v8, %v2558_v7  ;;  %v3637_v51 = vadd.f32 1.0, %v5259_v36 }
 0x562   : > { %5260 = vtanh.f32 %v3510_v23  ;;  %3405 = vmatmul.bf16.gmra.mxu3 %v3243_v44  ;;  %v2787_v50 = vadd.f32 %v6502_v16, %v2786_v40 }
 0x563   : > { %v3076_v37 = vpop.f32.mrf.mxu2  ;;  %2825 = vmatmul.bf16.gmra.mxu1 %v2591_v3  ;;  %v3701_v45 = vmul.f32 0.5, %v3637_v51 }
 0x564   : > { %v3077_v43 = vadd.f32 %v6467_v48, %v3076_v37  ;;  %v2877_v34 = vmax.f32 %v2787_v50, 0.0 }
 0x565   : > { %v3366_v35 = vpop.f32.mrf.mxu3 }
 0x566   : > { %v3367_v38 = vadd.f32 %v6551_v41, %v3366_v35  ;;  %v3194_v25 = vmax.f32 %v3077_v43, 0.0 }
 0x568   : > { %v5261_v39 = vpop.eup %5260  ;;  %v3511_v55 = vmul.f32 0.5, %v3367_v38 }
 0x569   : > { %v3638_v61 = vadd.f32 1.0, %v5261_v39  ;;  %v2788_v59 = vpop.f32.mrf.mxu1 }
 0x56a   : > { %v2789_v10 = vadd.f32 %v6502_v16, %v2788_v59  ;;  %5262 = vtanh.f32 %v3511_v55 }
 0x56b   : > { %v3702_v42 = vmul.f32 0.5, %v3638_v61  ;;  %v3078_v52 = vpop.f32.mrf.mxu2 }
 0x56c   : > { %v2878_v58 = vmax.f32 %v2789_v10, 0.0  ;;  %v3079_v56 = vadd.f32 %v6610_v22, %v3078_v52 }
 0x56d   : > { %v4738_v62 = vpack.c.bf16 %v3702_v42, %v3701_v45  ;;  %v3368_v48 = vpop.f32.mrf.mxu3 }
 0x56e   : > { %v2918_v60 = vpack.c.bf16 %v2878_v58, %v2877_v34  ;;  %v3195_v21 = vmax.f32 %v3079_v56, 0.0  ;;  %v3369_v46 = vadd.f32 %v6551_v41, %v3368_v48 }
 0x56f   : > { %5038 = vst [vmem:[%s6569_s28 + $0x20] sm:$0xff] %v4738_v62  }
 0x570   : > { %v3512_v47 = vmul.f32 0.5, %v3369_v46  ;;  %3120 = vmatmul.bf16.gmra.mxu2 %v2918_v60  ;;  %v3244_v31 = vpack.c.bf16 %v3195_v21, %v3194_v25  ;;  %v5263_v57 = vpop.eup %5262 }
 0x571   : > { %v2791_v53 = vpop.f32.mrf.mxu1  ;;  %v3639_v6 = vadd.f32 1.0, %v5263_v57 }
 0x572   : > { %5264 = vtanh.f32 %v3512_v47  ;;  %3410 = vmatmul.bf16.gmra.mxu3 %v3244_v31  ;;  %v2792_v29 = vadd.f32 %v6502_v16, %v2791_v53 }
 0x573   : > { %v3081_v28 = vpop.f32.mrf.mxu2  ;;  %v3703_v14 = vmul.f32 0.5, %v3639_v6 }
 0x574   : > { %v3082_v54 = vadd.f32 %v6610_v22, %v3081_v28  ;;  %v2879_v19 = vmax.f32 %v2792_v29, 0.0 }
 0x575   : > { %v3371_v2 = vpop.f32.mrf.mxu3 }
 0x576   : > { %v3372_v4 = vadd.f32 %v6551_v41, %v3371_v2  ;;  %v3196_v27 = vmax.f32 %v3082_v54, 0.0 }
 0x578   : > { %v5265_v11 = vpop.eup %5264  ;;  %v3513_v12 = vmul.f32 0.5, %v3372_v4 }
 0x579   : > { %v3640_v30 = vadd.f32 1.0, %v5265_v11  ;;  %v2793_v15 = vpop.f32.mrf.mxu1 }
 0x57a   : > { %v2794_v5 = vadd.f32 %v6502_v16, %v2793_v15  ;;  %5266 = vtanh.f32 %v3513_v12 }
 0x57b   : > { %v3704_v49 = vmul.f32 0.5, %v3640_v30  ;;  %v3083_v18 = vpop.f32.mrf.mxu2 }
 0x57c   : > { %v2880_v20 = vmax.f32 %v2794_v5, 0.0  ;;  %v3084_v0 = vadd.f32 %v6610_v22, %v3083_v18 }
 0x57d   : > { %v4743_v1 = vpack.c.bf16 %v3704_v49, %v3703_v14  ;;  %v3373_v63 = vpop.f32.mrf.mxu3 }
 0x57e   : > { %v2919_v33 = vpack.c.bf16 %v2880_v20, %v2879_v19  ;;  %v3197_v24 = vmax.f32 %v3084_v0, 0.0  ;;  %v3374_v26 = vadd.f32 %v6551_v41, %v3373_v63 }
 0x57f   : > { %5039 = vst [vmem:[%s6569_s28 + $0x28] sm:$0xff] %v4743_v1  }
 0x580   : > { %v3514_v13 = vmul.f32 0.5, %v3374_v26  ;;  %3125 = vmatmul.bf16.gmra.mxu2 %v2919_v33  ;;  %v3245_v32 = vpack.c.bf16 %v3197_v24, %v3196_v27  ;;  %v5267_v7 = vpop.eup %5266 }
 0x581   : > { %v2796_v17 = vpop.f32.mrf.mxu1  ;;  %v3641_v44 = vadd.f32 1.0, %v5267_v7 }
 0x582   : > { %5268 = vtanh.f32 %v3514_v13  ;;  %3415 = vmatmul.bf16.gmra.mxu3 %v3245_v32  ;;  %v2797_v3 = vadd.f32 %v6502_v16, %v2796_v17 }
 0x583   : > { %v3086_v9 = vpop.f32.mrf.mxu2  ;;  %v3705_v39 = vmul.f32 0.5, %v3641_v44 }
 0x584   : > { %v3087_v37 = vadd.f32 %v6610_v22, %v3086_v9  ;;  %v2881_v43 = vmax.f32 %v2797_v3, 0.0 }
 0x585   : > { %v3376_v8 = vpop.f32.mrf.mxu3 }
 0x586   : > { %v3377_v23 = vadd.f32 %v6551_v41, %v3376_v8  ;;  %v3198_v45 = vmax.f32 %v3087_v37, 0.0 }
 0x588   : > { %v5269_v40 = vpop.eup %5268  ;;  %v3515_v38 = vmul.f32 0.5, %v3377_v23 }
 0x589   : > { %v3642_v36 = vadd.f32 1.0, %v5269_v40  ;;  %v2798_v35 = vpop.f32.mrf.mxu1 }
 0x58a   : > { %v2799_v51 = vadd.f32 %v6502_v16, %v2798_v35  ;;  %5270 = vtanh.f32 %v3515_v38 }
 0x58b   : > { %v3706_v50 = vmul.f32 0.5, %v3642_v36  ;;  %v3088_v61 = vpop.f32.mrf.mxu2 }
 0x58c   : > { %v2882_v59 = vmax.f32 %v2799_v51, 0.0  ;;  %v3089_v55 = vadd.f32 %v6610_v22, %v3088_v61 }
 0x58d   : > { %v4748_v10 = vpack.c.bf16 %v3706_v50, %v3705_v39  ;;  %v3378_v42 = vpop.f32.mrf.mxu3 }
 0x58e   : > { %v2920_v52 = vpack.c.bf16 %v2882_v59, %v2881_v43  ;;  %v3199_v34 = vmax.f32 %v3089_v55, 0.0  ;;  %v3379_v58 = vadd.f32 %v6551_v41, %v3378_v42 }
 0x58f   : > { %5040 = vst [vmem:[%s6569_s28 + $0x30] sm:$0xff] %v4748_v10  }
 0x590   : > { %v3516_v56 = vmul.f32 0.5, %v3379_v58  ;;  %3130 = vmatmul.bf16.gmra.mxu2 %v2920_v52  ;;  %v3246_v62 = vpack.c.bf16 %v3199_v34, %v3198_v45  ;;  %v5271_v60 = vpop.eup %5270 }
 0x591   : > { %v2801_v25 = vpop.f32.mrf.mxu1  ;;  %v3643_v47 = vadd.f32 1.0, %v5271_v60 }
 0x592   : > { %5272 = vtanh.f32 %v3516_v56  ;;  %3420 = vmatmul.bf16.gmra.mxu3 %v3246_v62  ;;  %v2802_v53 = vadd.f32 %v6502_v16, %v2801_v25  ;;  %v6647_v62 = vld [vmem:[%s6759_s2 + $0x5] ss:$0 sm:$0xff] }
 0x593   : > { %v3091_v48 = vpop.f32.mrf.mxu2  ;;  %v3707_v11 = vmul.f32 0.5, %v3643_v47 }
 0x594   : > { %v3092_v57 = vadd.f32 %v6610_v22, %v3091_v48  ;;  %v2883_v54 = vmax.f32 %v2802_v53, 0.0 }
 0x595   : > { %v3381_v21 = vpop.f32.mrf.mxu3 }
 0x596   : > { %v3382_v46 = vadd.f32 %v6551_v41, %v3381_v21  ;;  %v3200_v14 = vmax.f32 %v3092_v57, 0.0 }
 0x598   : > { %v5273_v31 = vpop.eup %5272  ;;  %v3517_v4 = vmul.f32 0.5, %v3382_v46 }
 0x599   : > { %v3644_v28 = vadd.f32 1.0, %v5273_v31  ;;  %v2803_v2 = vpop.f32.mrf.mxu1 }
 0x59a   : > { %v2804_v6 = vadd.f32 %v6502_v16, %v2803_v2  ;;  %5274 = vtanh.f32 %v3517_v4 }
 0x59b   : > { %v3708_v29 = vmul.f32 0.5, %v3644_v28  ;;  %v3093_v30 = vpop.f32.mrf.mxu2 }
 0x59c   : > { %v2884_v15 = vmax.f32 %v2804_v6, 0.0  ;;  %v3094_v12 = vadd.f32 %v6610_v22, %v3093_v30 }
 0x59d   : > { %v4753_v5 = vpack.c.bf16 %v3708_v29, %v3707_v11  ;;  %v3383_v49 = vpop.f32.mrf.mxu3 }
 0x59e   : > { %v2921_v18 = vpack.c.bf16 %v2884_v15, %v2883_v54  ;;  %v3201_v19 = vmax.f32 %v3094_v12, 0.0  ;;  %v3384_v20 = vadd.f32 %v6551_v41, %v3383_v49 }
 0x59f   : > { %5041 = vst [vmem:[%s6569_s28 + $0x38] sm:$0xff] %v4753_v5  }
 0x5a0   : > { %v3518_v0 = vmul.f32 0.5, %v3384_v20  ;;  %3135 = vmatmul.bf16.gmra.mxu2 %v2921_v18  ;;  %v3247_v1 = vpack.c.bf16 %v3201_v19, %v3200_v14  ;;  %v5275_v33 = vpop.eup %5274 }
 0x5a1   : > { %v2806_v27 = vpop.f32.mrf.mxu1  ;;  %v3645_v13 = vadd.f32 1.0, %v5275_v33 }
 0x5a2   : > { %5276 = vtanh.f32 %v3518_v0  ;;  %3425 = vmatmul.bf16.gmra.mxu3 %v3247_v1  ;;  %v2807_v17 = vadd.f32 %v6502_v16, %v2806_v27 }
 0x5a3   : > { %v3096_v63 = vpop.f32.mrf.mxu2  ;;  %v3709_v40 = vmul.f32 0.5, %v3645_v13 }
 0x5a4   : > { %v3097_v7 = vadd.f32 %v6610_v22, %v3096_v63  ;;  %v2885_v37 = vmax.f32 %v2807_v17, 0.0 }
 0x5a5   : > { %v3386_v24 = vpop.f32.mrf.mxu3 }
 0x5a6   : > { %v3387_v26 = vadd.f32 %v6551_v41, %v3386_v24  ;;  %v3202_v39 = vmax.f32 %v3097_v7, 0.0 }
 0x5a8   : > { %v5277_v32 = vpop.eup %5276  ;;  %v3519_v23 = vmul.f32 0.5, %v3387_v26 }
 0x5a9   : > { %v3646_v9 = vadd.f32 1.0, %v5277_v32  ;;  %v2808_v8 = vpop.f32.mrf.mxu1 }
 0x5aa   : > { %v2809_v44 = vadd.f32 %v6502_v16, %v2808_v8  ;;  %5278 = vtanh.f32 %v3519_v23 }
 0x5ab   : > { %v3710_v3 = vmul.f32 0.5, %v3646_v9  ;;  %v3098_v36 = vpop.f32.mrf.mxu2 }
 0x5ac   : > { %v2886_v35 = vmax.f32 %v2809_v44, 0.0  ;;  %v3099_v38 = vadd.f32 %v6610_v22, %v3098_v36 }
 0x5ad   : > { %v4758_v51 = vpack.c.bf16 %v3710_v3, %v3709_v40  ;;  %v3388_v50 = vpop.f32.mrf.mxu3 }
 0x5ae   : > { %v2922_v61 = vpack.c.bf16 %v2886_v35, %v2885_v37  ;;  %v3203_v43 = vmax.f32 %v3099_v38, 0.0  ;;  %v3389_v59 = vadd.f32 %v6551_v41, %v3388_v50 }
 0x5af   : > { %5042 = vst [vmem:[%s6569_s28 + $0x40] sm:$0xff] %v4758_v51  }
 0x5b0   : > { %v3520_v55 = vmul.f32 0.5, %v3389_v59  ;;  %3140 = vmatmul.bf16.gmra.mxu2 %v2922_v61  ;;  %v3248_v10 = vpack.c.bf16 %v3203_v43, %v3202_v39  ;;  %v5279_v42 = vpop.eup %5278 }
 0x5b1   : > { %v2811_v16 = vpop.f32.mrf.mxu1  ;;  %v3647_v58 = vadd.f32 1.0, %v5279_v42 }
 0x5b2   : > { %5280 = vtanh.f32 %v3520_v55  ;;  %3430 = vmatmul.bf16.gmra.mxu3 %v3248_v10  ;;  %v2812_v25 = vadd.f32 %v6647_v62, %v2811_v16 }
 0x5b3   : > { %v3101_v45 = vpop.f32.mrf.mxu2  ;;  %v3711_v31 = vmul.f32 0.5, %v3647_v58 }
 0x5b4   : > { %v3102_v60 = vadd.f32 %v6610_v22, %v3101_v45  ;;  %v2887_v57 = vmax.f32 %v2812_v25, 0.0 }
 0x5b5   : > { %v3391_v52 = vpop.f32.mrf.mxu3 }
 0x5b6   : > { %v3392_v34 = vadd.f32 %v6551_v41, %v3391_v52  ;;  %v3204_v11 = vmax.f32 %v3102_v60, 0.0 }
 0x5b8   : > { %v5281_v56 = vpop.eup %5280  ;;  %v3521_v46 = vmul.f32 0.5, %v3392_v34 }
 0x5b9   : > { %v3648_v48 = vadd.f32 1.0, %v5281_v56  ;;  %v2813_v21 = vpop.f32.mrf.mxu1 }
 0x5ba   : > { %v2814_v47 = vadd.f32 %v6647_v62, %v2813_v21  ;;  %5282 = vtanh.f32 %v3521_v46 }
 0x5bb   : > { %v3712_v53 = vmul.f32 0.5, %v3648_v48  ;;  %v3103_v28 = vpop.f32.mrf.mxu2 }
 0x5bc   : > { %v2888_v2 = vmax.f32 %v2814_v47, 0.0  ;;  %v3104_v4 = vadd.f32 %v6610_v22, %v3103_v28 }
 0x5bd   : > { %v4763_v6 = vpack.c.bf16 %v3712_v53, %v3711_v31  ;;  %v3393_v29 = vpop.f32.mrf.mxu3 }
 0x5be   : > { %v2923_v30 = vpack.c.bf16 %v2888_v2, %v2887_v57  ;;  %v3205_v54 = vmax.f32 %v3104_v4, 0.0  ;;  %v3394_v15 = vadd.f32 %v6551_v41, %v3393_v29 }
 0x5bf   : > { %5043 = vst [vmem:[%s6569_s28 + $0x48] sm:$0xff] %v4763_v6  }
 0x5c0   : > { %v3522_v12 = vmul.f32 0.5, %v3394_v15  ;;  %3145 = vmatmul.bf16.gmra.mxu2 %v2923_v30  ;;  %v3249_v5 = vpack.c.bf16 %v3205_v54, %v3204_v11  ;;  %v5283_v18 = vpop.eup %5282 }
 0x5c1   : > { %v2816_v14 = vpop.f32.mrf.mxu1  ;;  %v3649_v0 = vadd.f32 1.0, %v5283_v18 }
 0x5c2   : > { %5284 = vtanh.f32 %v3522_v12  ;;  %3435 = vmatmul.bf16.gmra.mxu3 %v3249_v5  ;;  %v2817_v27 = vadd.f32 %v6647_v62, %v2816_v14 }
 0x5c3   : > { %v3106_v49 = vpop.f32.mrf.mxu2  ;;  %v3713_v32 = vmul.f32 0.5, %v3649_v0 }
 0x5c4   : > { %v3107_v33 = vadd.f32 %v6610_v22, %v3106_v49  ;;  %v2889_v7 = vmax.f32 %v2817_v27, 0.0 }
 0x5c5   : > { %v3396_v19 = vpop.f32.mrf.mxu3 }
 0x5c6   : > { %v3397_v20 = vadd.f32 %v6551_v41, %v3396_v19  ;;  %v3206_v40 = vmax.f32 %v3107_v33, 0.0 }
 0x5c8   : > { %v5285_v1 = vpop.eup %5284  ;;  %v3523_v26 = vmul.f32 0.5, %v3397_v20 }
 0x5c9   : > { %v3650_v63 = vadd.f32 1.0, %v5285_v1  ;;  %v2818_v24 = vpop.f32.mrf.mxu1 }
 0x5ca   : > { %v2819_v13 = vadd.f32 %v6647_v62, %v2818_v24  ;;  %5286 = vtanh.f32 %v3523_v26 }
 0x5cb   : > { %v3714_v17 = vmul.f32 0.5, %v3650_v63  ;;  %v3108_v9 = vpop.f32.mrf.mxu2 }
 0x5cc   : > { %v2890_v8 = vmax.f32 %v2819_v13, 0.0  ;;  %v3109_v23 = vadd.f32 %v6610_v22, %v3108_v9 }
 0x5cd   : > { %v4768_v44 = vpack.c.bf16 %v3714_v17, %v3713_v32  ;;  %v3398_v3 = vpop.f32.mrf.mxu3 }
 0x5ce   : > { %v2924_v36 = vpack.c.bf16 %v2890_v8, %v2889_v7  ;;  %v3207_v37 = vmax.f32 %v3109_v23, 0.0  ;;  %v3399_v35 = vadd.f32 %v6551_v41, %v3398_v3 }
 0x5cf   : > { %5044 = vst [vmem:[%s6569_s28 + $0x50] sm:$0xff] %v4768_v44  }
 0x5d0   : > { %v3250_v38 = vpack.c.bf16 %v3207_v37, %v3206_v40  ;;  %v3524_v51 = vmul.f32 0.5, %v3399_v35  ;;  %3150 = vmatmul.bf16.gmra.mxu2 %v2924_v36  ;;  %v5287_v61 = vpop.eup %5286 }
 0x5d1   : > { %v2821_v39 = vpop.f32.mrf.mxu1  ;;  %v3651_v55 = vadd.f32 1.0, %v5287_v61 }
 0x5d2   : > { %5288 = vtanh.f32 %v3524_v51  ;;  %3440 = vmatmul.bf16.gmra.mxu3 %v3250_v38  ;;  %v2822_v16 = vadd.f32 %v6647_v62, %v2821_v39 }
 0x5d3   : > { %v3111_v50 = vpop.f32.mrf.mxu2  ;;  %v3715_v56 = vmul.f32 0.5, %v3651_v55 }
 0x5d4   : > { %v3112_v42 = vadd.f32 %v6610_v22, %v3111_v50  ;;  %v2891_v60 = vmax.f32 %v2822_v16, 0.0 }
 0x5d5   : > { %v3401_v43 = vpop.f32.mrf.mxu3 }
 0x5d6   : > { %v3402_v59 = vadd.f32 %v6551_v41, %v3401_v43  ;;  %v3208_v31 = vmax.f32 %v3112_v42, 0.0 }
 0x5d8   : > { %v5289_v10 = vpop.eup %5288  ;;  %v3525_v34 = vmul.f32 0.5, %v3402_v59 }
 0x5d9   : > { %v3652_v45 = vadd.f32 1.0, %v5289_v10  ;;  %v2823_v52 = vpop.f32.mrf.mxu1 }
 0x5da   : > { %v2824_v58 = vadd.f32 %v6647_v62, %v2823_v52  ;;  %5290 = vtanh.f32 %v3525_v34 }
 0x5db   : > { %v3716_v25 = vmul.f32 0.5, %v3652_v45  ;;  %v3113_v48 = vpop.f32.mrf.mxu2 }
 0x5dc   : > { %v2892_v21 = vmax.f32 %v2824_v58, 0.0  ;;  %v3114_v46 = vadd.f32 %v6610_v22, %v3113_v48 }
 0x5dd   : > { %v4773_v47 = vpack.c.bf16 %v3716_v25, %v3715_v56  ;;  %v3403_v53 = vpop.f32.mrf.mxu3 }
 0x5de   : > { %v2925_v28 = vpack.c.bf16 %v2892_v21, %v2891_v60  ;;  %v3209_v57 = vmax.f32 %v3114_v46, 0.0  ;;  %v3404_v2 = vadd.f32 %v6551_v41, %v3403_v53 }
 0x5df   : > { %5045 = vst [vmem:[%s6569_s28 + $0x58] sm:$0xff] %v4773_v47  }
 0x5e0   : > { %v3251_v4 = vpack.c.bf16 %v3209_v57, %v3208_v31  ;;  %v3526_v6 = vmul.f32 0.5, %v3404_v2  ;;  %3155 = vmatmul.bf16.gmra.mxu2 %v2925_v28  ;;  %v5291_v30 = vpop.eup %5290 }
 0x5e1   : > { %v2826_v11 = vpop.f32.mrf.mxu1  ;;  %v3653_v12 = vadd.f32 1.0, %v5291_v30 }
 0x5e2   : > { %5292 = vtanh.f32 %v3526_v6  ;;  %3445 = vmatmul.bf16.gmra.mxu3 %v3251_v4  ;;  %v2827_v14 = vadd.f32 %v6647_v62, %v2826_v11 }
 0x5e3   : > { %v3116_v29 = vpop.f32.mrf.mxu2  ;;  %v3717_v1 = vmul.f32 0.5, %v3653_v12 }
 0x5e4   : > { %v3117_v18 = vadd.f32 %v6610_v22, %v3116_v29  ;;  %v2893_v33 = vmax.f32 %v2827_v14, 0.0 }
 0x5e5   : > { %v3406_v54 = vpop.f32.mrf.mxu3 }
 0x5e6   : > { %v3407_v15 = vadd.f32 %v6551_v41, %v3406_v54  ;;  %v3210_v32 = vmax.f32 %v3117_v18, 0.0 }
 0x5e8   : > { %v5293_v5 = vpop.eup %5292  ;;  %v3527_v20 = vmul.f32 0.5, %v3407_v15 }
 0x5e9   : > { %v3654_v49 = vadd.f32 1.0, %v5293_v5  ;;  %v2828_v19 = vpop.f32.mrf.mxu1 }
 0x5ea   : > { %v2829_v0 = vadd.f32 %v6647_v62, %v2828_v19  ;;  %5294 = vtanh.f32 %v3527_v20 }
 0x5eb   : > { %v3718_v27 = vmul.f32 0.5, %v3654_v49  ;;  %v3118_v63 = vpop.f32.mrf.mxu2 }
 0x5ec   : > { %v2894_v24 = vmax.f32 %v2829_v0, 0.0  ;;  %v3119_v26 = vadd.f32 %v6610_v22, %v3118_v63 }
 0x5ed   : > { %v4778_v13 = vpack.c.bf16 %v3718_v27, %v3717_v1  ;;  %v3408_v17 = vpop.f32.mrf.mxu3 }
 0x5ee   : > { %v2926_v9 = vpack.c.bf16 %v2894_v24, %v2893_v33  ;;  %v3211_v7 = vmax.f32 %v3119_v26, 0.0  ;;  %v3409_v8 = vadd.f32 %v6551_v41, %v3408_v17 }
 0x5ef   : > { %5046 = vst [vmem:[%s6569_s28 + $0x60] sm:$0xff] %v4778_v13  }
 0x5f0   : > { %v3252_v23 = vpack.c.bf16 %v3211_v7, %v3210_v32  ;;  %v3528_v44 = vmul.f32 0.5, %v3409_v8  ;;  %3160 = vmatmul.bf16.gmra.mxu2 %v2926_v9  ;;  %v5295_v40 = vpop.eup %5294 }
 0x5f1   : > { %v3655_v37 = vadd.f32 1.0, %v5295_v40 }
 0x5f2   : > { %5296 = vtanh.f32 %v3528_v44  ;;  %3450 = vmatmul.bf16.gmra.mxu3 %v3252_v23 }
 0x5f3   : > { %v3121_v62 = vpop.f32.mrf.mxu2  ;;  %v3719_v50 = vmul.f32 0.5, %v3655_v37 }
 0x5f4   : > { %v3122_v51 = vadd.f32 %v6610_v22, %v3121_v62 }
 0x5f5   : > { %v3411_v3 = vpop.f32.mrf.mxu3 }
 0x5f6   : > { %v3412_v36 = vadd.f32 %v6551_v41, %v3411_v3  ;;  %v3212_v16 = vmax.f32 %v3122_v51, 0.0 }
 0x5f8   : > { %v5297_v35 = vpop.eup %5296  ;;  %v3529_v39 = vmul.f32 0.5, %v3412_v36 }
 0x5f9   : > { %v3656_v38 = vadd.f32 1.0, %v5297_v35 }
 0x5fa   : > { %5298 = vtanh.f32 %v3529_v39 }
 0x5fb   : > { %v3720_v61 = vmul.f32 0.5, %v3656_v38  ;;  %v3123_v43 = vpop.f32.mrf.mxu2 }
 0x5fc   : > { %v3124_v59 = vadd.f32 %v6610_v22, %v3123_v43 }
 0x5fd   : > { %v4783_v55 = vpack.c.bf16 %v3720_v61, %v3719_v50  ;;  %v3413_v10 = vpop.f32.mrf.mxu3 }
 0x5fe   : > { %v3213_v45 = vmax.f32 %v3124_v59, 0.0  ;;  %v3414_v42 = vadd.f32 %v6551_v41, %v3413_v10 }
 0x5ff   : > { %5047 = vst [vmem:[%s6569_s28 + $0x68] sm:$0xff] %v4783_v55  }
 0x600   : > { %v3253_v52 = vpack.c.bf16 %v3213_v45, %v3212_v16  ;;  %v3530_v34 = vmul.f32 0.5, %v3414_v42  ;;  %v5299_v56 = vpop.eup %5298 }
 0x601   : > { %v3657_v60 = vadd.f32 1.0, %v5299_v56 }
 0x602   : > { %5300 = vtanh.f32 %v3530_v34  ;;  %3455 = vmatmul.bf16.gmra.mxu3 %v3253_v52 }
 0x603   : > { %v3126_v58 = vpop.f32.mrf.mxu2  ;;  %v3721_v53 = vmul.f32 0.5, %v3657_v60 }
 0x604   : > { %v3127_v47 = vadd.f32 %v6610_v22, %v3126_v58 }
 0x605   : > { %v3416_v25 = vpop.f32.mrf.mxu3 }
 0x606   : > { %v3417_v48 = vadd.f32 %v6551_v41, %v3416_v25  ;;  %v3214_v11 = vmax.f32 %v3127_v47, 0.0  ;;  %v6687_v41 = vld [vmem:[%s6759_s2 + $0x7] ss:$0 sm:$0xff] }
 0x608   : > { %v5301_v21 = vpop.eup %5300  ;;  %v3531_v31 = vmul.f32 0.5, %v3417_v48 }
 0x609   : > { %v3658_v46 = vadd.f32 1.0, %v5301_v21 }
 0x60a   : > { %5302 = vtanh.f32 %v3531_v31 }
 0x60b   : > { %v3722_v28 = vmul.f32 0.5, %v3658_v46  ;;  %v3128_v57 = vpop.f32.mrf.mxu2 }
 0x60c   : > { %v3129_v2 = vadd.f32 %v6610_v22, %v3128_v57 }
 0x60d   : > { %v4788_v4 = vpack.c.bf16 %v3722_v28, %v3721_v53  ;;  %v3418_v6 = vpop.f32.mrf.mxu3 }
 0x60e   : > { %v3215_v29 = vmax.f32 %v3129_v2, 0.0  ;;  %v3419_v30 = vadd.f32 %v6687_v41, %v3418_v6 }
 0x60f   : > { %5048 = vst [vmem:[%s6569_s28 + $0x70] sm:$0xff] %v4788_v4  }
 0x610   : > { %v3254_v54 = vpack.c.bf16 %v3215_v29, %v3214_v11  ;;  %v3532_v15 = vmul.f32 0.5, %v3419_v30  ;;  %v5303_v5 = vpop.eup %5302 }
 0x611   : > { %v3659_v18 = vadd.f32 1.0, %v5303_v5 }
 0x612   : > { %5304 = vtanh.f32 %v3532_v15  ;;  %3460 = vmatmul.bf16.gmra.mxu3 %v3254_v54 }
 0x613   : > { %v3131_v12 = vpop.f32.mrf.mxu2  ;;  %v3723_v27 = vmul.f32 0.5, %v3659_v18 }
 0x614   : > { %v3132_v0 = vadd.f32 %v6610_v22, %v3131_v12 }
 0x615   : > { %v3421_v14 = vpop.f32.mrf.mxu3 }
 0x616   : > { %v3422_v49 = vadd.f32 %v6687_v41, %v3421_v14  ;;  %v3216_v32 = vmax.f32 %v3132_v0, 0.0 }
 0x618   : > { %v5305_v19 = vpop.eup %5304  ;;  %v3533_v1 = vmul.f32 0.5, %v3422_v49 }
 0x619   : > { %v3660_v20 = vadd.f32 1.0, %v5305_v19 }
 0x61a   : > { %5306 = vtanh.f32 %v3533_v1 }
 0x61b   : > { %v3724_v63 = vmul.f32 0.5, %v3660_v20  ;;  %v3133_v33 = vpop.f32.mrf.mxu2 }
 0x61c   : > { %v3134_v24 = vadd.f32 %v6610_v22, %v3133_v33 }
 0x61d   : > { %v4793_v26 = vpack.c.bf16 %v3724_v63, %v3723_v27  ;;  %v3423_v13 = vpop.f32.mrf.mxu3 }
 0x61e   : > { %v3217_v17 = vmax.f32 %v3134_v24, 0.0  ;;  %v3424_v9 = vadd.f32 %v6687_v41, %v3423_v13 }
 0x61f   : > { %5049 = vst [vmem:[%s6569_s28 + $0x78] sm:$0xff] %v4793_v26  }
 0x620   : > { %v3255_v7 = vpack.c.bf16 %v3217_v17, %v3216_v32  ;;  %v3534_v8 = vmul.f32 0.5, %v3424_v9  ;;  %v5307_v44 = vpop.eup %5306 }
 0x621   : > { %v3661_v3 = vadd.f32 1.0, %v5307_v44 }
 0x622   : > { %5308 = vtanh.f32 %v3534_v8  ;;  %3465 = vmatmul.bf16.gmra.mxu3 %v3255_v7 }
 0x623   : > { %v3136_v23 = vpop.f32.mrf.mxu2  ;;  %v3725_v51 = vmul.f32 0.5, %v3661_v3 }
 0x624   : > { %v3137_v35 = vadd.f32 %v6610_v22, %v3136_v23 }
 0x625   : > { %v3426_v62 = vpop.f32.mrf.mxu3 }
 0x626   : > { %v3427_v40 = vadd.f32 %v6687_v41, %v3426_v62  ;;  %v3218_v55 = vmax.f32 %v3137_v35, 0.0 }
 0x628   : > { %v5309_v36 = vpop.eup %5308  ;;  %v3535_v38 = vmul.f32 0.5, %v3427_v40 }
 0x629   : > { %v3662_v37 = vadd.f32 1.0, %v5309_v36 }
 0x62a   : > { %5310 = vtanh.f32 %v3535_v38 }
 0x62b   : > { %v3726_v39 = vmul.f32 0.5, %v3662_v37  ;;  %v3138_v50 = vpop.f32.mrf.mxu2 }
 0x62c   : > { %v3139_v61 = vadd.f32 %v6610_v22, %v3138_v50 }
 0x62d   : > { %v4798_v43 = vpack.c.bf16 %v3726_v39, %v3725_v51  ;;  %v3428_v59 = vpop.f32.mrf.mxu3 }
 0x62e   : > { %v3219_v10 = vmax.f32 %v3139_v61, 0.0  ;;  %v3429_v16 = vadd.f32 %v6687_v41, %v3428_v59 }
 0x62f   : > { %5050 = vst [vmem:[%s6569_s28 + $0x80] sm:$0xff] %v4798_v43  }
 0x630   : > { %v3256_v45 = vpack.c.bf16 %v3219_v10, %v3218_v55  ;;  %v3536_v42 = vmul.f32 0.5, %v3429_v16  ;;  %v5311_v34 = vpop.eup %5310 }
 0x631   : > { %v3663_v25 = vadd.f32 1.0, %v5311_v34 }
 0x632   : > { %5312 = vtanh.f32 %v3536_v42  ;;  %3470 = vmatmul.bf16.gmra.mxu3 %v3256_v45 }
 0x633   : > { %v3141_v52 = vpop.f32.mrf.mxu2  ;;  %v3727_v47 = vmul.f32 0.5, %v3663_v25 }
 0x634   : > { %v3142_v21 = vadd.f32 %v6610_v22, %v3141_v52 }
 0x635   : > { %v3431_v58 = vpop.f32.mrf.mxu3 }
 0x636   : > { %v3432_v56 = vadd.f32 %v6687_v41, %v3431_v58  ;;  %v3220_v4 = vmax.f32 %v3142_v21, 0.0 }
 0x638   : > { %v5313_v48 = vpop.eup %5312  ;;  %v3537_v46 = vmul.f32 0.5, %v3432_v56 }
 0x639   : > { %v3664_v60 = vadd.f32 1.0, %v5313_v48 }
 0x63a   : > { %5314 = vtanh.f32 %v3537_v46 }
 0x63b   : > { %v3728_v31 = vmul.f32 0.5, %v3664_v60  ;;  %v3143_v53 = vpop.f32.mrf.mxu2 }
 0x63c   : > { %v3144_v28 = vadd.f32 %v6610_v22, %v3143_v53 }
 0x63d   : > { %v4803_v57 = vpack.c.bf16 %v3728_v31, %v3727_v47  ;;  %v3433_v2 = vpop.f32.mrf.mxu3 }
 0x63e   : > { %v3221_v6 = vmax.f32 %v3144_v28, 0.0  ;;  %v3434_v11 = vadd.f32 %v6687_v41, %v3433_v2 }
 0x63f   : > { %5051 = vst [vmem:[%s6569_s28 + $0x88] sm:$0xff] %v4803_v57  }
 0x640   : > { %v3257_v29 = vpack.c.bf16 %v3221_v6, %v3220_v4  ;;  %v3538_v30 = vmul.f32 0.5, %v3434_v11  ;;  %v5315_v15 = vpop.eup %5314 }
 0x641   : > { %v3665_v14 = vadd.f32 1.0, %v5315_v15 }
 0x642   : > { %5316 = vtanh.f32 %v3538_v30  ;;  %3475 = vmatmul.bf16.gmra.mxu3 %v3257_v29 }
 0x643   : > { %v3146_v54 = vpop.f32.mrf.mxu2  ;;  %v3729_v0 = vmul.f32 0.5, %v3665_v14 }
 0x644   : > { %v3147_v19 = vadd.f32 %v6610_v22, %v3146_v54 }
 0x645   : > { %v3436_v12 = vpop.f32.mrf.mxu3 }
 0x646   : > { %v3437_v5 = vadd.f32 %v6687_v41, %v3436_v12  ;;  %v3222_v26 = vmax.f32 %v3147_v19, 0.0 }
 0x648   : > { %v5317_v49 = vpop.eup %5316  ;;  %v3539_v20 = vmul.f32 0.5, %v3437_v5 }
 0x649   : > { %v3666_v18 = vadd.f32 1.0, %v5317_v49 }
 0x64a   : > { %5318 = vtanh.f32 %v3539_v20 }
 0x64b   : > { %v3730_v1 = vmul.f32 0.5, %v3666_v18  ;;  %v3148_v27 = vpop.f32.mrf.mxu2 }
 0x64c   : > { %v3149_v63 = vadd.f32 %v6610_v22, %v3148_v27 }
 0x64d   : > { %v4808_v33 = vpack.c.bf16 %v3730_v1, %v3729_v0  ;;  %v3438_v24 = vpop.f32.mrf.mxu3 }
 0x64e   : > { %v3223_v13 = vmax.f32 %v3149_v63, 0.0  ;;  %v3439_v32 = vadd.f32 %v6687_v41, %v3438_v24 }
 0x64f   : > { %5052 = vst [vmem:[%s6569_s28 + $0x90] sm:$0xff] %v4808_v33  }
 0x650   : > { %v3258_v17 = vpack.c.bf16 %v3223_v13, %v3222_v26  ;;  %v3540_v9 = vmul.f32 0.5, %v3439_v32  ;;  %v5319_v8 = vpop.eup %5318 }
 0x651   : > { %v3667_v62 = vadd.f32 1.0, %v5319_v8 }
 0x652   : > { %5320 = vtanh.f32 %v3540_v9  ;;  %3480 = vmatmul.bf16.gmra.mxu3 %v3258_v17 }
 0x653   : > { %v3151_v7 = vpop.f32.mrf.mxu2  ;;  %v3731_v35 = vmul.f32 0.5, %v3667_v62 }
 0x654   : > { %v3152_v36 = vadd.f32 %v6610_v22, %v3151_v7 }
 0x655   : > { %v3441_v23 = vpop.f32.mrf.mxu3 }
 0x656   : > { %v3442_v44 = vadd.f32 %v6687_v41, %v3441_v23  ;;  %v3224_v43 = vmax.f32 %v3152_v36, 0.0 }
 0x658   : > { %v5321_v40 = vpop.eup %5320  ;;  %v3541_v37 = vmul.f32 0.5, %v3442_v44 }
 0x659   : > { %v3668_v3 = vadd.f32 1.0, %v5321_v40 }
 0x65a   : > { %5322 = vtanh.f32 %v3541_v37 }
 0x65b   : > { %v3732_v38 = vmul.f32 0.5, %v3668_v3  ;;  %v3153_v51 = vpop.f32.mrf.mxu2 }
 0x65c   : > { %v3154_v39 = vadd.f32 %v6610_v22, %v3153_v51 }
 0x65d   : > { %v4813_v50 = vpack.c.bf16 %v3732_v38, %v3731_v35  ;;  %v3443_v61 = vpop.f32.mrf.mxu3 }
 0x65e   : > { %v3225_v59 = vmax.f32 %v3154_v39, 0.0  ;;  %v3444_v55 = vadd.f32 %v6687_v41, %v3443_v61 }
 0x65f   : > { %5053 = vst [vmem:[%s6569_s28 + $0x98] sm:$0xff] %v4813_v50  }
 0x660   : > { %v3259_v10 = vpack.c.bf16 %v3225_v59, %v3224_v43  ;;  %v3542_v16 = vmul.f32 0.5, %v3444_v55  ;;  %v5323_v42 = vpop.eup %5322 }
 0x661   : > { %v3669_v58 = vadd.f32 1.0, %v5323_v42 }
 0x662   : > { %5324 = vtanh.f32 %v3542_v16  ;;  %3485 = vmatmul.bf16.gmra.mxu3 %v3259_v10 }
 0x663   : > { %v3156_v45 = vpop.f32.mrf.mxu2  ;;  %v3733_v21 = vmul.f32 0.5, %v3669_v58 }
 0x664   : > { %v3157_v48 = vadd.f32 %v6610_v22, %v3156_v45 }
 0x665   : > { %v3446_v52 = vpop.f32.mrf.mxu3 }
 0x666   : > { %v3447_v34 = vadd.f32 %v6687_v41, %v3446_v52  ;;  %v3226_v57 = vmax.f32 %v3157_v48, 0.0 }
 0x668   : > { %v5325_v56 = vpop.eup %5324  ;;  %v3543_v60 = vmul.f32 0.5, %v3447_v34 }
 0x669   : > { %v3670_v25 = vadd.f32 1.0, %v5325_v56 }
 0x66a   : > { %5326 = vtanh.f32 %v3543_v60 }
 0x66b   : > { %v3734_v46 = vmul.f32 0.5, %v3670_v25  ;;  %v3158_v47 = vpop.f32.mrf.mxu2 }
 0x66c   : > { %v3159_v31 = vadd.f32 %v6610_v22, %v3158_v47 }
 0x66d   : > { %v4818_v53 = vpack.c.bf16 %v3734_v46, %v3733_v21  ;;  %v3448_v28 = vpop.f32.mrf.mxu3 }
 0x66e   : > { %v3227_v2 = vmax.f32 %v3159_v31, 0.0  ;;  %v3449_v4 = vadd.f32 %v6687_v41, %v3448_v28 }
 0x66f   : > { %5054 = vst [vmem:[%s6569_s28 + $0xa0] sm:$0xff] %v4818_v53  }
 0x670   : > { %v3260_v6 = vpack.c.bf16 %v3227_v2, %v3226_v57  ;;  %v3544_v11 = vmul.f32 0.5, %v3449_v4  ;;  %v5327_v30 = vpop.eup %5326 }
 0x671   : > { %v3671_v12 = vadd.f32 1.0, %v5327_v30 }
 0x672   : > { %5328 = vtanh.f32 %v3544_v11  ;;  %3490 = vmatmul.bf16.gmra.mxu3 %v3260_v6 }
 0x673   : > { %v3161_v29 = vpop.f32.mrf.mxu2  ;;  %v3735_v19 = vmul.f32 0.5, %v3671_v12 }
 0x674   : > { %v3162_v49 = vadd.f32 %v6610_v22, %v3161_v29 }
 0x675   : > { %v3451_v54 = vpop.f32.mrf.mxu3 }
 0x676   : > { %v3452_v15 = vadd.f32 %v6687_v41, %v3451_v54  ;;  %v3228_v33 = vmax.f32 %v3162_v49, 0.0 }
 0x678   : > { %v5329_v5 = vpop.eup %5328  ;;  %v3545_v18 = vmul.f32 0.5, %v3452_v15 }
 0x679   : > { %v3672_v14 = vadd.f32 1.0, %v5329_v5 }
 0x67a   : > { %5330 = vtanh.f32 %v3545_v18 }
 0x67b   : > { %v3736_v20 = vmul.f32 0.5, %v3672_v14  ;;  %v3163_v0 = vpop.f32.mrf.mxu2 }
 0x67c   : > { %v3164_v1 = vadd.f32 %v6610_v22, %v3163_v0 }
 0x67d   : > { %v4823_v27 = vpack.c.bf16 %v3736_v20, %v3735_v19  ;;  %v3453_v63 = vpop.f32.mrf.mxu3 }
 0x67e   : > { %v3229_v24 = vmax.f32 %v3164_v1, 0.0  ;;  %v3454_v26 = vadd.f32 %v6687_v41, %v3453_v63 }
 0x67f   : > { %5055 = vst [vmem:[%s6569_s28 + $0xa8] sm:$0xff] %v4823_v27  }
 0x680   : > { %v3261_v13 = vpack.c.bf16 %v3229_v24, %v3228_v33  ;;  %v3546_v32 = vmul.f32 0.5, %v3454_v26  ;;  %v5331_v17 = vpop.eup %5330 }
 0x681   : > { %v3673_v8 = vadd.f32 1.0, %v5331_v17 }
 0x682   : > { %5332 = vtanh.f32 %v3546_v32  ;;  %3495 = vmatmul.bf16.gmra.mxu3 %v3261_v13 }
 0x683   : > { %v3737_v62 = vmul.f32 0.5, %v3673_v8 }
 0x685   : > { %v3456_v9 = vpop.f32.mrf.mxu3 }
 0x686   : > { %v3457_v7 = vadd.f32 %v6687_v41, %v3456_v9 }
 0x688   : > { %v5333_v23 = vpop.eup %5332  ;;  %v3547_v44 = vmul.f32 0.5, %v3457_v7 }
 0x689   : > { %v3674_v22 = vadd.f32 1.0, %v5333_v23 }
 0x68a   : > { %5334 = vtanh.f32 %v3547_v44 }
 0x68b   : > { %v3738_v40 = vmul.f32 0.5, %v3674_v22 }
 0x68d   : > { %v4828_v3 = vpack.c.bf16 %v3738_v40, %v3737_v62  ;;  %v3458_v36 = vpop.f32.mrf.mxu3 }
 0x68e   : > { %v3459_v37 = vadd.f32 %v6687_v41, %v3458_v36 }
 0x68f   : > { %5056 = vst [vmem:[%s6569_s28 + $0xb0] sm:$0xff] %v4828_v3  }
 0x690   : > { %v3548_v35 = vmul.f32 0.5, %v3459_v37  ;;  %v5335_v38 = vpop.eup %5334 }
 0x691   : > { %v3675_v50 = vadd.f32 1.0, %v5335_v38 }
 0x692   : > { %5336 = vtanh.f32 %v3548_v35 }
 0x693   : > { %v3739_v55 = vmul.f32 0.5, %v3675_v50 }
 0x695   : > { %v3461_v51 = vpop.f32.mrf.mxu3 }
 0x696   : > { %v3462_v39 = vadd.f32 %v6687_v41, %v3461_v51 }
 0x698   : > { %v5337_v61 = vpop.eup %5336  ;;  %v3549_v59 = vmul.f32 0.5, %v3462_v39 }
 0x699   : > { %v3676_v43 = vadd.f32 1.0, %v5337_v61 }
 0x69a   : > { %5338 = vtanh.f32 %v3549_v59 }
 0x69b   : > { %v3740_v10 = vmul.f32 0.5, %v3676_v43 }
 0x69d   : > { %v4833_v16 = vpack.c.bf16 %v3740_v10, %v3739_v55  ;;  %v3463_v45 = vpop.f32.mrf.mxu3 }
 0x69e   : > { %v3464_v42 = vadd.f32 %v6687_v41, %v3463_v45 }
 0x69f   : > { %5057 = vst [vmem:[%s6569_s28 + $0xb8] sm:$0xff] %v4833_v16  }
 0x6a0   : > { %v3550_v52 = vmul.f32 0.5, %v3464_v42  ;;  %v5339_v34 = vpop.eup %5338 }
 0x6a1   : > { %v3677_v25 = vadd.f32 1.0, %v5339_v34 }
 0x6a2   : > { %5340 = vtanh.f32 %v3550_v52 }
 0x6a3   : > { %v3741_v46 = vmul.f32 0.5, %v3677_v25 }
 0x6a5   : > { %v3466_v58 = vpop.f32.mrf.mxu3 }
 0x6a6   : > { %v3467_v56 = vadd.f32 %v6687_v41, %v3466_v58 }
 0x6a8   : > { %v5341_v48 = vpop.eup %5340  ;;  %v3551_v21 = vmul.f32 0.5, %v3467_v56 }
 0x6a9   : > { %v3678_v60 = vadd.f32 1.0, %v5341_v48 }
 0x6aa   : > { %5342 = vtanh.f32 %v3551_v21 }
 0x6ab   : > { %v3742_v47 = vmul.f32 0.5, %v3678_v60 }
 0x6ad   : > { %v4838_v31 = vpack.c.bf16 %v3742_v47, %v3741_v46  ;;  %v3468_v53 = vpop.f32.mrf.mxu3 }
 0x6ae   : > { %v3469_v28 = vadd.f32 %v6687_v41, %v3468_v53 }
 0x6af   : > { %5058 = vst [vmem:[%s6569_s28 + $0xc0] sm:$0xff] %v4838_v31  }
 0x6b0   : > { %v3552_v57 = vmul.f32 0.5, %v3469_v28  ;;  %v5343_v2 = vpop.eup %5342 }
 0x6b1   : > { %v3679_v11 = vadd.f32 1.0, %v5343_v2 }
 0x6b2   : > { %5344 = vtanh.f32 %v3552_v57 }
 0x6b3   : > { %v3743_v15 = vmul.f32 0.5, %v3679_v11 }
 0x6b5   : > { %v3471_v4 = vpop.f32.mrf.mxu3 }
 0x6b6   : > { %v3472_v6 = vadd.f32 %v6687_v41, %v3471_v4 }
 0x6b8   : > { %v5345_v29 = vpop.eup %5344  ;;  %v3553_v54 = vmul.f32 0.5, %v3472_v6 }
 0x6b9   : > { %v3680_v30 = vadd.f32 1.0, %v5345_v29 }
 0x6ba   : > { %5346 = vtanh.f32 %v3553_v54 }
 0x6bb   : > { %v3744_v12 = vmul.f32 0.5, %v3680_v30 }
 0x6bd   : > { %v4843_v5 = vpack.c.bf16 %v3744_v12, %v3743_v15  ;;  %v3473_v14 = vpop.f32.mrf.mxu3 }
 0x6be   : > { %v3474_v49 = vadd.f32 %v6687_v41, %v3473_v14 }
 0x6bf   : > { %5059 = vst [vmem:[%s6569_s28 + $0xc8] sm:$0xff] %v4843_v5  }
 0x6c0   : > { %v3554_v18 = vmul.f32 0.5, %v3474_v49  ;;  %v5347_v19 = vpop.eup %5346 }
 0x6c1   : > { %v3681_v1 = vadd.f32 1.0, %v5347_v19 }
 0x6c2   : > { %5348 = vtanh.f32 %v3554_v18 }
 0x6c3   : > { %v3745_v24 = vmul.f32 0.5, %v3681_v1 }
 0x6c5   : > { %v3476_v20 = vpop.f32.mrf.mxu3 }
 0x6c6   : > { %v3477_v0 = vadd.f32 %v6687_v41, %v3476_v20 }
 0x6c8   : > { %v5349_v27 = vpop.eup %5348  ;;  %v3555_v33 = vmul.f32 0.5, %v3477_v0 }
 0x6c9   : > { %v3682_v63 = vadd.f32 1.0, %v5349_v27 }
 0x6ca   : > { %5350 = vtanh.f32 %v3555_v33 }
 0x6cb   : > { %v3746_v26 = vmul.f32 0.5, %v3682_v63 }
 0x6cd   : > { %v4848_v13 = vpack.c.bf16 %v3746_v26, %v3745_v24  ;;  %v3478_v32 = vpop.f32.mrf.mxu3 }
 0x6ce   : > { %v3479_v17 = vadd.f32 %v6687_v41, %v3478_v32 }
 0x6cf   : > { %5060 = vst [vmem:[%s6569_s28 + $0xd0] sm:$0xff] %v4848_v13  }
 0x6d0   : > { %v3556_v9 = vmul.f32 0.5, %v3479_v17  ;;  %v5351_v7 = vpop.eup %5350 }
 0x6d1   : > { %v3683_v22 = vadd.f32 1.0, %v5351_v7 }
 0x6d2   : > { %5352 = vtanh.f32 %v3556_v9 }
 0x6d3   : > { %v3747_v3 = vmul.f32 0.5, %v3683_v22 }
 0x6d5   : > { %v3481_v8 = vpop.f32.mrf.mxu3 }
 0x6d6   : > { %v3482_v23 = vadd.f32 %v6687_v41, %v3481_v8 }
 0x6d8   : > { %v5353_v44 = vpop.eup %5352  ;;  %v3557_v40 = vmul.f32 0.5, %v3482_v23 }
 0x6d9   : > { %v3684_v62 = vadd.f32 1.0, %v5353_v44 }
 0x6da   : > { %5354 = vtanh.f32 %v3557_v40 }
 0x6db   : > { %v3748_v36 = vmul.f32 0.5, %v3684_v62 }
 0x6dd   : > { %v4853_v37 = vpack.c.bf16 %v3748_v36, %v3747_v3  ;;  %v3483_v35 = vpop.f32.mrf.mxu3 }
 0x6de   : > { %v3484_v38 = vadd.f32 %v6687_v41, %v3483_v35 }
 0x6df   : > { %5061 = vst [vmem:[%s6569_s28 + $0xd8] sm:$0xff] %v4853_v37  }
 0x6e0   : > { %v3558_v51 = vmul.f32 0.5, %v3484_v38  ;;  %v5355_v39 = vpop.eup %5354 }
 0x6e1   : > { %v3685_v43 = vadd.f32 1.0, %v5355_v39 }
 0x6e2   : > { %5356 = vtanh.f32 %v3558_v51 }
 0x6e3   : > { %v3749_v16 = vmul.f32 0.5, %v3685_v43 }
 0x6e5   : > { %v3486_v50 = vpop.f32.mrf.mxu3 }
 0x6e6   : > { %v3487_v61 = vadd.f32 %v6687_v41, %v3486_v50 }
 0x6e8   : > { %v5357_v59 = vpop.eup %5356  ;;  %v3559_v10 = vmul.f32 0.5, %v3487_v61 }
 0x6e9   : > { %v3686_v55 = vadd.f32 1.0, %v5357_v59 }
 0x6ea   : > { %5358 = vtanh.f32 %v3559_v10 }
 0x6eb   : > { %v3750_v45 = vmul.f32 0.5, %v3686_v55 }
 0x6ed   : > { %v4858_v42 = vpack.c.bf16 %v3750_v45, %v3749_v16  ;;  %v3488_v52 = vpop.f32.mrf.mxu3 }
 0x6ee   : > { %v3489_v34 = vadd.f32 %v6687_v41, %v3488_v52 }
 0x6ef   : > { %5062 = vst [vmem:[%s6569_s28 + $0xe0] sm:$0xff] %v4858_v42  }
 0x6f0   : > { %v3560_v58 = vmul.f32 0.5, %v3489_v34  ;;  %v5359_v56 = vpop.eup %5358 }
 0x6f1   : > { %v3687_v60 = vadd.f32 1.0, %v5359_v56 }
 0x6f2   : > { %5360 = vtanh.f32 %v3560_v58 }
 0x6f3   : > { %v3751_v31 = vmul.f32 0.5, %v3687_v60 }
 0x6f5   : > { %v3491_v25 = vpop.f32.mrf.mxu3 }
 0x6f6   : > { %v3492_v48 = vadd.f32 %v6687_v41, %v3491_v25 }
 0x6f8   : > { %v5361_v21 = vpop.eup %5360  ;;  %v3561_v47 = vmul.f32 0.5, %v3492_v48 }
 0x6f9   : > { %v3688_v46 = vadd.f32 1.0, %v5361_v21 }
 0x6fa   : > { %5362 = vtanh.f32 %v3561_v47 }
 0x6fb   : > { %v3752_v53 = vmul.f32 0.5, %v3688_v46 }
 0x6fd   : > { %v4863_v28 = vpack.c.bf16 %v3752_v53, %v3751_v31  ;;  %v3493_v57 = vpop.f32.mrf.mxu3 }
 0x6fe   : > { %v3494_v2 = vadd.f32 %v6687_v41, %v3493_v57 }
 0x6ff   : > { %5063 = vst [vmem:[%s6569_s28 + $0xe8] sm:$0xff] %v4863_v28  }
 0x700   : > { %v3562_v4 = vmul.f32 0.5, %v3494_v2  ;;  %v5363_v6 = vpop.eup %5362 }
 0x701   : > { %v3689_v30 = vadd.f32 1.0, %v5363_v6 }
 0x702   : > { %5364 = vtanh.f32 %v3562_v4 }
 0x703   : > { %v3753_v5 = vmul.f32 0.5, %v3689_v30 }
 0x705   : > { %v3496_v11 = vpop.f32.mrf.mxu3 }
 0x706   : > { %v3497_v29 = vadd.f32 %v6687_v41, %v3496_v11 }
 0x708   : > { %v5365_v54 = vpop.eup %5364  ;;  %v3563_v12 = vmul.f32 0.5, %v3497_v29 }
 0x709   : > { %v3690_v15 = vadd.f32 1.0, %v5365_v54 }
 0x70a   : > { %5366 = vtanh.f32 %v3563_v12 }
 0x70b   : > { %v3754_v14 = vmul.f32 0.5, %v3690_v15 }
 0x70d   : > { %v4868_v49 = vpack.c.bf16 %v3754_v14, %v3753_v5  ;;  %v3498_v18 = vpop.f32.mrf.mxu3 }
 0x70e   : > { %v3499_v19 = vadd.f32 %v6687_v41, %v3498_v18 }
 0x70f   : > { %5064 = vst [vmem:[%s6569_s28 + $0xf0] sm:$0xff] %v4868_v49  }
 0x710   : > { %v3564_v20 = vmul.f32 0.5, %v3499_v19  ;;  %v5367_v0 = vpop.eup %5366 }
 0x711   : > { %v3691_v1 = vadd.f32 1.0, %v5367_v0 }
 0x712   : > { %5368 = vtanh.f32 %v3564_v20 }
 0x713   : > { %v3755_v33 = vmul.f32 0.5, %v3691_v1 }
 0x718   : > { %v5369_v27 = vpop.eup %5368 }
 0x719   : > { %v3692_v63 = vadd.f32 1.0, %v5369_v27 }
 0x71b   : > { %v3756_v24 = vmul.f32 0.5, %v3692_v63 }
 0x71d   : > { %v4873_v26 = vpack.c.bf16 %v3756_v24, %v3755_v33 }
 0x71f   : > { %5065 = vst [vmem:[%s6569_s28 + $0xf8] sm:$0xff] %v4873_v26  }
 0x720 PF: > { %s15_s15 = sadd.s32 1, %s5388_s15  }
 0x721   : > { %p12_p4 = scmp.ge.s32.totalorder %s15_s15, 4  }
 0x723   :  { %14 = sbr.rel (!%p12_p4) target bundleno = 1 (0x1), region = 88 }

</bundles_post_ra>
